<compile_context>
chip_gen: v5e
topology: v5e:2x2
jax: 0.10.0
libtpu: 0.0.40
codegen_flags: <defaults>
</compile_context>

<pallas_src>
import functools
import math

import numpy as np
import jax
import jax.numpy as jnp
from jax import lax
from jax.experimental import pallas as pl
from jax.experimental.pallas import tpu as pltpu  # noqa: F401  (TPU tuning hooks)

EPS = float(np.finfo(np.float32).eps)

# ---------------- small config consistent with the module ----------------
BATCH = 2
NUM_NODE = 8
NUM_ATOM = 8                      # module sets input_dim = num_atom
HIDDEN_DIM = [32, 32]
OUTPUT_DIM = 4
NUM_LAYER = 2
NUM_EDGETYPE = 2                  # L carries E + 1 = 3 operator slices
SHORT_DIFFUSION_DIST = (1, 2)
LONG_DIFFUSION_DIST = (1, 2)
NUM_EIG_VEC = 8
LANCZOS_LB = 1e-4
DROPOUT = 0.0                     # eval-mode / zero dropout -> no-op
# spectral_filter_kind != 'MLP'  -> Q T^s Q^T branch


def _nn_dot(a, b):
    return jnp.dot(a, b, preferred_element_type=jnp.float32)


# --------------------------------------------------------------------------
# Single fused kernel: embedding -> Laplacian -> Lanczos -> spectral filters
# -> all propagation layers -> attention head -> per-graph score.
# --------------------------------------------------------------------------
def _fused_forward_kernel(*refs, batch, num_layer, num_eig_vec, short_dist,
                          long_dist, num_edgetype):
    node_ref, emb_ref, lops_ref, qinit_ref = refs[0:4]
    layer_refs = refs[4:4 + 2 * num_layer]
    wo_ref, bo_ref, wa_ref, ba_ref = refs[4 + 2 * num_layer:4 + 2 * num_layer + 4]
    score_ref = refs[-1]

    B = batch
    N = lops_ref.shape[1]
    A = emb_ref.shape[0]
    K = min(N, num_eig_vec)
    S = len(long_dist)
    max_long = max(long_dist) if long_dist else 0
    max_short = max(short_dist) if short_dist else 0

    # Constant index masks, hoisted out of the (unrolled) batch loop.
    row_kk = lax.broadcasted_iota(jnp.int32, (K, K), 0)
    col_kk = lax.broadcasted_iota(jnp.int32, (K, K), 1)
    col_1k = lax.broadcasted_iota(jnp.int32, (1, K), 1)
    row_n1 = lax.broadcasted_iota(jnp.int32, (N, 1), 0).astype(jnp.float32)
    atom_iota = lax.broadcasted_iota(jnp.int32, (N, A), 1)
    diag_masks = [((row_kk == k) & (col_kk == k)).astype(jnp.float32)
                  for k in range(K)]
    offd_masks = [(((row_kk == k) & (col_kk == k + 1)) |
                   ((row_kk == k + 1) & (col_kk == k))).astype(jnp.float32)
                  for k in range(K - 1)]
    qcol_masks = [(col_1k == k).astype(jnp.float32) for k in range(K)]

    for b in range(B):                 # B = 2: unrolled, all values stay in VMEM
        # ---- embedding gather as one-hot matmul ---------------------------
        idx = node_ref[b]                                      # (N, 1) int32
        one_hot = (idx == atom_iota).astype(jnp.float32)       # (N, A)
        x0 = _nn_dot(one_hot, emb_ref[...])                    # (N, D0)

        L0 = lops_ref[0 * B + b]                               # (N, N) edge-type 0

        # ---- layer-invariant spectral filters Lf_s = Q T^s Q^T ------------
        lf_list = []
        if long_dist:
            # adaptive graph Laplacian (no HBM round-trip)
            adj = (L0 != 0.0).astype(jnp.float32)
            sq = jnp.sum(x0 * x0, axis=1, keepdims=True)       # (N, 1)
            gram = _nn_dot(x0, x0.T)                           # (N, N)
            dist2 = jnp.maximum(sq + sq.T - 2.0 * gram, 0.0)   # ||xi - xj||^2
            # EPS guard: the reference divides by mean(dist2) unguarded and
            # would NaN for degenerate (all-identical) embeddings; no other change.
            sigma2 = jnp.maximum(jnp.mean(dist2), EPS)
            Aff = jnp.exp(-dist2 / sigma2) * adj
            row_sum = jnp.sum(Aff, axis=1, keepdims=True)
            pad = jnp.where(row_sum == 0.0, 1.0, 0.0)
            dsc = 1.0 / jnp.sqrt(row_sum + pad)                # alpha = 0.5
            Le = dsc * Aff * dsc.T                             # (N, N)

            # K-step Lanczos tridiagonalisation (strictly sequential)
            q0 = qinit_ref[b]                                  # (N, 1)
            q_cur = q0 / jnp.sqrt(jnp.sum(q0 * q0))
            q_prev = jnp.zeros((N, 1), jnp.float32)
            beta_prev = jnp.float32(0.0)
            vmask = jnp.float32(1.0)
            alphas, betas, valids, q_cols = [], [], [], []
            for _ in range(K):
                q_cols.append(q_cur)
                z = _nn_dot(Le, q_cur)                         # (N, 1)
                alpha = jnp.sum(q_cur * z)
                z = z - alpha * q_cur - beta_prev * q_prev
                # TODO(synk): reference re-orthogonalisation uses out-of-place
                # Tensor.sub/div whose results are discarded (a no-op) -> skipped.
                beta = jnp.sqrt(jnp.sum(z * z))
                vmask = vmask * (beta >= LANCZOS_LB).astype(jnp.float32)
                q_next = z * vmask / (beta + EPS)
                alphas.append(alpha)
                betas.append(beta)
                valids.append(vmask)
                q_prev, q_cur, beta_prev = q_cur, q_next, beta

            # tridiagonal T (K x K) from masked scalars
            T = jnp.zeros((K, K), jnp.float32)
            for k in range(K):
                T = T + (alphas[k] * valids[k]) * diag_masks[k]
            for k in range(K - 1):
                T = T + (betas[k] * valids[k]) * offd_masks[k]

            # Q (N x K): column validity mask + row (idx_mask) zeroing
            Q = jnp.zeros((N, K), jnp.float32)
            for k in range(K):
                Q = Q + (q_cols[k] * valids[k]) * qcol_masks[k]
            idx_mask = jnp.float32(0.0)
            for k in range(K):
                idx_mask = idx_mask + valids[k]
            Q = Q * (row_n1 < idx_mask).astype(jnp.float32)
            # K == num_eig_vec here; zero-padding T/Q (K < num_eig_vec case)
            # would not change Q T^s Q^T, so no explicit pad is required.

            TT = T
            for ii in range(1, max_long + 1):
                if ii in long_dist:
                    lf_list.append(_nn_dot(_nn_dot(Q, TT), Q.T))
                if ii < max_long:
                    TT = _nn_dot(TT, T)

        # ---- propagation layers (unrolled) --------------------------------
        x = x0
        for tt in range(num_layer):
            w_ref = layer_refs[2 * tt]
            bias = layer_refs[2 * tt + 1][...]                 # (1, d_out)
            d_in = x.shape[1]
            d_out = w_ref.shape[1]
            acc = jnp.zeros((N, d_out), jnp.float32)
            blk = 0

            def w_block(i, _w=w_ref, _d=d_in):
                # static block-row slice of the filter weight (one per scale)
                return _w[pl.ds(i * _d, _d), :]

            l0x = _nn_dot(L0, x)       # reused for short-dist 1 AND edge-type 0
            # short diffusion messages: L0^k @ state
            if short_dist:
                tmp = l0x
                if 1 in short_dist:
                    acc = acc + _nn_dot(tmp, w_block(blk))
                    blk += 1
                for ii in range(2, max_short + 1):
                    tmp = _nn_dot(L0, tmp)
                    if ii in short_dist:
                        acc = acc + _nn_dot(tmp, w_block(blk))
                        blk += 1
            # long (spectral) messages: (Q T^s Q^T) @ state
            for s in range(S):
                acc = acc + _nn_dot(_nn_dot(lf_list[s], x), w_block(blk))
                blk += 1
            # edge-type messages: L_e @ state
            for ee in range(num_edgetype + 1):
                m = l0x if ee == 0 else _nn_dot(lops_ref[ee * B + b], x)
                acc = acc + _nn_dot(m, w_block(blk))
                blk += 1

            x = jnp.maximum(acc + bias, 0.0)                   # bias + ReLU
            # dropout == 0.0 (eval mode) -> no-op

        # ---- output head: Linear + sigmoid attention gate + node mean -----
        y = _nn_dot(x, wo_ref[...]) + bo_ref[...]              # (N, P)
        att = _nn_dot(x, wa_ref[...]) + ba_ref[...]            # (N, 1)
        att = 1.0 / (1.0 + jnp.exp(-att))                      # sigmoid gate
        score_ref[pl.ds(b, 1), :] = jnp.mean(att * y, axis=0, keepdims=True)


# --------------------------- parameters & forward --------------------------
def xavier_uniform(key, fan_in, fan_out):
    limit = math.sqrt(6.0 / (fan_in + fan_out))
    return jax.random.uniform(key, (fan_in, fan_out), jnp.float32, -limit, limit)


def init_params(key):
    dim_list = [NUM_ATOM] + HIDDEN_DIM + [OUTPUT_DIM]
    num_scale = (len(SHORT_DIFFUSION_DIST) + len(LONG_DIFFUSION_DIST)
                 + NUM_EDGETYPE + 1)
    keys = jax.random.split(key, NUM_LAYER + 3)
    params = {
        "embedding": jax.random.normal(keys[0], (NUM_ATOM, NUM_ATOM), jnp.float32),
        "filter_w": [], "filter_b": [],
    }
    for tt in range(NUM_LAYER):
        fin = dim_list[tt] * num_scale
        fout = dim_list[tt + 1]
        params["filter_w"].append(xavier_uniform(keys[1 + tt], fin, fout))
        params["filter_b"].append(jnp.zeros((fout,), jnp.float32))
    params["out_w"] = xavier_uniform(keys[1 + NUM_LAYER], dim_list[-2], dim_list[-1])
    params["out_b"] = jnp.zeros((dim_list[-1],), jnp.float32)
    params["att_w"] = xavier_uniform(keys[2 + NUM_LAYER], dim_list[-2], 1)
    params["att_b"] = jnp.zeros((1,), jnp.float32)
    return params


def forward(params, node_feat, L, lanczos_key, mask=None):
    # TODO(synk): mask-conditioned Lanczos / masked node mean (mask=None path only).
    B, N = node_feat.shape
    E1 = L.shape[-1]
    # One contiguous ((E+1)*B, N, N) copy of the operators up front; no strided
    # L[:, :, :, ee] slices exist inside the kernel.
    l_ops = jnp.transpose(L, (3, 0, 1, 2)).reshape(E1 * B, N, N)
    q_init = jax.random.normal(lanczos_key, (B, N, 1), dtype=jnp.float32)
    node_idx = node_feat.astype(jnp.int32).reshape(B, N, 1)

    inputs = [node_idx, params["embedding"], l_ops, q_init]
    for tt in range(NUM_LAYER):
        inputs.append(params["filter_w"][tt])
        inputs.append(params["filter_b"][tt].reshape(1, -1))
    inputs += [params["out_w"], params["out_b"].reshape(1, -1),
               params["att_w"], params["att_b"].reshape(1, -1)]

    kernel = functools.partial(
        _fused_forward_kernel,
        batch=B,
        num_layer=NUM_LAYER,
        num_eig_vec=NUM_EIG_VEC,
        short_dist=tuple(SHORT_DIFFUSION_DIST),
        long_dist=tuple(LONG_DIFFUSION_DIST),
        num_edgetype=NUM_EDGETYPE,
    )
    # Single fused pallas_call: one launch per forward, everything in VMEM.
    return pl.pallas_call(
        kernel,
        out_shape=jax.ShapeDtypeStruct((B, OUTPUT_DIM), jnp.float32),
    )(*inputs)


if __name__ == "__main__":
    root = jax.random.PRNGKey(0)
    k_param, k_feat, k_L, k_keep, k_lanczos = jax.random.split(root, 5)

    params = init_params(k_param)
    node_feat = jax.random.randint(k_feat, (BATCH, NUM_NODE), 0, NUM_ATOM)
    raw = jax.random.uniform(k_L, (BATCH, NUM_NODE, NUM_NODE, NUM_EDGETYPE + 1),
                             dtype=jnp.float32)
    keep = (jax.random.uniform(k_keep, raw.shape) < 0.7).astype(jnp.float32)
    L = 0.5 * (raw * keep + jnp.swapaxes(raw * keep, 1, 2))     # symmetric operators
    eye = jnp.eye(NUM_NODE, dtype=jnp.float32)[None, :, :]
    L = L.at[:, :, :, 0].set(jnp.maximum(L[:, :, :, 0], eye))   # self loops on slice 0

    fwd = jax.jit(forward)
    score = fwd(params, node_feat, L, k_lanczos)
    jax.block_until_ready(score)
    assert score.shape == (BATCH, OUTPUT_DIM)
    assert bool(jnp.all(jnp.isfinite(score)))
    print("KERNEL_OK")
</pallas_src>

<mosaic_0001>
module attributes {stable_mosaic.version = 11 : i64} {
  func.func @_fused_forward_kernel(%arg0: memref<2x8x1xi32, #tpu.memory_space<vmem>>, %arg1: memref<8x8xf32, #tpu.memory_space<vmem>>, %arg2: memref<6x8x8xf32, #tpu.memory_space<vmem>>, %arg3: memref<2x8x1xf32, #tpu.memory_space<vmem>>, %arg4: memref<56x32xf32, #tpu.memory_space<vmem>>, %arg5: memref<1x32xf32, #tpu.memory_space<vmem>>, %arg6: memref<224x32xf32, #tpu.memory_space<vmem>>, %arg7: memref<1x32xf32, #tpu.memory_space<vmem>>, %arg8: memref<32x4xf32, #tpu.memory_space<vmem>>, %arg9: memref<1x4xf32, #tpu.memory_space<vmem>>, %arg10: memref<32x1xf32, #tpu.memory_space<vmem>>, %arg11: memref<1x1xf32, #tpu.memory_space<vmem>>, %arg12: memref<2x4xf32, #tpu.memory_space<vmem>>) attributes {dimension_semantics = [], scalar_prefetch = 0 : i64, scratch_operands = 0 : i64, tpu.core_type = #tpu.core_type<tc>} {
    %0 = tpu.iota {dimensions = array<i32: 0>} : vector<8x8xi32>
    %1 = tpu.iota {dimensions = array<i32: 1>} : vector<8x8xi32>
    %2 = tpu.iota {dimensions = array<i32: 1>} : vector<1x8xi32>
    %3 = tpu.iota {dimensions = array<i32: 0>} : vector<8x1xi32>
    %4 = arith.sitofp %3 : vector<8x1xi32> to vector<8x1xf32>
    %5 = tpu.iota {dimensions = array<i32: 1>} : vector<8x8xi32>
    %c0_i32 = arith.constant 0 : i32
    %6 = vector.broadcast %c0_i32 : i32 to vector<8x8xi32>
    %7 = arith.cmpi eq, %0, %6 : vector<8x8xi32>
    %c0_i32_0 = arith.constant 0 : i32
    %8 = vector.broadcast %c0_i32_0 : i32 to vector<8x8xi32>
    %9 = arith.cmpi eq, %1, %8 : vector<8x8xi32>
    %10 = arith.andi %7, %9 : vector<8x8xi1>
    %11 = arith.extui %10 : vector<8x8xi1> to vector<8x8xi32>
    %12 = arith.sitofp %11 : vector<8x8xi32> to vector<8x8xf32>
    %c1_i32 = arith.constant 1 : i32
    %13 = vector.broadcast %c1_i32 : i32 to vector<8x8xi32>
    %14 = arith.cmpi eq, %0, %13 : vector<8x8xi32>
    %c1_i32_1 = arith.constant 1 : i32
    %15 = vector.broadcast %c1_i32_1 : i32 to vector<8x8xi32>
    %16 = arith.cmpi eq, %1, %15 : vector<8x8xi32>
    %17 = arith.andi %14, %16 : vector<8x8xi1>
    %18 = arith.extui %17 : vector<8x8xi1> to vector<8x8xi32>
    %19 = arith.sitofp %18 : vector<8x8xi32> to vector<8x8xf32>
    %c2_i32 = arith.constant 2 : i32
    %20 = vector.broadcast %c2_i32 : i32 to vector<8x8xi32>
    %21 = arith.cmpi eq, %0, %20 : vector<8x8xi32>
    %c2_i32_2 = arith.constant 2 : i32
    %22 = vector.broadcast %c2_i32_2 : i32 to vector<8x8xi32>
    %23 = arith.cmpi eq, %1, %22 : vector<8x8xi32>
    %24 = arith.andi %21, %23 : vector<8x8xi1>
    %25 = arith.extui %24 : vector<8x8xi1> to vector<8x8xi32>
    %26 = arith.sitofp %25 : vector<8x8xi32> to vector<8x8xf32>
    %c3_i32 = arith.constant 3 : i32
    %27 = vector.broadcast %c3_i32 : i32 to vector<8x8xi32>
    %28 = arith.cmpi eq, %0, %27 : vector<8x8xi32>
    %c3_i32_3 = arith.constant 3 : i32
    %29 = vector.broadcast %c3_i32_3 : i32 to vector<8x8xi32>
    %30 = arith.cmpi eq, %1, %29 : vector<8x8xi32>
    %31 = arith.andi %28, %30 : vector<8x8xi1>
    %32 = arith.extui %31 : vector<8x8xi1> to vector<8x8xi32>
    %33 = arith.sitofp %32 : vector<8x8xi32> to vector<8x8xf32>
    %c4_i32 = arith.constant 4 : i32
    %34 = vector.broadcast %c4_i32 : i32 to vector<8x8xi32>
    %35 = arith.cmpi eq, %0, %34 : vector<8x8xi32>
    %c4_i32_4 = arith.constant 4 : i32
    %36 = vector.broadcast %c4_i32_4 : i32 to vector<8x8xi32>
    %37 = arith.cmpi eq, %1, %36 : vector<8x8xi32>
    %38 = arith.andi %35, %37 : vector<8x8xi1>
    %39 = arith.extui %38 : vector<8x8xi1> to vector<8x8xi32>
    %40 = arith.sitofp %39 : vector<8x8xi32> to vector<8x8xf32>
    %c5_i32 = arith.constant 5 : i32
    %41 = vector.broadcast %c5_i32 : i32 to vector<8x8xi32>
    %42 = arith.cmpi eq, %0, %41 : vector<8x8xi32>
    %c5_i32_5 = arith.constant 5 : i32
    %43 = vector.broadcast %c5_i32_5 : i32 to vector<8x8xi32>
    %44 = arith.cmpi eq, %1, %43 : vector<8x8xi32>
    %45 = arith.andi %42, %44 : vector<8x8xi1>
    %46 = arith.extui %45 : vector<8x8xi1> to vector<8x8xi32>
    %47 = arith.sitofp %46 : vector<8x8xi32> to vector<8x8xf32>
    %c6_i32 = arith.constant 6 : i32
    %48 = vector.broadcast %c6_i32 : i32 to vector<8x8xi32>
    %49 = arith.cmpi eq, %0, %48 : vector<8x8xi32>
    %c6_i32_6 = arith.constant 6 : i32
    %50 = vector.broadcast %c6_i32_6 : i32 to vector<8x8xi32>
    %51 = arith.cmpi eq, %1, %50 : vector<8x8xi32>
    %52 = arith.andi %49, %51 : vector<8x8xi1>
    %53 = arith.extui %52 : vector<8x8xi1> to vector<8x8xi32>
    %54 = arith.sitofp %53 : vector<8x8xi32> to vector<8x8xf32>
    %c7_i32 = arith.constant 7 : i32
    %55 = vector.broadcast %c7_i32 : i32 to vector<8x8xi32>
    %56 = arith.cmpi eq, %0, %55 : vector<8x8xi32>
    %c7_i32_7 = arith.constant 7 : i32
    %57 = vector.broadcast %c7_i32_7 : i32 to vector<8x8xi32>
    %58 = arith.cmpi eq, %1, %57 : vector<8x8xi32>
    %59 = arith.andi %56, %58 : vector<8x8xi1>
    %60 = arith.extui %59 : vector<8x8xi1> to vector<8x8xi32>
    %61 = arith.sitofp %60 : vector<8x8xi32> to vector<8x8xf32>
    %c0_i32_8 = arith.constant 0 : i32
    %62 = vector.broadcast %c0_i32_8 : i32 to vector<8x8xi32>
    %63 = arith.cmpi eq, %0, %62 : vector<8x8xi32>
    %c1_i32_9 = arith.constant 1 : i32
    %64 = vector.broadcast %c1_i32_9 : i32 to vector<8x8xi32>
    %65 = arith.cmpi eq, %1, %64 : vector<8x8xi32>
    %66 = arith.andi %63, %65 : vector<8x8xi1>
    %c1_i32_10 = arith.constant 1 : i32
    %67 = vector.broadcast %c1_i32_10 : i32 to vector<8x8xi32>
    %68 = arith.cmpi eq, %0, %67 : vector<8x8xi32>
    %c0_i32_11 = arith.constant 0 : i32
    %69 = vector.broadcast %c0_i32_11 : i32 to vector<8x8xi32>
    %70 = arith.cmpi eq, %1, %69 : vector<8x8xi32>
    %71 = arith.andi %68, %70 : vector<8x8xi1>
    %72 = arith.ori %66, %71 : vector<8x8xi1>
    %73 = arith.extui %72 : vector<8x8xi1> to vector<8x8xi32>
    %74 = arith.sitofp %73 : vector<8x8xi32> to vector<8x8xf32>
    %c1_i32_12 = arith.constant 1 : i32
    %75 = vector.broadcast %c1_i32_12 : i32 to vector<8x8xi32>
    %76 = arith.cmpi eq, %0, %75 : vector<8x8xi32>
    %c2_i32_13 = arith.constant 2 : i32
    %77 = vector.broadcast %c2_i32_13 : i32 to vector<8x8xi32>
    %78 = arith.cmpi eq, %1, %77 : vector<8x8xi32>
    %79 = arith.andi %76, %78 : vector<8x8xi1>
    %c2_i32_14 = arith.constant 2 : i32
    %80 = vector.broadcast %c2_i32_14 : i32 to vector<8x8xi32>
    %81 = arith.cmpi eq, %0, %80 : vector<8x8xi32>
    %c1_i32_15 = arith.constant 1 : i32
    %82 = vector.broadcast %c1_i32_15 : i32 to vector<8x8xi32>
    %83 = arith.cmpi eq, %1, %82 : vector<8x8xi32>
    %84 = arith.andi %81, %83 : vector<8x8xi1>
    %85 = arith.ori %79, %84 : vector<8x8xi1>
    %86 = arith.extui %85 : vector<8x8xi1> to vector<8x8xi32>
    %87 = arith.sitofp %86 : vector<8x8xi32> to vector<8x8xf32>
    %c2_i32_16 = arith.constant 2 : i32
    %88 = vector.broadcast %c2_i32_16 : i32 to vector<8x8xi32>
    %89 = arith.cmpi eq, %0, %88 : vector<8x8xi32>
    %c3_i32_17 = arith.constant 3 : i32
    %90 = vector.broadcast %c3_i32_17 : i32 to vector<8x8xi32>
    %91 = arith.cmpi eq, %1, %90 : vector<8x8xi32>
    %92 = arith.andi %89, %91 : vector<8x8xi1>
    %c3_i32_18 = arith.constant 3 : i32
    %93 = vector.broadcast %c3_i32_18 : i32 to vector<8x8xi32>
    %94 = arith.cmpi eq, %0, %93 : vector<8x8xi32>
    %c2_i32_19 = arith.constant 2 : i32
    %95 = vector.broadcast %c2_i32_19 : i32 to vector<8x8xi32>
    %96 = arith.cmpi eq, %1, %95 : vector<8x8xi32>
    %97 = arith.andi %94, %96 : vector<8x8xi1>
    %98 = arith.ori %92, %97 : vector<8x8xi1>
    %99 = arith.extui %98 : vector<8x8xi1> to vector<8x8xi32>
    %100 = arith.sitofp %99 : vector<8x8xi32> to vector<8x8xf32>
    %c3_i32_20 = arith.constant 3 : i32
    %101 = vector.broadcast %c3_i32_20 : i32 to vector<8x8xi32>
    %102 = arith.cmpi eq, %0, %101 : vector<8x8xi32>
    %c4_i32_21 = arith.constant 4 : i32
    %103 = vector.broadcast %c4_i32_21 : i32 to vector<8x8xi32>
    %104 = arith.cmpi eq, %1, %103 : vector<8x8xi32>
    %105 = arith.andi %102, %104 : vector<8x8xi1>
    %c4_i32_22 = arith.constant 4 : i32
    %106 = vector.broadcast %c4_i32_22 : i32 to vector<8x8xi32>
    %107 = arith.cmpi eq, %0, %106 : vector<8x8xi32>
    %c3_i32_23 = arith.constant 3 : i32
    %108 = vector.broadcast %c3_i32_23 : i32 to vector<8x8xi32>
    %109 = arith.cmpi eq, %1, %108 : vector<8x8xi32>
    %110 = arith.andi %107, %109 : vector<8x8xi1>
    %111 = arith.ori %105, %110 : vector<8x8xi1>
    %112 = arith.extui %111 : vector<8x8xi1> to vector<8x8xi32>
    %113 = arith.sitofp %112 : vector<8x8xi32> to vector<8x8xf32>
    %c4_i32_24 = arith.constant 4 : i32
    %114 = vector.broadcast %c4_i32_24 : i32 to vector<8x8xi32>
    %115 = arith.cmpi eq, %0, %114 : vector<8x8xi32>
    %c5_i32_25 = arith.constant 5 : i32
    %116 = vector.broadcast %c5_i32_25 : i32 to vector<8x8xi32>
    %117 = arith.cmpi eq, %1, %116 : vector<8x8xi32>
    %118 = arith.andi %115, %117 : vector<8x8xi1>
    %c5_i32_26 = arith.constant 5 : i32
    %119 = vector.broadcast %c5_i32_26 : i32 to vector<8x8xi32>
    %120 = arith.cmpi eq, %0, %119 : vector<8x8xi32>
    %c4_i32_27 = arith.constant 4 : i32
    %121 = vector.broadcast %c4_i32_27 : i32 to vector<8x8xi32>
    %122 = arith.cmpi eq, %1, %121 : vector<8x8xi32>
    %123 = arith.andi %120, %122 : vector<8x8xi1>
    %124 = arith.ori %118, %123 : vector<8x8xi1>
    %125 = arith.extui %124 : vector<8x8xi1> to vector<8x8xi32>
    %126 = arith.sitofp %125 : vector<8x8xi32> to vector<8x8xf32>
    %c5_i32_28 = arith.constant 5 : i32
    %127 = vector.broadcast %c5_i32_28 : i32 to vector<8x8xi32>
    %128 = arith.cmpi eq, %0, %127 : vector<8x8xi32>
    %c6_i32_29 = arith.constant 6 : i32
    %129 = vector.broadcast %c6_i32_29 : i32 to vector<8x8xi32>
    %130 = arith.cmpi eq, %1, %129 : vector<8x8xi32>
    %131 = arith.andi %128, %130 : vector<8x8xi1>
    %c6_i32_30 = arith.constant 6 : i32
    %132 = vector.broadcast %c6_i32_30 : i32 to vector<8x8xi32>
    %133 = arith.cmpi eq, %0, %132 : vector<8x8xi32>
    %c5_i32_31 = arith.constant 5 : i32
    %134 = vector.broadcast %c5_i32_31 : i32 to vector<8x8xi32>
    %135 = arith.cmpi eq, %1, %134 : vector<8x8xi32>
    %136 = arith.andi %133, %135 : vector<8x8xi1>
    %137 = arith.ori %131, %136 : vector<8x8xi1>
    %138 = arith.extui %137 : vector<8x8xi1> to vector<8x8xi32>
    %139 = arith.sitofp %138 : vector<8x8xi32> to vector<8x8xf32>
    %c6_i32_32 = arith.constant 6 : i32
    %140 = vector.broadcast %c6_i32_32 : i32 to vector<8x8xi32>
    %141 = arith.cmpi eq, %0, %140 : vector<8x8xi32>
    %c7_i32_33 = arith.constant 7 : i32
    %142 = vector.broadcast %c7_i32_33 : i32 to vector<8x8xi32>
    %143 = arith.cmpi eq, %1, %142 : vector<8x8xi32>
    %144 = arith.andi %141, %143 : vector<8x8xi1>
    %c7_i32_34 = arith.constant 7 : i32
    %145 = vector.broadcast %c7_i32_34 : i32 to vector<8x8xi32>
    %146 = arith.cmpi eq, %0, %145 : vector<8x8xi32>
    %c6_i32_35 = arith.constant 6 : i32
    %147 = vector.broadcast %c6_i32_35 : i32 to vector<8x8xi32>
    %148 = arith.cmpi eq, %1, %147 : vector<8x8xi32>
    %149 = arith.andi %146, %148 : vector<8x8xi1>
    %150 = arith.ori %144, %149 : vector<8x8xi1>
    %151 = arith.extui %150 : vector<8x8xi1> to vector<8x8xi32>
    %152 = arith.sitofp %151 : vector<8x8xi32> to vector<8x8xf32>
    %c0_i32_36 = arith.constant 0 : i32
    %153 = vector.broadcast %c0_i32_36 : i32 to vector<1x8xi32>
    %154 = arith.cmpi eq, %2, %153 : vector<1x8xi32>
    %155 = arith.extui %154 : vector<1x8xi1> to vector<1x8xi32>
    %156 = arith.sitofp %155 : vector<1x8xi32> to vector<1x8xf32>
    %c1_i32_37 = arith.constant 1 : i32
    %157 = vector.broadcast %c1_i32_37 : i32 to vector<1x8xi32>
    %158 = arith.cmpi eq, %2, %157 : vector<1x8xi32>
    %159 = arith.extui %158 : vector<1x8xi1> to vector<1x8xi32>
    %160 = arith.sitofp %159 : vector<1x8xi32> to vector<1x8xf32>
    %c2_i32_38 = arith.constant 2 : i32
    %161 = vector.broadcast %c2_i32_38 : i32 to vector<1x8xi32>
    %162 = arith.cmpi eq, %2, %161 : vector<1x8xi32>
    %163 = arith.extui %162 : vector<1x8xi1> to vector<1x8xi32>
    %164 = arith.sitofp %163 : vector<1x8xi32> to vector<1x8xf32>
    %c3_i32_39 = arith.constant 3 : i32
    %165 = vector.broadcast %c3_i32_39 : i32 to vector<1x8xi32>
    %166 = arith.cmpi eq, %2, %165 : vector<1x8xi32>
    %167 = arith.extui %166 : vector<1x8xi1> to vector<1x8xi32>
    %168 = arith.sitofp %167 : vector<1x8xi32> to vector<1x8xf32>
    %c4_i32_40 = arith.constant 4 : i32
    %169 = vector.broadcast %c4_i32_40 : i32 to vector<1x8xi32>
    %170 = arith.cmpi eq, %2, %169 : vector<1x8xi32>
    %171 = arith.extui %170 : vector<1x8xi1> to vector<1x8xi32>
    %172 = arith.sitofp %171 : vector<1x8xi32> to vector<1x8xf32>
    %c5_i32_41 = arith.constant 5 : i32
    %173 = vector.broadcast %c5_i32_41 : i32 to vector<1x8xi32>
    %174 = arith.cmpi eq, %2, %173 : vector<1x8xi32>
    %175 = arith.extui %174 : vector<1x8xi1> to vector<1x8xi32>
    %176 = arith.sitofp %175 : vector<1x8xi32> to vector<1x8xf32>
    %c6_i32_42 = arith.constant 6 : i32
    %177 = vector.broadcast %c6_i32_42 : i32 to vector<1x8xi32>
    %178 = arith.cmpi eq, %2, %177 : vector<1x8xi32>
    %179 = arith.extui %178 : vector<1x8xi1> to vector<1x8xi32>
    %180 = arith.sitofp %179 : vector<1x8xi32> to vector<1x8xf32>
    %c7_i32_43 = arith.constant 7 : i32
    %181 = vector.broadcast %c7_i32_43 : i32 to vector<1x8xi32>
    %182 = arith.cmpi eq, %2, %181 : vector<1x8xi32>
    %183 = arith.extui %182 : vector<1x8xi1> to vector<1x8xi32>
    %184 = arith.sitofp %183 : vector<1x8xi32> to vector<1x8xf32>
    %c0 = arith.constant 0 : index
    %c0_44 = arith.constant 0 : index
    %c0_45 = arith.constant 0 : index
    %185 = vector.load %arg0[%c0, %c0_44, %c0_45] : memref<2x8x1xi32, #tpu.memory_space<vmem>>, vector<1x8x1xi32>
    %186 = vector.shape_cast %185 : vector<1x8x1xi32> to vector<8x1xi32>
    %187 = vector.broadcast %186 : vector<8x1xi32> to vector<8x8xi32>
    %188 = arith.cmpi eq, %187, %5 : vector<8x8xi32>
    %189 = arith.extui %188 : vector<8x8xi1> to vector<8x8xi32>
    %190 = arith.sitofp %189 : vector<8x8xi32> to vector<8x8xf32>
    %c0_46 = arith.constant 0 : index
    %c0_47 = arith.constant 0 : index
    %191 = vector.load %arg1[%c0_46, %c0_47] : memref<8x8xf32, #tpu.memory_space<vmem>>, vector<8x8xf32>
    %cst = arith.constant dense<0.000000e+00> : vector<8x8xf32>
    %192 = tpu.matmul %190, %191, %cst {dimension_numbers = #tpu.dot_dimension_numbers<[1], [0], [0], [1], [0, 0, 1, 1], [], []>} : vector<8x8xf32>, vector<8x8xf32>, vector<8x8xf32> -> vector<8x8xf32>
    %c0_48 = arith.constant 0 : index
    %c0_49 = arith.constant 0 : index
    %c0_50 = arith.constant 0 : index
    %193 = vector.load %arg2[%c0_48, %c0_49, %c0_50] : memref<6x8x8xf32, #tpu.memory_space<vmem>>, vector<1x8x8xf32>
    %194 = vector.shape_cast %193 : vector<1x8x8xf32> to vector<8x8xf32>
    %cst_51 = arith.constant 0.000000e+00 : f32
    %195 = vector.broadcast %cst_51 : f32 to vector<8x8xf32>
    %196 = arith.cmpf one, %194, %195 : vector<8x8xf32>
    %197 = arith.extui %196 : vector<8x8xi1> to vector<8x8xi32>
    %198 = arith.sitofp %197 : vector<8x8xi32> to vector<8x8xf32>
    %199 = arith.mulf %192, %192 : vector<8x8xf32>
    %cst_52 = arith.constant dense<0.000000e+00> : vector<8xf32>
    %200 = vector.multi_reduction <add>, %199, %cst_52 [1] : vector<8x8xf32> to vector<8xf32>
    %201 = vector.shape_cast %200 : vector<8xf32> to vector<8x1xf32>
    %202 = tpu.transpose %192, [1, 0] : vector<8x8xf32> -> vector<8x8xf32>
    %cst_53 = arith.constant dense<0.000000e+00> : vector<8x8xf32>
    %203 = tpu.matmul %192, %202, %cst_53 {dimension_numbers = #tpu.dot_dimension_numbers<[1], [0], [0], [1], [0, 0, 1, 1], [], []>} : vector<8x8xf32>, vector<8x8xf32>, vector<8x8xf32> -> vector<8x8xf32>
    %204 = tpu.transpose %201, [1, 0] : vector<8x1xf32> -> vector<1x8xf32>
    %205 = vector.broadcast %201 : vector<8x1xf32> to vector<8x8xf32>
    %206 = vector.broadcast %204 : vector<1x8xf32> to vector<8x8xf32>
    %207 = arith.addf %205, %206 : vector<8x8xf32>
    %cst_54 = arith.constant 2.000000e+00 : f32
    %208 = vector.broadcast %cst_54 : f32 to vector<8x8xf32>
    %209 = arith.mulf %208, %203 : vector<8x8xf32>
    %210 = arith.subf %207, %209 : vector<8x8xf32>
    %cst_55 = arith.constant 0.000000e+00 : f32
    %211 = vector.broadcast %cst_55 : f32 to vector<8x8xf32>
    %212 = arith.maximumf %210, %211 : vector<8x8xf32>
    %213 = vector.shape_cast %212 : vector<8x8xf32> to vector<1x8x8xf32>
    %cst_56 = arith.constant dense<0.000000e+00> : vector<1xf32>
    %214 = vector.multi_reduction <add>, %213, %cst_56 [1, 2] : vector<1x8x8xf32> to vector<1xf32>
    %215 = vector.shape_cast %214 : vector<1xf32> to vector<1x1x1xf32>
    %216 = vector.extract %215[0, 0, 0] : f32 from vector<1x1x1xf32>
    %cst_57 = arith.constant 6.400000e+01 : f32
    %217 = arith.divf %216, %cst_57 : f32
    %cst_58 = arith.constant 1.1920929E-7 : f32
    %218 = arith.maximumf %217, %cst_58 : f32
    %cst_59 = arith.constant 0.000000e+00 : f32
    %219 = vector.broadcast %cst_59 : f32 to vector<8x8xf32>
    %220 = arith.subf %219, %212 : vector<8x8xf32>
    %221 = vector.broadcast %218 : f32 to vector<8x8xf32>
    %222 = arith.divf %220, %221 : vector<8x8xf32>
    %223 = math.exp %222 : vector<8x8xf32>
    %224 = arith.mulf %223, %198 : vector<8x8xf32>
    %cst_60 = arith.constant dense<0.000000e+00> : vector<8xf32>
    %225 = vector.multi_reduction <add>, %224, %cst_60 [1] : vector<8x8xf32> to vector<8xf32>
    %226 = vector.shape_cast %225 : vector<8xf32> to vector<8x1xf32>
    %cst_61 = arith.constant 0.000000e+00 : f32
    %227 = vector.broadcast %cst_61 : f32 to vector<8x1xf32>
    %228 = arith.cmpf oeq, %226, %227 : vector<8x1xf32>
    %cst_62 = arith.constant 1.000000e+00 : f32
    %cst_63 = arith.constant 0.000000e+00 : f32
    %229 = vector.broadcast %cst_62 : f32 to vector<8x1xf32>
    %230 = vector.broadcast %cst_63 : f32 to vector<8x1xf32>
    %231 = arith.select %228, %229, %230 : vector<8x1xi1>, vector<8x1xf32>
    %232 = arith.addf %226, %231 : vector<8x1xf32>
    %233 = math.sqrt %232 : vector<8x1xf32>
    %cst_64 = arith.constant 1.000000e+00 : f32
    %234 = vector.broadcast %cst_64 : f32 to vector<8x1xf32>
    %235 = arith.divf %234, %233 : vector<8x1xf32>
    %236 = vector.broadcast %235 : vector<8x1xf32> to vector<8x8xf32>
    %237 = arith.mulf %236, %224 : vector<8x8xf32>
    %238 = tpu.transpose %235, [1, 0] : vector<8x1xf32> -> vector<1x8xf32>
    %239 = vector.broadcast %238 : vector<1x8xf32> to vector<8x8xf32>
    %240 = arith.mulf %237, %239 : vector<8x8xf32>
    %c0_65 = arith.constant 0 : index
    %c0_66 = arith.constant 0 : index
    %c0_67 = arith.constant 0 : index
    %241 = vector.load %arg3[%c0_65, %c0_66, %c0_67] : memref<2x8x1xf32, #tpu.memory_space<vmem>>, vector<1x8x1xf32>
    %242 = vector.shape_cast %241 : vector<1x8x1xf32> to vector<8x1xf32>
    %243 = arith.mulf %242, %242 : vector<8x1xf32>
    %244 = vector.shape_cast %243 : vector<8x1xf32> to vector<1x8x1xf32>
    %cst_68 = arith.constant dense<0.000000e+00> : vector<1xf32>
    %245 = vector.multi_reduction <add>, %244, %cst_68 [1, 2] : vector<1x8x1xf32> to vector<1xf32>
    %246 = vector.shape_cast %245 : vector<1xf32> to vector<1x1x1xf32>
    %247 = vector.extract %246[0, 0, 0] : f32 from vector<1x1x1xf32>
    %248 = math.sqrt %247 : f32
    %249 = vector.broadcast %248 : f32 to vector<8x1xf32>
    %250 = arith.divf %242, %249 : vector<8x1xf32>
    %cst_69 = arith.constant 0.000000e+00 : f32
    %251 = vector.broadcast %cst_69 : f32 to vector<8x1xf32>
    %cst_70 = arith.constant dense<0.000000e+00> : vector<8x1xf32>
    %252 = tpu.matmul %240, %250, %cst_70 {dimension_numbers = #tpu.dot_dimension_numbers<[1], [0], [0], [1], [0, 0, 1, 1], [], []>} : vector<8x8xf32>, vector<8x1xf32>, vector<8x1xf32> -> vector<8x1xf32>
    %253 = arith.mulf %250, %252 : vector<8x1xf32>
    %254 = vector.shape_cast %253 : vector<8x1xf32> to vector<1x8x1xf32>
    %cst_71 = arith.constant dense<0.000000e+00> : vector<1xf32>
    %255 = vector.multi_reduction <add>, %254, %cst_71 [1, 2] : vector<1x8x1xf32> to vector<1xf32>
    %256 = vector.shape_cast %255 : vector<1xf32> to vector<1x1x1xf32>
    %257 = vector.extract %256[0, 0, 0] : f32 from vector<1x1x1xf32>
    %258 = vector.broadcast %257 : f32 to vector<8x1xf32>
    %259 = arith.mulf %258, %250 : vector<8x1xf32>
    %260 = arith.subf %252, %259 : vector<8x1xf32>
    %cst_72 = arith.constant 0.000000e+00 : f32
    %261 = vector.broadcast %cst_72 : f32 to vector<8x1xf32>
    %262 = arith.mulf %261, %251 : vector<8x1xf32>
    %263 = arith.subf %260, %262 : vector<8x1xf32>
    %264 = arith.mulf %263, %263 : vector<8x1xf32>
    %265 = vector.shape_cast %264 : vector<8x1xf32> to vector<1x8x1xf32>
    %cst_73 = arith.constant dense<0.000000e+00> : vector<1xf32>
    %266 = vector.multi_reduction <add>, %265, %cst_73 [1, 2] : vector<1x8x1xf32> to vector<1xf32>
    %267 = vector.shape_cast %266 : vector<1xf32> to vector<1x1x1xf32>
    %268 = vector.extract %267[0, 0, 0] : f32 from vector<1x1x1xf32>
    %269 = math.sqrt %268 : f32
    %cst_74 = arith.constant 9.99999974E-5 : f32
    %270 = arith.cmpf oge, %269, %cst_74 : f32
    %271 = arith.extui %270 : i1 to i32
    %272 = arith.sitofp %271 : i32 to f32
    %cst_75 = arith.constant 1.000000e+00 : f32
    %273 = arith.mulf %cst_75, %272 : f32
    %274 = vector.broadcast %273 : f32 to vector<8x1xf32>
    %275 = arith.mulf %263, %274 : vector<8x1xf32>
    %cst_76 = arith.constant 1.1920929E-7 : f32
    %276 = arith.addf %269, %cst_76 : f32
    %277 = vector.broadcast %276 : f32 to vector<8x1xf32>
    %278 = arith.divf %275, %277 : vector<8x1xf32>
    %cst_77 = arith.constant dense<0.000000e+00> : vector<8x1xf32>
    %279 = tpu.matmul %240, %278, %cst_77 {dimension_numbers = #tpu.dot_dimension_numbers<[1], [0], [0], [1], [0, 0, 1, 1], [], []>} : vector<8x8xf32>, vector<8x1xf32>, vector<8x1xf32> -> vector<8x1xf32>
    %280 = arith.mulf %278, %279 : vector<8x1xf32>
    %281 = vector.shape_cast %280 : vector<8x1xf32> to vector<1x8x1xf32>
    %cst_78 = arith.constant dense<0.000000e+00> : vector<1xf32>
    %282 = vector.multi_reduction <add>, %281, %cst_78 [1, 2] : vector<1x8x1xf32> to vector<1xf32>
    %283 = vector.shape_cast %282 : vector<1xf32> to vector<1x1x1xf32>
    %284 = vector.extract %283[0, 0, 0] : f32 from vector<1x1x1xf32>
    %285 = vector.broadcast %284 : f32 to vector<8x1xf32>
    %286 = arith.mulf %285, %278 : vector<8x1xf32>
    %287 = arith.subf %279, %286 : vector<8x1xf32>
    %288 = vector.broadcast %269 : f32 to vector<8x1xf32>
    %289 = arith.mulf %288, %250 : vector<8x1xf32>
    %290 = arith.subf %287, %289 : vector<8x1xf32>
    %291 = arith.mulf %290, %290 : vector<8x1xf32>
    %292 = vector.shape_cast %291 : vector<8x1xf32> to vector<1x8x1xf32>
    %cst_79 = arith.constant dense<0.000000e+00> : vector<1xf32>
    %293 = vector.multi_reduction <add>, %292, %cst_79 [1, 2] : vector<1x8x1xf32> to vector<1xf32>
    %294 = vector.shape_cast %293 : vector<1xf32> to vector<1x1x1xf32>
    %295 = vector.extract %294[0, 0, 0] : f32 from vector<1x1x1xf32>
    %296 = math.sqrt %295 : f32
    %cst_80 = arith.constant 9.99999974E-5 : f32
    %297 = arith.cmpf oge, %296, %cst_80 : f32
    %298 = arith.extui %297 : i1 to i32
    %299 = arith.sitofp %298 : i32 to f32
    %300 = arith.mulf %273, %299 : f32
    %301 = vector.broadcast %300 : f32 to vector<8x1xf32>
    %302 = arith.mulf %290, %301 : vector<8x1xf32>
    %cst_81 = arith.constant 1.1920929E-7 : f32
    %303 = arith.addf %296, %cst_81 : f32
    %304 = vector.broadcast %303 : f32 to vector<8x1xf32>
    %305 = arith.divf %302, %304 : vector<8x1xf32>
    %cst_82 = arith.constant dense<0.000000e+00> : vector<8x1xf32>
    %306 = tpu.matmul %240, %305, %cst_82 {dimension_numbers = #tpu.dot_dimension_numbers<[1], [0], [0], [1], [0, 0, 1, 1], [], []>} : vector<8x8xf32>, vector<8x1xf32>, vector<8x1xf32> -> vector<8x1xf32>
    %307 = arith.mulf %305, %306 : vector<8x1xf32>
    %308 = vector.shape_cast %307 : vector<8x1xf32> to vector<1x8x1xf32>
    %cst_83 = arith.constant dense<0.000000e+00> : vector<1xf32>
    %309 = vector.multi_reduction <add>, %308, %cst_83 [1, 2] : vector<1x8x1xf32> to vector<1xf32>
    %310 = vector.shape_cast %309 : vector<1xf32> to vector<1x1x1xf32>
    %311 = vector.extract %310[0, 0, 0] : f32 from vector<1x1x1xf32>
    %312 = vector.broadcast %311 : f32 to vector<8x1xf32>
    %313 = arith.mulf %312, %305 : vector<8x1xf32>
    %314 = arith.subf %306, %313 : vector<8x1xf32>
    %315 = vector.broadcast %296 : f32 to vector<8x1xf32>
    %316 = arith.mulf %315, %278 : vector<8x1xf32>
    %317 = arith.subf %314, %316 : vector<8x1xf32>
    %318 = arith.mulf %317, %317 : vector<8x1xf32>
    %319 = vector.shape_cast %318 : vector<8x1xf32> to vector<1x8x1xf32>
    %cst_84 = arith.constant dense<0.000000e+00> : vector<1xf32>
    %320 = vector.multi_reduction <add>, %319, %cst_84 [1, 2] : vector<1x8x1xf32> to vector<1xf32>
    %321 = vector.shape_cast %320 : vector<1xf32> to vector<1x1x1xf32>
    %322 = vector.extract %321[0, 0, 0] : f32 from vector<1x1x1xf32>
    %323 = math.sqrt %322 : f32
    %cst_85 = arith.constant 9.99999974E-5 : f32
    %324 = arith.cmpf oge, %323, %cst_85 : f32
    %325 = arith.extui %324 : i1 to i32
    %326 = arith.sitofp %325 : i32 to f32
    %327 = arith.mulf %300, %326 : f32
    %328 = vector.broadcast %327 : f32 to vector<8x1xf32>
    %329 = arith.mulf %317, %328 : vector<8x1xf32>
    %cst_86 = arith.constant 1.1920929E-7 : f32
    %330 = arith.addf %323, %cst_86 : f32
    %331 = vector.broadcast %330 : f32 to vector<8x1xf32>
    %332 = arith.divf %329, %331 : vector<8x1xf32>
    %cst_87 = arith.constant dense<0.000000e+00> : vector<8x1xf32>
    %333 = tpu.matmul %240, %332, %cst_87 {dimension_numbers = #tpu.dot_dimension_numbers<[1], [0], [0], [1], [0, 0, 1, 1], [], []>} : vector<8x8xf32>, vector<8x1xf32>, vector<8x1xf32> -> vector<8x1xf32>
    %334 = arith.mulf %332, %333 : vector<8x1xf32>
    %335 = vector.shape_cast %334 : vector<8x1xf32> to vector<1x8x1xf32>
    %cst_88 = arith.constant dense<0.000000e+00> : vector<1xf32>
    %336 = vector.multi_reduction <add>, %335, %cst_88 [1, 2] : vector<1x8x1xf32> to vector<1xf32>
    %337 = vector.shape_cast %336 : vector<1xf32> to vector<1x1x1xf32>
    %338 = vector.extract %337[0, 0, 0] : f32 from vector<1x1x1xf32>
    %339 = vector.broadcast %338 : f32 to vector<8x1xf32>
    %340 = arith.mulf %339, %332 : vector<8x1xf32>
    %341 = arith.subf %333, %340 : vector<8x1xf32>
    %342 = vector.broadcast %323 : f32 to vector<8x1xf32>
    %343 = arith.mulf %342, %305 : vector<8x1xf32>
    %344 = arith.subf %341, %343 : vector<8x1xf32>
    %345 = arith.mulf %344, %344 : vector<8x1xf32>
    %346 = vector.shape_cast %345 : vector<8x1xf32> to vector<1x8x1xf32>
    %cst_89 = arith.constant dense<0.000000e+00> : vector<1xf32>
    %347 = vector.multi_reduction <add>, %346, %cst_89 [1, 2] : vector<1x8x1xf32> to vector<1xf32>
    %348 = vector.shape_cast %347 : vector<1xf32> to vector<1x1x1xf32>
    %349 = vector.extract %348[0, 0, 0] : f32 from vector<1x1x1xf32>
    %350 = math.sqrt %349 : f32
    %cst_90 = arith.constant 9.99999974E-5 : f32
    %351 = arith.cmpf oge, %350, %cst_90 : f32
    %352 = arith.extui %351 : i1 to i32
    %353 = arith.sitofp %352 : i32 to f32
    %354 = arith.mulf %327, %353 : f32
    %355 = vector.broadcast %354 : f32 to vector<8x1xf32>
    %356 = arith.mulf %344, %355 : vector<8x1xf32>
    %cst_91 = arith.constant 1.1920929E-7 : f32
    %357 = arith.addf %350, %cst_91 : f32
    %358 = vector.broadcast %357 : f32 to vector<8x1xf32>
    %359 = arith.divf %356, %358 : vector<8x1xf32>
    %cst_92 = arith.constant dense<0.000000e+00> : vector<8x1xf32>
    %360 = tpu.matmul %240, %359, %cst_92 {dimension_numbers = #tpu.dot_dimension_numbers<[1], [0], [0], [1], [0, 0, 1, 1], [], []>} : vector<8x8xf32>, vector<8x1xf32>, vector<8x1xf32> -> vector<8x1xf32>
    %361 = arith.mulf %359, %360 : vector<8x1xf32>
    %362 = vector.shape_cast %361 : vector<8x1xf32> to vector<1x8x1xf32>
    %cst_93 = arith.constant dense<0.000000e+00> : vector<1xf32>
    %363 = vector.multi_reduction <add>, %362, %cst_93 [1, 2] : vector<1x8x1xf32> to vector<1xf32>
    %364 = vector.shape_cast %363 : vector<1xf32> to vector<1x1x1xf32>
    %365 = vector.extract %364[0, 0, 0] : f32 from vector<1x1x1xf32>
    %366 = vector.broadcast %365 : f32 to vector<8x1xf32>
    %367 = arith.mulf %366, %359 : vector<8x1xf32>
    %368 = arith.subf %360, %367 : vector<8x1xf32>
    %369 = vector.broadcast %350 : f32 to vector<8x1xf32>
    %370 = arith.mulf %369, %332 : vector<8x1xf32>
    %371 = arith.subf %368, %370 : vector<8x1xf32>
    %372 = arith.mulf %371, %371 : vector<8x1xf32>
    %373 = vector.shape_cast %372 : vector<8x1xf32> to vector<1x8x1xf32>
    %cst_94 = arith.constant dense<0.000000e+00> : vector<1xf32>
    %374 = vector.multi_reduction <add>, %373, %cst_94 [1, 2] : vector<1x8x1xf32> to vector<1xf32>
    %375 = vector.shape_cast %374 : vector<1xf32> to vector<1x1x1xf32>
    %376 = vector.extract %375[0, 0, 0] : f32 from vector<1x1x1xf32>
    %377 = math.sqrt %376 : f32
    %cst_95 = arith.constant 9.99999974E-5 : f32
    %378 = arith.cmpf oge, %377, %cst_95 : f32
    %379 = arith.extui %378 : i1 to i32
    %380 = arith.sitofp %379 : i32 to f32
    %381 = arith.mulf %354, %380 : f32
    %382 = vector.broadcast %381 : f32 to vector<8x1xf32>
    %383 = arith.mulf %371, %382 : vector<8x1xf32>
    %cst_96 = arith.constant 1.1920929E-7 : f32
    %384 = arith.addf %377, %cst_96 : f32
    %385 = vector.broadcast %384 : f32 to vector<8x1xf32>
    %386 = arith.divf %383, %385 : vector<8x1xf32>
    %cst_97 = arith.constant dense<0.000000e+00> : vector<8x1xf32>
    %387 = tpu.matmul %240, %386, %cst_97 {dimension_numbers = #tpu.dot_dimension_numbers<[1], [0], [0], [1], [0, 0, 1, 1], [], []>} : vector<8x8xf32>, vector<8x1xf32>, vector<8x1xf32> -> vector<8x1xf32>
    %388 = arith.mulf %386, %387 : vector<8x1xf32>
    %389 = vector.shape_cast %388 : vector<8x1xf32> to vector<1x8x1xf32>
    %cst_98 = arith.constant dense<0.000000e+00> : vector<1xf32>
    %390 = vector.multi_reduction <add>, %389, %cst_98 [1, 2] : vector<1x8x1xf32> to vector<1xf32>
    %391 = vector.shape_cast %390 : vector<1xf32> to vector<1x1x1xf32>
    %392 = vector.extract %391[0, 0, 0] : f32 from vector<1x1x1xf32>
    %393 = vector.broadcast %392 : f32 to vector<8x1xf32>
    %394 = arith.mulf %393, %386 : vector<8x1xf32>
    %395 = arith.subf %387, %394 : vector<8x1xf32>
    %396 = vector.broadcast %377 : f32 to vector<8x1xf32>
    %397 = arith.mulf %396, %359 : vector<8x1xf32>
    %398 = arith.subf %395, %397 : vector<8x1xf32>
    %399 = arith.mulf %398, %398 : vector<8x1xf32>
    %400 = vector.shape_cast %399 : vector<8x1xf32> to vector<1x8x1xf32>
    %cst_99 = arith.constant dense<0.000000e+00> : vector<1xf32>
    %401 = vector.multi_reduction <add>, %400, %cst_99 [1, 2] : vector<1x8x1xf32> to vector<1xf32>
    %402 = vector.shape_cast %401 : vector<1xf32> to vector<1x1x1xf32>
    %403 = vector.extract %402[0, 0, 0] : f32 from vector<1x1x1xf32>
    %404 = math.sqrt %403 : f32
    %cst_100 = arith.constant 9.99999974E-5 : f32
    %405 = arith.cmpf oge, %404, %cst_100 : f32
    %406 = arith.extui %405 : i1 to i32
    %407 = arith.sitofp %406 : i32 to f32
    %408 = arith.mulf %381, %407 : f32
    %409 = vector.broadcast %408 : f32 to vector<8x1xf32>
    %410 = arith.mulf %398, %409 : vector<8x1xf32>
    %cst_101 = arith.constant 1.1920929E-7 : f32
    %411 = arith.addf %404, %cst_101 : f32
    %412 = vector.broadcast %411 : f32 to vector<8x1xf32>
    %413 = arith.divf %410, %412 : vector<8x1xf32>
    %cst_102 = arith.constant dense<0.000000e+00> : vector<8x1xf32>
    %414 = tpu.matmul %240, %413, %cst_102 {dimension_numbers = #tpu.dot_dimension_numbers<[1], [0], [0], [1], [0, 0, 1, 1], [], []>} : vector<8x8xf32>, vector<8x1xf32>, vector<8x1xf32> -> vector<8x1xf32>
    %415 = arith.mulf %413, %414 : vector<8x1xf32>
    %416 = vector.shape_cast %415 : vector<8x1xf32> to vector<1x8x1xf32>
    %cst_103 = arith.constant dense<0.000000e+00> : vector<1xf32>
    %417 = vector.multi_reduction <add>, %416, %cst_103 [1, 2] : vector<1x8x1xf32> to vector<1xf32>
    %418 = vector.shape_cast %417 : vector<1xf32> to vector<1x1x1xf32>
    %419 = vector.extract %418[0, 0, 0] : f32 from vector<1x1x1xf32>
    %420 = vector.broadcast %419 : f32 to vector<8x1xf32>
    %421 = arith.mulf %420, %413 : vector<8x1xf32>
    %422 = arith.subf %414, %421 : vector<8x1xf32>
    %423 = vector.broadcast %404 : f32 to vector<8x1xf32>
    %424 = arith.mulf %423, %386 : vector<8x1xf32>
    %425 = arith.subf %422, %424 : vector<8x1xf32>
    %426 = arith.mulf %425, %425 : vector<8x1xf32>
    %427 = vector.shape_cast %426 : vector<8x1xf32> to vector<1x8x1xf32>
    %cst_104 = arith.constant dense<0.000000e+00> : vector<1xf32>
    %428 = vector.multi_reduction <add>, %427, %cst_104 [1, 2] : vector<1x8x1xf32> to vector<1xf32>
    %429 = vector.shape_cast %428 : vector<1xf32> to vector<1x1x1xf32>
    %430 = vector.extract %429[0, 0, 0] : f32 from vector<1x1x1xf32>
    %431 = math.sqrt %430 : f32
    %cst_105 = arith.constant 9.99999974E-5 : f32
    %432 = arith.cmpf oge, %431, %cst_105 : f32
    %433 = arith.extui %432 : i1 to i32
    %434 = arith.sitofp %433 : i32 to f32
    %435 = arith.mulf %408, %434 : f32
    %436 = vector.broadcast %435 : f32 to vector<8x1xf32>
    %437 = arith.mulf %425, %436 : vector<8x1xf32>
    %cst_106 = arith.constant 1.1920929E-7 : f32
    %438 = arith.addf %431, %cst_106 : f32
    %439 = vector.broadcast %438 : f32 to vector<8x1xf32>
    %440 = arith.divf %437, %439 : vector<8x1xf32>
    %cst_107 = arith.constant dense<0.000000e+00> : vector<8x1xf32>
    %441 = tpu.matmul %240, %440, %cst_107 {dimension_numbers = #tpu.dot_dimension_numbers<[1], [0], [0], [1], [0, 0, 1, 1], [], []>} : vector<8x8xf32>, vector<8x1xf32>, vector<8x1xf32> -> vector<8x1xf32>
    %442 = arith.mulf %440, %441 : vector<8x1xf32>
    %443 = vector.shape_cast %442 : vector<8x1xf32> to vector<1x8x1xf32>
    %cst_108 = arith.constant dense<0.000000e+00> : vector<1xf32>
    %444 = vector.multi_reduction <add>, %443, %cst_108 [1, 2] : vector<1x8x1xf32> to vector<1xf32>
    %445 = vector.shape_cast %444 : vector<1xf32> to vector<1x1x1xf32>
    %446 = vector.extract %445[0, 0, 0] : f32 from vector<1x1x1xf32>
    %447 = vector.broadcast %446 : f32 to vector<8x1xf32>
    %448 = arith.mulf %447, %440 : vector<8x1xf32>
    %449 = arith.subf %441, %448 : vector<8x1xf32>
    %450 = vector.broadcast %431 : f32 to vector<8x1xf32>
    %451 = arith.mulf %450, %413 : vector<8x1xf32>
    %452 = arith.subf %449, %451 : vector<8x1xf32>
    %453 = arith.mulf %452, %452 : vector<8x1xf32>
    %454 = vector.shape_cast %453 : vector<8x1xf32> to vector<1x8x1xf32>
    %cst_109 = arith.constant dense<0.000000e+00> : vector<1xf32>
    %455 = vector.multi_reduction <add>, %454, %cst_109 [1, 2] : vector<1x8x1xf32> to vector<1xf32>
    %456 = vector.shape_cast %455 : vector<1xf32> to vector<1x1x1xf32>
    %457 = vector.extract %456[0, 0, 0] : f32 from vector<1x1x1xf32>
    %458 = math.sqrt %457 : f32
    %cst_110 = arith.constant 9.99999974E-5 : f32
    %459 = arith.cmpf oge, %458, %cst_110 : f32
    %460 = arith.extui %459 : i1 to i32
    %461 = arith.sitofp %460 : i32 to f32
    %462 = arith.mulf %435, %461 : f32
    %cst_111 = arith.constant 0.000000e+00 : f32
    %463 = vector.broadcast %cst_111 : f32 to vector<8x8xf32>
    %464 = arith.mulf %257, %273 : f32
    %465 = vector.broadcast %464 : f32 to vector<8x8xf32>
    %466 = arith.mulf %465, %12 : vector<8x8xf32>
    %467 = arith.addf %463, %466 : vector<8x8xf32>
    %468 = arith.mulf %284, %300 : f32
    %469 = vector.broadcast %468 : f32 to vector<8x8xf32>
    %470 = arith.mulf %469, %19 : vector<8x8xf32>
    %471 = arith.addf %467, %470 : vector<8x8xf32>
    %472 = arith.mulf %311, %327 : f32
    %473 = vector.broadcast %472 : f32 to vector<8x8xf32>
    %474 = arith.mulf %473, %26 : vector<8x8xf32>
    %475 = arith.addf %471, %474 : vector<8x8xf32>
    %476 = arith.mulf %338, %354 : f32
    %477 = vector.broadcast %476 : f32 to vector<8x8xf32>
    %478 = arith.mulf %477, %33 : vector<8x8xf32>
    %479 = arith.addf %475, %478 : vector<8x8xf32>
    %480 = arith.mulf %365, %381 : f32
    %481 = vector.broadcast %480 : f32 to vector<8x8xf32>
    %482 = arith.mulf %481, %40 : vector<8x8xf32>
    %483 = arith.addf %479, %482 : vector<8x8xf32>
    %484 = arith.mulf %392, %408 : f32
    %485 = vector.broadcast %484 : f32 to vector<8x8xf32>
    %486 = arith.mulf %485, %47 : vector<8x8xf32>
    %487 = arith.addf %483, %486 : vector<8x8xf32>
    %488 = arith.mulf %419, %435 : f32
    %489 = vector.broadcast %488 : f32 to vector<8x8xf32>
    %490 = arith.mulf %489, %54 : vector<8x8xf32>
    %491 = arith.addf %487, %490 : vector<8x8xf32>
    %492 = arith.mulf %446, %462 : f32
    %493 = vector.broadcast %492 : f32 to vector<8x8xf32>
    %494 = arith.mulf %493, %61 : vector<8x8xf32>
    %495 = arith.addf %491, %494 : vector<8x8xf32>
    %496 = arith.mulf %269, %273 : f32
    %497 = vector.broadcast %496 : f32 to vector<8x8xf32>
    %498 = arith.mulf %497, %74 : vector<8x8xf32>
    %499 = arith.addf %495, %498 : vector<8x8xf32>
    %500 = arith.mulf %296, %300 : f32
    %501 = vector.broadcast %500 : f32 to vector<8x8xf32>
    %502 = arith.mulf %501, %87 : vector<8x8xf32>
    %503 = arith.addf %499, %502 : vector<8x8xf32>
    %504 = arith.mulf %323, %327 : f32
    %505 = vector.broadcast %504 : f32 to vector<8x8xf32>
    %506 = arith.mulf %505, %100 : vector<8x8xf32>
    %507 = arith.addf %503, %506 : vector<8x8xf32>
    %508 = arith.mulf %350, %354 : f32
    %509 = vector.broadcast %508 : f32 to vector<8x8xf32>
    %510 = arith.mulf %509, %113 : vector<8x8xf32>
    %511 = arith.addf %507, %510 : vector<8x8xf32>
    %512 = arith.mulf %377, %381 : f32
    %513 = vector.broadcast %512 : f32 to vector<8x8xf32>
    %514 = arith.mulf %513, %126 : vector<8x8xf32>
    %515 = arith.addf %511, %514 : vector<8x8xf32>
    %516 = arith.mulf %404, %408 : f32
    %517 = vector.broadcast %516 : f32 to vector<8x8xf32>
    %518 = arith.mulf %517, %139 : vector<8x8xf32>
    %519 = arith.addf %515, %518 : vector<8x8xf32>
    %520 = arith.mulf %431, %435 : f32
    %521 = vector.broadcast %520 : f32 to vector<8x8xf32>
    %522 = arith.mulf %521, %152 : vector<8x8xf32>
    %523 = arith.addf %519, %522 : vector<8x8xf32>
    %cst_112 = arith.constant 0.000000e+00 : f32
    %524 = vector.broadcast %cst_112 : f32 to vector<8x8xf32>
    %525 = vector.broadcast %273 : f32 to vector<8x1xf32>
    %526 = arith.mulf %250, %525 : vector<8x1xf32>
    %527 = vector.broadcast %526 : vector<8x1xf32> to vector<8x8xf32>
    %528 = vector.broadcast %156 : vector<1x8xf32> to vector<8x8xf32>
    %529 = arith.mulf %527, %528 : vector<8x8xf32>
    %530 = arith.addf %524, %529 : vector<8x8xf32>
    %531 = vector.broadcast %300 : f32 to vector<8x1xf32>
    %532 = arith.mulf %278, %531 : vector<8x1xf32>
    %533 = vector.broadcast %532 : vector<8x1xf32> to vector<8x8xf32>
    %534 = vector.broadcast %160 : vector<1x8xf32> to vector<8x8xf32>
    %535 = arith.mulf %533, %534 : vector<8x8xf32>
    %536 = arith.addf %530, %535 : vector<8x8xf32>
    %537 = vector.broadcast %327 : f32 to vector<8x1xf32>
    %538 = arith.mulf %305, %537 : vector<8x1xf32>
    %539 = vector.broadcast %538 : vector<8x1xf32> to vector<8x8xf32>
    %540 = vector.broadcast %164 : vector<1x8xf32> to vector<8x8xf32>
    %541 = arith.mulf %539, %540 : vector<8x8xf32>
    %542 = arith.addf %536, %541 : vector<8x8xf32>
    %543 = vector.broadcast %354 : f32 to vector<8x1xf32>
    %544 = arith.mulf %332, %543 : vector<8x1xf32>
    %545 = vector.broadcast %544 : vector<8x1xf32> to vector<8x8xf32>
    %546 = vector.broadcast %168 : vector<1x8xf32> to vector<8x8xf32>
    %547 = arith.mulf %545, %546 : vector<8x8xf32>
    %548 = arith.addf %542, %547 : vector<8x8xf32>
    %549 = vector.broadcast %381 : f32 to vector<8x1xf32>
    %550 = arith.mulf %359, %549 : vector<8x1xf32>
    %551 = vector.broadcast %550 : vector<8x1xf32> to vector<8x8xf32>
    %552 = vector.broadcast %172 : vector<1x8xf32> to vector<8x8xf32>
    %553 = arith.mulf %551, %552 : vector<8x8xf32>
    %554 = arith.addf %548, %553 : vector<8x8xf32>
    %555 = vector.broadcast %408 : f32 to vector<8x1xf32>
    %556 = arith.mulf %386, %555 : vector<8x1xf32>
    %557 = vector.broadcast %556 : vector<8x1xf32> to vector<8x8xf32>
    %558 = vector.broadcast %176 : vector<1x8xf32> to vector<8x8xf32>
    %559 = arith.mulf %557, %558 : vector<8x8xf32>
    %560 = arith.addf %554, %559 : vector<8x8xf32>
    %561 = vector.broadcast %435 : f32 to vector<8x1xf32>
    %562 = arith.mulf %413, %561 : vector<8x1xf32>
    %563 = vector.broadcast %562 : vector<8x1xf32> to vector<8x8xf32>
    %564 = vector.broadcast %180 : vector<1x8xf32> to vector<8x8xf32>
    %565 = arith.mulf %563, %564 : vector<8x8xf32>
    %566 = arith.addf %560, %565 : vector<8x8xf32>
    %567 = vector.broadcast %462 : f32 to vector<8x1xf32>
    %568 = arith.mulf %440, %567 : vector<8x1xf32>
    %569 = vector.broadcast %568 : vector<8x1xf32> to vector<8x8xf32>
    %570 = vector.broadcast %184 : vector<1x8xf32> to vector<8x8xf32>
    %571 = arith.mulf %569, %570 : vector<8x8xf32>
    %572 = arith.addf %566, %571 : vector<8x8xf32>
    %cst_113 = arith.constant 0.000000e+00 : f32
    %573 = arith.addf %cst_113, %273 : f32
    %574 = arith.addf %573, %300 : f32
    %575 = arith.addf %574, %327 : f32
    %576 = arith.addf %575, %354 : f32
    %577 = arith.addf %576, %381 : f32
    %578 = arith.addf %577, %408 : f32
    %579 = arith.addf %578, %435 : f32
    %580 = arith.addf %579, %462 : f32
    %581 = vector.broadcast %580 : f32 to vector<8x1xf32>
    %582 = arith.cmpf olt, %4, %581 : vector<8x1xf32>
    %583 = arith.extui %582 : vector<8x1xi1> to vector<8x1xi32>
    %584 = arith.sitofp %583 : vector<8x1xi32> to vector<8x1xf32>
    %585 = vector.broadcast %584 : vector<8x1xf32> to vector<8x8xf32>
    %586 = arith.mulf %572, %585 : vector<8x8xf32>
    %cst_114 = arith.constant dense<0.000000e+00> : vector<8x8xf32>
    %587 = tpu.matmul %586, %523, %cst_114 {dimension_numbers = #tpu.dot_dimension_numbers<[1], [0], [0], [1], [0, 0, 1, 1], [], []>} : vector<8x8xf32>, vector<8x8xf32>, vector<8x8xf32> -> vector<8x8xf32>
    %588 = tpu.transpose %586, [1, 0] : vector<8x8xf32> -> vector<8x8xf32>
    %cst_115 = arith.constant dense<0.000000e+00> : vector<8x8xf32>
    %589 = tpu.matmul %587, %588, %cst_115 {dimension_numbers = #tpu.dot_dimension_numbers<[1], [0], [0], [1], [0, 0, 1, 1], [], []>} : vector<8x8xf32>, vector<8x8xf32>, vector<8x8xf32> -> vector<8x8xf32>
    %cst_116 = arith.constant dense<0.000000e+00> : vector<8x8xf32>
    %590 = tpu.matmul %523, %523, %cst_116 {dimension_numbers = #tpu.dot_dimension_numbers<[1], [0], [0], [1], [0, 0, 1, 1], [], []>} : vector<8x8xf32>, vector<8x8xf32>, vector<8x8xf32> -> vector<8x8xf32>
    %cst_117 = arith.constant dense<0.000000e+00> : vector<8x8xf32>
    %591 = tpu.matmul %586, %590, %cst_117 {dimension_numbers = #tpu.dot_dimension_numbers<[1], [0], [0], [1], [0, 0, 1, 1], [], []>} : vector<8x8xf32>, vector<8x8xf32>, vector<8x8xf32> -> vector<8x8xf32>
    %592 = tpu.transpose %586, [1, 0] : vector<8x8xf32> -> vector<8x8xf32>
    %cst_118 = arith.constant dense<0.000000e+00> : vector<8x8xf32>
    %593 = tpu.matmul %591, %592, %cst_118 {dimension_numbers = #tpu.dot_dimension_numbers<[1], [0], [0], [1], [0, 0, 1, 1], [], []>} : vector<8x8xf32>, vector<8x8xf32>, vector<8x8xf32> -> vector<8x8xf32>
    %c0_119 = arith.constant 0 : index
    %c0_120 = arith.constant 0 : index
    %594 = vector.load %arg5[%c0_119, %c0_120] : memref<1x32xf32, #tpu.memory_space<vmem>>, vector<1x32xf32>
    %cst_121 = arith.constant 0.000000e+00 : f32
    %595 = vector.broadcast %cst_121 : f32 to vector<8x32xf32>
    %cst_122 = arith.constant dense<0.000000e+00> : vector<8x8xf32>
    %596 = tpu.matmul %194, %192, %cst_122 {dimension_numbers = #tpu.dot_dimension_numbers<[1], [0], [0], [1], [0, 0, 1, 1], [], []>} : vector<8x8xf32>, vector<8x8xf32>, vector<8x8xf32> -> vector<8x8xf32>
    %c0_123 = arith.constant 0 : index
    %c0_124 = arith.constant 0 : index
    %597 = vector.load %arg4[%c0_123, %c0_124] : memref<56x32xf32, #tpu.memory_space<vmem>>, vector<8x32xf32>
    %cst_125 = arith.constant dense<0.000000e+00> : vector<8x32xf32>
    %598 = tpu.matmul %596, %597, %cst_125 {dimension_numbers = #tpu.dot_dimension_numbers<[1], [0], [0], [1], [0, 0, 1, 1], [], []>} : vector<8x8xf32>, vector<8x32xf32>, vector<8x32xf32> -> vector<8x32xf32>
    %599 = arith.addf %595, %598 : vector<8x32xf32>
    %cst_126 = arith.constant dense<0.000000e+00> : vector<8x8xf32>
    %600 = tpu.matmul %194, %596, %cst_126 {dimension_numbers = #tpu.dot_dimension_numbers<[1], [0], [0], [1], [0, 0, 1, 1], [], []>} : vector<8x8xf32>, vector<8x8xf32>, vector<8x8xf32> -> vector<8x8xf32>
    %c8 = arith.constant 8 : index
    %c0_127 = arith.constant 0 : index
    %601 = vector.load %arg4[%c8, %c0_127] : memref<56x32xf32, #tpu.memory_space<vmem>>, vector<8x32xf32>
    %cst_128 = arith.constant dense<0.000000e+00> : vector<8x32xf32>
    %602 = tpu.matmul %600, %601, %cst_128 {dimension_numbers = #tpu.dot_dimension_numbers<[1], [0], [0], [1], [0, 0, 1, 1], [], []>} : vector<8x8xf32>, vector<8x32xf32>, vector<8x32xf32> -> vector<8x32xf32>
    %603 = arith.addf %599, %602 : vector<8x32xf32>
    %cst_129 = arith.constant dense<0.000000e+00> : vector<8x8xf32>
    %604 = tpu.matmul %589, %192, %cst_129 {dimension_numbers = #tpu.dot_dimension_numbers<[1], [0], [0], [1], [0, 0, 1, 1], [], []>} : vector<8x8xf32>, vector<8x8xf32>, vector<8x8xf32> -> vector<8x8xf32>
    %c16 = arith.constant 16 : index
    %c0_130 = arith.constant 0 : index
    %605 = vector.load %arg4[%c16, %c0_130] : memref<56x32xf32, #tpu.memory_space<vmem>>, vector<8x32xf32>
    %cst_131 = arith.constant dense<0.000000e+00> : vector<8x32xf32>
    %606 = tpu.matmul %604, %605, %cst_131 {dimension_numbers = #tpu.dot_dimension_numbers<[1], [0], [0], [1], [0, 0, 1, 1], [], []>} : vector<8x8xf32>, vector<8x32xf32>, vector<8x32xf32> -> vector<8x32xf32>
    %607 = arith.addf %603, %606 : vector<8x32xf32>
    %cst_132 = arith.constant dense<0.000000e+00> : vector<8x8xf32>
    %608 = tpu.matmul %593, %192, %cst_132 {dimension_numbers = #tpu.dot_dimension_numbers<[1], [0], [0], [1], [0, 0, 1, 1], [], []>} : vector<8x8xf32>, vector<8x8xf32>, vector<8x8xf32> -> vector<8x8xf32>
    %c24 = arith.constant 24 : index
    %c0_133 = arith.constant 0 : index
    %609 = vector.load %arg4[%c24, %c0_133] : memref<56x32xf32, #tpu.memory_space<vmem>>, vector<8x32xf32>
    %cst_134 = arith.constant dense<0.000000e+00> : vector<8x32xf32>
    %610 = tpu.matmul %608, %609, %cst_134 {dimension_numbers = #tpu.dot_dimension_numbers<[1], [0], [0], [1], [0, 0, 1, 1], [], []>} : vector<8x8xf32>, vector<8x32xf32>, vector<8x32xf32> -> vector<8x32xf32>
    %611 = arith.addf %607, %610 : vector<8x32xf32>
    %c32 = arith.constant 32 : index
    %c0_135 = arith.constant 0 : index
    %612 = vector.load %arg4[%c32, %c0_135] : memref<56x32xf32, #tpu.memory_space<vmem>>, vector<8x32xf32>
    %cst_136 = arith.constant dense<0.000000e+00> : vector<8x32xf32>
    %613 = tpu.matmul %596, %612, %cst_136 {dimension_numbers = #tpu.dot_dimension_numbers<[1], [0], [0], [1], [0, 0, 1, 1], [], []>} : vector<8x8xf32>, vector<8x32xf32>, vector<8x32xf32> -> vector<8x32xf32>
    %614 = arith.addf %611, %613 : vector<8x32xf32>
    %c2 = arith.constant 2 : index
    %c0_137 = arith.constant 0 : index
    %c0_138 = arith.constant 0 : index
    %615 = vector.load %arg2[%c2, %c0_137, %c0_138] : memref<6x8x8xf32, #tpu.memory_space<vmem>>, vector<1x8x8xf32>
    %616 = vector.shape_cast %615 : vector<1x8x8xf32> to vector<8x8xf32>
    %cst_139 = arith.constant dense<0.000000e+00> : vector<8x8xf32>
    %617 = tpu.matmul %616, %192, %cst_139 {dimension_numbers = #tpu.dot_dimension_numbers<[1], [0], [0], [1], [0, 0, 1, 1], [], []>} : vector<8x8xf32>, vector<8x8xf32>, vector<8x8xf32> -> vector<8x8xf32>
    %c40 = arith.constant 40 : index
    %c0_140 = arith.constant 0 : index
    %618 = vector.load %arg4[%c40, %c0_140] : memref<56x32xf32, #tpu.memory_space<vmem>>, vector<8x32xf32>
    %cst_141 = arith.constant dense<0.000000e+00> : vector<8x32xf32>
    %619 = tpu.matmul %617, %618, %cst_141 {dimension_numbers = #tpu.dot_dimension_numbers<[1], [0], [0], [1], [0, 0, 1, 1], [], []>} : vector<8x8xf32>, vector<8x32xf32>, vector<8x32xf32> -> vector<8x32xf32>
    %620 = arith.addf %614, %619 : vector<8x32xf32>
    %c4 = arith.constant 4 : index
    %c0_142 = arith.constant 0 : index
    %c0_143 = arith.constant 0 : index
    %621 = vector.load %arg2[%c4, %c0_142, %c0_143] : memref<6x8x8xf32, #tpu.memory_space<vmem>>, vector<1x8x8xf32>
    %622 = vector.shape_cast %621 : vector<1x8x8xf32> to vector<8x8xf32>
    %cst_144 = arith.constant dense<0.000000e+00> : vector<8x8xf32>
    %623 = tpu.matmul %622, %192, %cst_144 {dimension_numbers = #tpu.dot_dimension_numbers<[1], [0], [0], [1], [0, 0, 1, 1], [], []>} : vector<8x8xf32>, vector<8x8xf32>, vector<8x8xf32> -> vector<8x8xf32>
    %c48 = arith.constant 48 : index
    %c0_145 = arith.constant 0 : index
    %624 = vector.load %arg4[%c48, %c0_145] : memref<56x32xf32, #tpu.memory_space<vmem>>, vector<8x32xf32>
    %cst_146 = arith.constant dense<0.000000e+00> : vector<8x32xf32>
    %625 = tpu.matmul %623, %624, %cst_146 {dimension_numbers = #tpu.dot_dimension_numbers<[1], [0], [0], [1], [0, 0, 1, 1], [], []>} : vector<8x8xf32>, vector<8x32xf32>, vector<8x32xf32> -> vector<8x32xf32>
    %626 = arith.addf %620, %625 : vector<8x32xf32>
    %627 = vector.broadcast %594 : vector<1x32xf32> to vector<8x32xf32>
    %628 = arith.addf %626, %627 : vector<8x32xf32>
    %cst_147 = arith.constant 0.000000e+00 : f32
    %629 = vector.broadcast %cst_147 : f32 to vector<8x32xf32>
    %630 = arith.maximumf %628, %629 : vector<8x32xf32>
    %c0_148 = arith.constant 0 : index
    %c0_149 = arith.constant 0 : index
    %631 = vector.load %arg7[%c0_148, %c0_149] : memref<1x32xf32, #tpu.memory_space<vmem>>, vector<1x32xf32>
    %cst_150 = arith.constant 0.000000e+00 : f32
    %632 = vector.broadcast %cst_150 : f32 to vector<8x32xf32>
    %cst_151 = arith.constant dense<0.000000e+00> : vector<8x32xf32>
    %633 = tpu.matmul %194, %630, %cst_151 {dimension_numbers = #tpu.dot_dimension_numbers<[1], [0], [0], [1], [0, 0, 1, 1], [], []>} : vector<8x8xf32>, vector<8x32xf32>, vector<8x32xf32> -> vector<8x32xf32>
    %c0_152 = arith.constant 0 : index
    %c0_153 = arith.constant 0 : index
    %634 = vector.load %arg6[%c0_152, %c0_153] : memref<224x32xf32, #tpu.memory_space<vmem>>, vector<32x32xf32>
    %cst_154 = arith.constant dense<0.000000e+00> : vector<8x32xf32>
    %635 = tpu.matmul %633, %634, %cst_154 {dimension_numbers = #tpu.dot_dimension_numbers<[1], [0], [0], [1], [0, 0, 1, 1], [], []>} : vector<8x32xf32>, vector<32x32xf32>, vector<8x32xf32> -> vector<8x32xf32>
    %636 = arith.addf %632, %635 : vector<8x32xf32>
    %cst_155 = arith.constant dense<0.000000e+00> : vector<8x32xf32>
    %637 = tpu.matmul %194, %633, %cst_155 {dimension_numbers = #tpu.dot_dimension_numbers<[1], [0], [0], [1], [0, 0, 1, 1], [], []>} : vector<8x8xf32>, vector<8x32xf32>, vector<8x32xf32> -> vector<8x32xf32>
    %c32_156 = arith.constant 32 : index
    %c0_157 = arith.constant 0 : index
    %638 = vector.load %arg6[%c32_156, %c0_157] : memref<224x32xf32, #tpu.memory_space<vmem>>, vector<32x32xf32>
    %cst_158 = arith.constant dense<0.000000e+00> : vector<8x32xf32>
    %639 = tpu.matmul %637, %638, %cst_158 {dimension_numbers = #tpu.dot_dimension_numbers<[1], [0], [0], [1], [0, 0, 1, 1], [], []>} : vector<8x32xf32>, vector<32x32xf32>, vector<8x32xf32> -> vector<8x32xf32>
    %640 = arith.addf %636, %639 : vector<8x32xf32>
    %cst_159 = arith.constant dense<0.000000e+00> : vector<8x32xf32>
    %641 = tpu.matmul %589, %630, %cst_159 {dimension_numbers = #tpu.dot_dimension_numbers<[1], [0], [0], [1], [0, 0, 1, 1], [], []>} : vector<8x8xf32>, vector<8x32xf32>, vector<8x32xf32> -> vector<8x32xf32>
    %c64 = arith.constant 64 : index
    %c0_160 = arith.constant 0 : index
    %642 = vector.load %arg6[%c64, %c0_160] : memref<224x32xf32, #tpu.memory_space<vmem>>, vector<32x32xf32>
    %cst_161 = arith.constant dense<0.000000e+00> : vector<8x32xf32>
    %643 = tpu.matmul %641, %642, %cst_161 {dimension_numbers = #tpu.dot_dimension_numbers<[1], [0], [0], [1], [0, 0, 1, 1], [], []>} : vector<8x32xf32>, vector<32x32xf32>, vector<8x32xf32> -> vector<8x32xf32>
    %644 = arith.addf %640, %643 : vector<8x32xf32>
    %cst_162 = arith.constant dense<0.000000e+00> : vector<8x32xf32>
    %645 = tpu.matmul %593, %630, %cst_162 {dimension_numbers = #tpu.dot_dimension_numbers<[1], [0], [0], [1], [0, 0, 1, 1], [], []>} : vector<8x8xf32>, vector<8x32xf32>, vector<8x32xf32> -> vector<8x32xf32>
    %c96 = arith.constant 96 : index
    %c0_163 = arith.constant 0 : index
    %646 = vector.load %arg6[%c96, %c0_163] : memref<224x32xf32, #tpu.memory_space<vmem>>, vector<32x32xf32>
    %cst_164 = arith.constant dense<0.000000e+00> : vector<8x32xf32>
    %647 = tpu.matmul %645, %646, %cst_164 {dimension_numbers = #tpu.dot_dimension_numbers<[1], [0], [0], [1], [0, 0, 1, 1], [], []>} : vector<8x32xf32>, vector<32x32xf32>, vector<8x32xf32> -> vector<8x32xf32>
    %648 = arith.addf %644, %647 : vector<8x32xf32>
    %c128 = arith.constant 128 : index
    %c0_165 = arith.constant 0 : index
    %649 = vector.load %arg6[%c128, %c0_165] : memref<224x32xf32, #tpu.memory_space<vmem>>, vector<32x32xf32>
    %cst_166 = arith.constant dense<0.000000e+00> : vector<8x32xf32>
    %650 = tpu.matmul %633, %649, %cst_166 {dimension_numbers = #tpu.dot_dimension_numbers<[1], [0], [0], [1], [0, 0, 1, 1], [], []>} : vector<8x32xf32>, vector<32x32xf32>, vector<8x32xf32> -> vector<8x32xf32>
    %651 = arith.addf %648, %650 : vector<8x32xf32>
    %c2_167 = arith.constant 2 : index
    %c0_168 = arith.constant 0 : index
    %c0_169 = arith.constant 0 : index
    %652 = vector.load %arg2[%c2_167, %c0_168, %c0_169] : memref<6x8x8xf32, #tpu.memory_space<vmem>>, vector<1x8x8xf32>
    %653 = vector.shape_cast %652 : vector<1x8x8xf32> to vector<8x8xf32>
    %cst_170 = arith.constant dense<0.000000e+00> : vector<8x32xf32>
    %654 = tpu.matmul %653, %630, %cst_170 {dimension_numbers = #tpu.dot_dimension_numbers<[1], [0], [0], [1], [0, 0, 1, 1], [], []>} : vector<8x8xf32>, vector<8x32xf32>, vector<8x32xf32> -> vector<8x32xf32>
    %c160 = arith.constant 160 : index
    %c0_171 = arith.constant 0 : index
    %655 = vector.load %arg6[%c160, %c0_171] : memref<224x32xf32, #tpu.memory_space<vmem>>, vector<32x32xf32>
    %cst_172 = arith.constant dense<0.000000e+00> : vector<8x32xf32>
    %656 = tpu.matmul %654, %655, %cst_172 {dimension_numbers = #tpu.dot_dimension_numbers<[1], [0], [0], [1], [0, 0, 1, 1], [], []>} : vector<8x32xf32>, vector<32x32xf32>, vector<8x32xf32> -> vector<8x32xf32>
    %657 = arith.addf %651, %656 : vector<8x32xf32>
    %c4_173 = arith.constant 4 : index
    %c0_174 = arith.constant 0 : index
    %c0_175 = arith.constant 0 : index
    %658 = vector.load %arg2[%c4_173, %c0_174, %c0_175] : memref<6x8x8xf32, #tpu.memory_space<vmem>>, vector<1x8x8xf32>
    %659 = vector.shape_cast %658 : vector<1x8x8xf32> to vector<8x8xf32>
    %cst_176 = arith.constant dense<0.000000e+00> : vector<8x32xf32>
    %660 = tpu.matmul %659, %630, %cst_176 {dimension_numbers = #tpu.dot_dimension_numbers<[1], [0], [0], [1], [0, 0, 1, 1], [], []>} : vector<8x8xf32>, vector<8x32xf32>, vector<8x32xf32> -> vector<8x32xf32>
    %c192 = arith.constant 192 : index
    %c0_177 = arith.constant 0 : index
    %661 = vector.load %arg6[%c192, %c0_177] : memref<224x32xf32, #tpu.memory_space<vmem>>, vector<32x32xf32>
    %cst_178 = arith.constant dense<0.000000e+00> : vector<8x32xf32>
    %662 = tpu.matmul %660, %661, %cst_178 {dimension_numbers = #tpu.dot_dimension_numbers<[1], [0], [0], [1], [0, 0, 1, 1], [], []>} : vector<8x32xf32>, vector<32x32xf32>, vector<8x32xf32> -> vector<8x32xf32>
    %663 = arith.addf %657, %662 : vector<8x32xf32>
    %664 = vector.broadcast %631 : vector<1x32xf32> to vector<8x32xf32>
    %665 = arith.addf %663, %664 : vector<8x32xf32>
    %cst_179 = arith.constant 0.000000e+00 : f32
    %666 = vector.broadcast %cst_179 : f32 to vector<8x32xf32>
    %667 = arith.maximumf %665, %666 : vector<8x32xf32>
    %c0_180 = arith.constant 0 : index
    %c0_181 = arith.constant 0 : index
    %668 = vector.load %arg8[%c0_180, %c0_181] : memref<32x4xf32, #tpu.memory_space<vmem>>, vector<32x4xf32>
    %cst_182 = arith.constant dense<0.000000e+00> : vector<8x4xf32>
    %669 = tpu.matmul %667, %668, %cst_182 {dimension_numbers = #tpu.dot_dimension_numbers<[1], [0], [0], [1], [0, 0, 1, 1], [], []>} : vector<8x32xf32>, vector<32x4xf32>, vector<8x4xf32> -> vector<8x4xf32>
    %c0_183 = arith.constant 0 : index
    %c0_184 = arith.constant 0 : index
    %670 = vector.load %arg9[%c0_183, %c0_184] : memref<1x4xf32, #tpu.memory_space<vmem>>, vector<1x4xf32>
    %671 = vector.broadcast %670 : vector<1x4xf32> to vector<8x4xf32>
    %672 = arith.addf %669, %671 : vector<8x4xf32>
    %c0_185 = arith.constant 0 : index
    %c0_186 = arith.constant 0 : index
    %673 = vector.load %arg10[%c0_185, %c0_186] : memref<32x1xf32, #tpu.memory_space<vmem>>, vector<32x1xf32>
    %cst_187 = arith.constant dense<0.000000e+00> : vector<8x1xf32>
    %674 = tpu.matmul %667, %673, %cst_187 {dimension_numbers = #tpu.dot_dimension_numbers<[1], [0], [0], [1], [0, 0, 1, 1], [], []>} : vector<8x32xf32>, vector<32x1xf32>, vector<8x1xf32> -> vector<8x1xf32>
    %c0_188 = arith.constant 0 : index
    %c0_189 = arith.constant 0 : index
    %675 = vector.load %arg11[%c0_188, %c0_189] : memref<1x1xf32, #tpu.memory_space<vmem>>, vector<1x1xf32>
    %676 = vector.broadcast %675 : vector<1x1xf32> to vector<8x1xf32>
    %677 = arith.addf %674, %676 : vector<8x1xf32>
    %cst_190 = arith.constant 0.000000e+00 : f32
    %678 = vector.broadcast %cst_190 : f32 to vector<8x1xf32>
    %679 = arith.subf %678, %677 : vector<8x1xf32>
    %680 = math.exp %679 : vector<8x1xf32>
    %cst_191 = arith.constant 1.000000e+00 : f32
    %681 = vector.broadcast %cst_191 : f32 to vector<8x1xf32>
    %682 = arith.addf %681, %680 : vector<8x1xf32>
    %cst_192 = arith.constant 1.000000e+00 : f32
    %683 = vector.broadcast %cst_192 : f32 to vector<8x1xf32>
    %684 = arith.divf %683, %682 : vector<8x1xf32>
    %685 = vector.broadcast %684 : vector<8x1xf32> to vector<8x4xf32>
    %686 = arith.mulf %685, %672 : vector<8x4xf32>
    %cst_193 = arith.constant dense<0.000000e+00> : vector<4xf32>
    %687 = vector.multi_reduction <add>, %686, %cst_193 [0] : vector<8x4xf32> to vector<4xf32>
    %688 = vector.shape_cast %687 : vector<4xf32> to vector<1x4xf32>
    %cst_194 = arith.constant 8.000000e+00 : f32
    %689 = vector.broadcast %cst_194 : f32 to vector<1x4xf32>
    %690 = arith.divf %688, %689 : vector<1x4xf32>
    %c0_195 = arith.constant 0 : index
    %c0_196 = arith.constant 0 : index
    %691 = vector.load %arg12[%c0_195, %c0_196] : memref<2x4xf32, #tpu.memory_space<vmem>>, vector<1x4xf32>
    tpu.vector_store %arg12[%c0_195, %c0_196], %690 {strides = array<i32>} : memref<2x4xf32, #tpu.memory_space<vmem>>, vector<1x4xf32>,
    %c1 = arith.constant 1 : index
    %c0_197 = arith.constant 0 : index
    %c0_198 = arith.constant 0 : index
    %692 = vector.load %arg0[%c1, %c0_197, %c0_198] : memref<2x8x1xi32, #tpu.memory_space<vmem>>, vector<1x8x1xi32>
    %693 = vector.shape_cast %692 : vector<1x8x1xi32> to vector<8x1xi32>
    %694 = vector.broadcast %693 : vector<8x1xi32> to vector<8x8xi32>
    %695 = arith.cmpi eq, %694, %5 : vector<8x8xi32>
    %696 = arith.extui %695 : vector<8x8xi1> to vector<8x8xi32>
    %697 = arith.sitofp %696 : vector<8x8xi32> to vector<8x8xf32>
    %c0_199 = arith.constant 0 : index
    %c0_200 = arith.constant 0 : index
    %698 = vector.load %arg1[%c0_199, %c0_200] : memref<8x8xf32, #tpu.memory_space<vmem>>, vector<8x8xf32>
    %cst_201 = arith.constant dense<0.000000e+00> : vector<8x8xf32>
    %699 = tpu.matmul %697, %698, %cst_201 {dimension_numbers = #tpu.dot_dimension_numbers<[1], [0], [0], [1], [0, 0, 1, 1], [], []>} : vector<8x8xf32>, vector<8x8xf32>, vector<8x8xf32> -> vector<8x8xf32>
    %c1_202 = arith.constant 1 : index
    %c0_203 = arith.constant 0 : index
    %c0_204 = arith.constant 0 : index
    %700 = vector.load %arg2[%c1_202, %c0_203, %c0_204] : memref<6x8x8xf32, #tpu.memory_space<vmem>>, vector<1x8x8xf32>
    %701 = vector.shape_cast %700 : vector<1x8x8xf32> to vector<8x8xf32>
    %cst_205 = arith.constant 0.000000e+00 : f32
    %702 = vector.broadcast %cst_205 : f32 to vector<8x8xf32>
    %703 = arith.cmpf one, %701, %702 : vector<8x8xf32>
    %704 = arith.extui %703 : vector<8x8xi1> to vector<8x8xi32>
    %705 = arith.sitofp %704 : vector<8x8xi32> to vector<8x8xf32>
    %706 = arith.mulf %699, %699 : vector<8x8xf32>
    %cst_206 = arith.constant dense<0.000000e+00> : vector<8xf32>
    %707 = vector.multi_reduction <add>, %706, %cst_206 [1] : vector<8x8xf32> to vector<8xf32>
    %708 = vector.shape_cast %707 : vector<8xf32> to vector<8x1xf32>
    %709 = tpu.transpose %699, [1, 0] : vector<8x8xf32> -> vector<8x8xf32>
    %cst_207 = arith.constant dense<0.000000e+00> : vector<8x8xf32>
    %710 = tpu.matmul %699, %709, %cst_207 {dimension_numbers = #tpu.dot_dimension_numbers<[1], [0], [0], [1], [0, 0, 1, 1], [], []>} : vector<8x8xf32>, vector<8x8xf32>, vector<8x8xf32> -> vector<8x8xf32>
    %711 = tpu.transpose %708, [1, 0] : vector<8x1xf32> -> vector<1x8xf32>
    %712 = vector.broadcast %708 : vector<8x1xf32> to vector<8x8xf32>
    %713 = vector.broadcast %711 : vector<1x8xf32> to vector<8x8xf32>
    %714 = arith.addf %712, %713 : vector<8x8xf32>
    %cst_208 = arith.constant 2.000000e+00 : f32
    %715 = vector.broadcast %cst_208 : f32 to vector<8x8xf32>
    %716 = arith.mulf %715, %710 : vector<8x8xf32>
    %717 = arith.subf %714, %716 : vector<8x8xf32>
    %cst_209 = arith.constant 0.000000e+00 : f32
    %718 = vector.broadcast %cst_209 : f32 to vector<8x8xf32>
    %719 = arith.maximumf %717, %718 : vector<8x8xf32>
    %720 = vector.shape_cast %719 : vector<8x8xf32> to vector<1x8x8xf32>
    %cst_210 = arith.constant dense<0.000000e+00> : vector<1xf32>
    %721 = vector.multi_reduction <add>, %720, %cst_210 [1, 2] : vector<1x8x8xf32> to vector<1xf32>
    %722 = vector.shape_cast %721 : vector<1xf32> to vector<1x1x1xf32>
    %723 = vector.extract %722[0, 0, 0] : f32 from vector<1x1x1xf32>
    %cst_211 = arith.constant 6.400000e+01 : f32
    %724 = arith.divf %723, %cst_211 : f32
    %cst_212 = arith.constant 1.1920929E-7 : f32
    %725 = arith.maximumf %724, %cst_212 : f32
    %cst_213 = arith.constant 0.000000e+00 : f32
    %726 = vector.broadcast %cst_213 : f32 to vector<8x8xf32>
    %727 = arith.subf %726, %719 : vector<8x8xf32>
    %728 = vector.broadcast %725 : f32 to vector<8x8xf32>
    %729 = arith.divf %727, %728 : vector<8x8xf32>
    %730 = math.exp %729 : vector<8x8xf32>
    %731 = arith.mulf %730, %705 : vector<8x8xf32>
    %cst_214 = arith.constant dense<0.000000e+00> : vector<8xf32>
    %732 = vector.multi_reduction <add>, %731, %cst_214 [1] : vector<8x8xf32> to vector<8xf32>
    %733 = vector.shape_cast %732 : vector<8xf32> to vector<8x1xf32>
    %cst_215 = arith.constant 0.000000e+00 : f32
    %734 = vector.broadcast %cst_215 : f32 to vector<8x1xf32>
    %735 = arith.cmpf oeq, %733, %734 : vector<8x1xf32>
    %cst_216 = arith.constant 1.000000e+00 : f32
    %cst_217 = arith.constant 0.000000e+00 : f32
    %736 = vector.broadcast %cst_216 : f32 to vector<8x1xf32>
    %737 = vector.broadcast %cst_217 : f32 to vector<8x1xf32>
    %738 = arith.select %735, %736, %737 : vector<8x1xi1>, vector<8x1xf32>
    %739 = arith.addf %733, %738 : vector<8x1xf32>
    %740 = math.sqrt %739 : vector<8x1xf32>
    %cst_218 = arith.constant 1.000000e+00 : f32
    %741 = vector.broadcast %cst_218 : f32 to vector<8x1xf32>
    %742 = arith.divf %741, %740 : vector<8x1xf32>
    %743 = vector.broadcast %742 : vector<8x1xf32> to vector<8x8xf32>
    %744 = arith.mulf %743, %731 : vector<8x8xf32>
    %745 = tpu.transpose %742, [1, 0] : vector<8x1xf32> -> vector<1x8xf32>
    %746 = vector.broadcast %745 : vector<1x8xf32> to vector<8x8xf32>
    %747 = arith.mulf %744, %746 : vector<8x8xf32>
    %c1_219 = arith.constant 1 : index
    %c0_220 = arith.constant 0 : index
    %c0_221 = arith.constant 0 : index
    %748 = vector.load %arg3[%c1_219, %c0_220, %c0_221] : memref<2x8x1xf32, #tpu.memory_space<vmem>>, vector<1x8x1xf32>
    %749 = vector.shape_cast %748 : vector<1x8x1xf32> to vector<8x1xf32>
    %750 = arith.mulf %749, %749 : vector<8x1xf32>
    %751 = vector.shape_cast %750 : vector<8x1xf32> to vector<1x8x1xf32>
    %cst_222 = arith.constant dense<0.000000e+00> : vector<1xf32>
    %752 = vector.multi_reduction <add>, %751, %cst_222 [1, 2] : vector<1x8x1xf32> to vector<1xf32>
    %753 = vector.shape_cast %752 : vector<1xf32> to vector<1x1x1xf32>
    %754 = vector.extract %753[0, 0, 0] : f32 from vector<1x1x1xf32>
    %755 = math.sqrt %754 : f32
    %756 = vector.broadcast %755 : f32 to vector<8x1xf32>
    %757 = arith.divf %749, %756 : vector<8x1xf32>
    %cst_223 = arith.constant 0.000000e+00 : f32
    %758 = vector.broadcast %cst_223 : f32 to vector<8x1xf32>
    %cst_224 = arith.constant dense<0.000000e+00> : vector<8x1xf32>
    %759 = tpu.matmul %747, %757, %cst_224 {dimension_numbers = #tpu.dot_dimension_numbers<[1], [0], [0], [1], [0, 0, 1, 1], [], []>} : vector<8x8xf32>, vector<8x1xf32>, vector<8x1xf32> -> vector<8x1xf32>
    %760 = arith.mulf %757, %759 : vector<8x1xf32>
    %761 = vector.shape_cast %760 : vector<8x1xf32> to vector<1x8x1xf32>
    %cst_225 = arith.constant dense<0.000000e+00> : vector<1xf32>
    %762 = vector.multi_reduction <add>, %761, %cst_225 [1, 2] : vector<1x8x1xf32> to vector<1xf32>
    %763 = vector.shape_cast %762 : vector<1xf32> to vector<1x1x1xf32>
    %764 = vector.extract %763[0, 0, 0] : f32 from vector<1x1x1xf32>
    %765 = vector.broadcast %764 : f32 to vector<8x1xf32>
    %766 = arith.mulf %765, %757 : vector<8x1xf32>
    %767 = arith.subf %759, %766 : vector<8x1xf32>
    %cst_226 = arith.constant 0.000000e+00 : f32
    %768 = vector.broadcast %cst_226 : f32 to vector<8x1xf32>
    %769 = arith.mulf %768, %758 : vector<8x1xf32>
    %770 = arith.subf %767, %769 : vector<8x1xf32>
    %771 = arith.mulf %770, %770 : vector<8x1xf32>
    %772 = vector.shape_cast %771 : vector<8x1xf32> to vector<1x8x1xf32>
    %cst_227 = arith.constant dense<0.000000e+00> : vector<1xf32>
    %773 = vector.multi_reduction <add>, %772, %cst_227 [1, 2] : vector<1x8x1xf32> to vector<1xf32>
    %774 = vector.shape_cast %773 : vector<1xf32> to vector<1x1x1xf32>
    %775 = vector.extract %774[0, 0, 0] : f32 from vector<1x1x1xf32>
    %776 = math.sqrt %775 : f32
    %cst_228 = arith.constant 9.99999974E-5 : f32
    %777 = arith.cmpf oge, %776, %cst_228 : f32
    %778 = arith.extui %777 : i1 to i32
    %779 = arith.sitofp %778 : i32 to f32
    %cst_229 = arith.constant 1.000000e+00 : f32
    %780 = arith.mulf %cst_229, %779 : f32
    %781 = vector.broadcast %780 : f32 to vector<8x1xf32>
    %782 = arith.mulf %770, %781 : vector<8x1xf32>
    %cst_230 = arith.constant 1.1920929E-7 : f32
    %783 = arith.addf %776, %cst_230 : f32
    %784 = vector.broadcast %783 : f32 to vector<8x1xf32>
    %785 = arith.divf %782, %784 : vector<8x1xf32>
    %cst_231 = arith.constant dense<0.000000e+00> : vector<8x1xf32>
    %786 = tpu.matmul %747, %785, %cst_231 {dimension_numbers = #tpu.dot_dimension_numbers<[1], [0], [0], [1], [0, 0, 1, 1], [], []>} : vector<8x8xf32>, vector<8x1xf32>, vector<8x1xf32> -> vector<8x1xf32>
    %787 = arith.mulf %785, %786 : vector<8x1xf32>
    %788 = vector.shape_cast %787 : vector<8x1xf32> to vector<1x8x1xf32>
    %cst_232 = arith.constant dense<0.000000e+00> : vector<1xf32>
    %789 = vector.multi_reduction <add>, %788, %cst_232 [1, 2] : vector<1x8x1xf32> to vector<1xf32>
    %790 = vector.shape_cast %789 : vector<1xf32> to vector<1x1x1xf32>
    %791 = vector.extract %790[0, 0, 0] : f32 from vector<1x1x1xf32>
    %792 = vector.broadcast %791 : f32 to vector<8x1xf32>
    %793 = arith.mulf %792, %785 : vector<8x1xf32>
    %794 = arith.subf %786, %793 : vector<8x1xf32>
    %795 = vector.broadcast %776 : f32 to vector<8x1xf32>
    %796 = arith.mulf %795, %757 : vector<8x1xf32>
    %797 = arith.subf %794, %796 : vector<8x1xf32>
    %798 = arith.mulf %797, %797 : vector<8x1xf32>
    %799 = vector.shape_cast %798 : vector<8x1xf32> to vector<1x8x1xf32>
    %cst_233 = arith.constant dense<0.000000e+00> : vector<1xf32>
    %800 = vector.multi_reduction <add>, %799, %cst_233 [1, 2] : vector<1x8x1xf32> to vector<1xf32>
    %801 = vector.shape_cast %800 : vector<1xf32> to vector<1x1x1xf32>
    %802 = vector.extract %801[0, 0, 0] : f32 from vector<1x1x1xf32>
    %803 = math.sqrt %802 : f32
    %cst_234 = arith.constant 9.99999974E-5 : f32
    %804 = arith.cmpf oge, %803, %cst_234 : f32
    %805 = arith.extui %804 : i1 to i32
    %806 = arith.sitofp %805 : i32 to f32
    %807 = arith.mulf %780, %806 : f32
    %808 = vector.broadcast %807 : f32 to vector<8x1xf32>
    %809 = arith.mulf %797, %808 : vector<8x1xf32>
    %cst_235 = arith.constant 1.1920929E-7 : f32
    %810 = arith.addf %803, %cst_235 : f32
    %811 = vector.broadcast %810 : f32 to vector<8x1xf32>
    %812 = arith.divf %809, %811 : vector<8x1xf32>
    %cst_236 = arith.constant dense<0.000000e+00> : vector<8x1xf32>
    %813 = tpu.matmul %747, %812, %cst_236 {dimension_numbers = #tpu.dot_dimension_numbers<[1], [0], [0], [1], [0, 0, 1, 1], [], []>} : vector<8x8xf32>, vector<8x1xf32>, vector<8x1xf32> -> vector<8x1xf32>
    %814 = arith.mulf %812, %813 : vector<8x1xf32>
    %815 = vector.shape_cast %814 : vector<8x1xf32> to vector<1x8x1xf32>
    %cst_237 = arith.constant dense<0.000000e+00> : vector<1xf32>
    %816 = vector.multi_reduction <add>, %815, %cst_237 [1, 2] : vector<1x8x1xf32> to vector<1xf32>
    %817 = vector.shape_cast %816 : vector<1xf32> to vector<1x1x1xf32>
    %818 = vector.extract %817[0, 0, 0] : f32 from vector<1x1x1xf32>
    %819 = vector.broadcast %818 : f32 to vector<8x1xf32>
    %820 = arith.mulf %819, %812 : vector<8x1xf32>
    %821 = arith.subf %813, %820 : vector<8x1xf32>
    %822 = vector.broadcast %803 : f32 to vector<8x1xf32>
    %823 = arith.mulf %822, %785 : vector<8x1xf32>
    %824 = arith.subf %821, %823 : vector<8x1xf32>
    %825 = arith.mulf %824, %824 : vector<8x1xf32>
    %826 = vector.shape_cast %825 : vector<8x1xf32> to vector<1x8x1xf32>
    %cst_238 = arith.constant dense<0.000000e+00> : vector<1xf32>
    %827 = vector.multi_reduction <add>, %826, %cst_238 [1, 2] : vector<1x8x1xf32> to vector<1xf32>
    %828 = vector.shape_cast %827 : vector<1xf32> to vector<1x1x1xf32>
    %829 = vector.extract %828[0, 0, 0] : f32 from vector<1x1x1xf32>
    %830 = math.sqrt %829 : f32
    %cst_239 = arith.constant 9.99999974E-5 : f32
    %831 = arith.cmpf oge, %830, %cst_239 : f32
    %832 = arith.extui %831 : i1 to i32
    %833 = arith.sitofp %832 : i32 to f32
    %834 = arith.mulf %807, %833 : f32
    %835 = vector.broadcast %834 : f32 to vector<8x1xf32>
    %836 = arith.mulf %824, %835 : vector<8x1xf32>
    %cst_240 = arith.constant 1.1920929E-7 : f32
    %837 = arith.addf %830, %cst_240 : f32
    %838 = vector.broadcast %837 : f32 to vector<8x1xf32>
    %839 = arith.divf %836, %838 : vector<8x1xf32>
    %cst_241 = arith.constant dense<0.000000e+00> : vector<8x1xf32>
    %840 = tpu.matmul %747, %839, %cst_241 {dimension_numbers = #tpu.dot_dimension_numbers<[1], [0], [0], [1], [0, 0, 1, 1], [], []>} : vector<8x8xf32>, vector<8x1xf32>, vector<8x1xf32> -> vector<8x1xf32>
    %841 = arith.mulf %839, %840 : vector<8x1xf32>
    %842 = vector.shape_cast %841 : vector<8x1xf32> to vector<1x8x1xf32>
    %cst_242 = arith.constant dense<0.000000e+00> : vector<1xf32>
    %843 = vector.multi_reduction <add>, %842, %cst_242 [1, 2] : vector<1x8x1xf32> to vector<1xf32>
    %844 = vector.shape_cast %843 : vector<1xf32> to vector<1x1x1xf32>
    %845 = vector.extract %844[0, 0, 0] : f32 from vector<1x1x1xf32>
    %846 = vector.broadcast %845 : f32 to vector<8x1xf32>
    %847 = arith.mulf %846, %839 : vector<8x1xf32>
    %848 = arith.subf %840, %847 : vector<8x1xf32>
    %849 = vector.broadcast %830 : f32 to vector<8x1xf32>
    %850 = arith.mulf %849, %812 : vector<8x1xf32>
    %851 = arith.subf %848, %850 : vector<8x1xf32>
    %852 = arith.mulf %851, %851 : vector<8x1xf32>
    %853 = vector.shape_cast %852 : vector<8x1xf32> to vector<1x8x1xf32>
    %cst_243 = arith.constant dense<0.000000e+00> : vector<1xf32>
    %854 = vector.multi_reduction <add>, %853, %cst_243 [1, 2] : vector<1x8x1xf32> to vector<1xf32>
    %855 = vector.shape_cast %854 : vector<1xf32> to vector<1x1x1xf32>
    %856 = vector.extract %855[0, 0, 0] : f32 from vector<1x1x1xf32>
    %857 = math.sqrt %856 : f32
    %cst_244 = arith.constant 9.99999974E-5 : f32
    %858 = arith.cmpf oge, %857, %cst_244 : f32
    %859 = arith.extui %858 : i1 to i32
    %860 = arith.sitofp %859 : i32 to f32
    %861 = arith.mulf %834, %860 : f32
    %862 = vector.broadcast %861 : f32 to vector<8x1xf32>
    %863 = arith.mulf %851, %862 : vector<8x1xf32>
    %cst_245 = arith.constant 1.1920929E-7 : f32
    %864 = arith.addf %857, %cst_245 : f32
    %865 = vector.broadcast %864 : f32 to vector<8x1xf32>
    %866 = arith.divf %863, %865 : vector<8x1xf32>
    %cst_246 = arith.constant dense<0.000000e+00> : vector<8x1xf32>
    %867 = tpu.matmul %747, %866, %cst_246 {dimension_numbers = #tpu.dot_dimension_numbers<[1], [0], [0], [1], [0, 0, 1, 1], [], []>} : vector<8x8xf32>, vector<8x1xf32>, vector<8x1xf32> -> vector<8x1xf32>
    %868 = arith.mulf %866, %867 : vector<8x1xf32>
    %869 = vector.shape_cast %868 : vector<8x1xf32> to vector<1x8x1xf32>
    %cst_247 = arith.constant dense<0.000000e+00> : vector<1xf32>
    %870 = vector.multi_reduction <add>, %869, %cst_247 [1, 2] : vector<1x8x1xf32> to vector<1xf32>
    %871 = vector.shape_cast %870 : vector<1xf32> to vector<1x1x1xf32>
    %872 = vector.extract %871[0, 0, 0] : f32 from vector<1x1x1xf32>
    %873 = vector.broadcast %872 : f32 to vector<8x1xf32>
    %874 = arith.mulf %873, %866 : vector<8x1xf32>
    %875 = arith.subf %867, %874 : vector<8x1xf32>
    %876 = vector.broadcast %857 : f32 to vector<8x1xf32>
    %877 = arith.mulf %876, %839 : vector<8x1xf32>
    %878 = arith.subf %875, %877 : vector<8x1xf32>
    %879 = arith.mulf %878, %878 : vector<8x1xf32>
    %880 = vector.shape_cast %879 : vector<8x1xf32> to vector<1x8x1xf32>
    %cst_248 = arith.constant dense<0.000000e+00> : vector<1xf32>
    %881 = vector.multi_reduction <add>, %880, %cst_248 [1, 2] : vector<1x8x1xf32> to vector<1xf32>
    %882 = vector.shape_cast %881 : vector<1xf32> to vector<1x1x1xf32>
    %883 = vector.extract %882[0, 0, 0] : f32 from vector<1x1x1xf32>
    %884 = math.sqrt %883 : f32
    %cst_249 = arith.constant 9.99999974E-5 : f32
    %885 = arith.cmpf oge, %884, %cst_249 : f32
    %886 = arith.extui %885 : i1 to i32
    %887 = arith.sitofp %886 : i32 to f32
    %888 = arith.mulf %861, %887 : f32
    %889 = vector.broadcast %888 : f32 to vector<8x1xf32>
    %890 = arith.mulf %878, %889 : vector<8x1xf32>
    %cst_250 = arith.constant 1.1920929E-7 : f32
    %891 = arith.addf %884, %cst_250 : f32
    %892 = vector.broadcast %891 : f32 to vector<8x1xf32>
    %893 = arith.divf %890, %892 : vector<8x1xf32>
    %cst_251 = arith.constant dense<0.000000e+00> : vector<8x1xf32>
    %894 = tpu.matmul %747, %893, %cst_251 {dimension_numbers = #tpu.dot_dimension_numbers<[1], [0], [0], [1], [0, 0, 1, 1], [], []>} : vector<8x8xf32>, vector<8x1xf32>, vector<8x1xf32> -> vector<8x1xf32>
    %895 = arith.mulf %893, %894 : vector<8x1xf32>
    %896 = vector.shape_cast %895 : vector<8x1xf32> to vector<1x8x1xf32>
    %cst_252 = arith.constant dense<0.000000e+00> : vector<1xf32>
    %897 = vector.multi_reduction <add>, %896, %cst_252 [1, 2] : vector<1x8x1xf32> to vector<1xf32>
    %898 = vector.shape_cast %897 : vector<1xf32> to vector<1x1x1xf32>
    %899 = vector.extract %898[0, 0, 0] : f32 from vector<1x1x1xf32>
    %900 = vector.broadcast %899 : f32 to vector<8x1xf32>
    %901 = arith.mulf %900, %893 : vector<8x1xf32>
    %902 = arith.subf %894, %901 : vector<8x1xf32>
    %903 = vector.broadcast %884 : f32 to vector<8x1xf32>
    %904 = arith.mulf %903, %866 : vector<8x1xf32>
    %905 = arith.subf %902, %904 : vector<8x1xf32>
    %906 = arith.mulf %905, %905 : vector<8x1xf32>
    %907 = vector.shape_cast %906 : vector<8x1xf32> to vector<1x8x1xf32>
    %cst_253 = arith.constant dense<0.000000e+00> : vector<1xf32>
    %908 = vector.multi_reduction <add>, %907, %cst_253 [1, 2] : vector<1x8x1xf32> to vector<1xf32>
    %909 = vector.shape_cast %908 : vector<1xf32> to vector<1x1x1xf32>
    %910 = vector.extract %909[0, 0, 0] : f32 from vector<1x1x1xf32>
    %911 = math.sqrt %910 : f32
    %cst_254 = arith.constant 9.99999974E-5 : f32
    %912 = arith.cmpf oge, %911, %cst_254 : f32
    %913 = arith.extui %912 : i1 to i32
    %914 = arith.sitofp %913 : i32 to f32
    %915 = arith.mulf %888, %914 : f32
    %916 = vector.broadcast %915 : f32 to vector<8x1xf32>
    %917 = arith.mulf %905, %916 : vector<8x1xf32>
    %cst_255 = arith.constant 1.1920929E-7 : f32
    %918 = arith.addf %911, %cst_255 : f32
    %919 = vector.broadcast %918 : f32 to vector<8x1xf32>
    %920 = arith.divf %917, %919 : vector<8x1xf32>
    %cst_256 = arith.constant dense<0.000000e+00> : vector<8x1xf32>
    %921 = tpu.matmul %747, %920, %cst_256 {dimension_numbers = #tpu.dot_dimension_numbers<[1], [0], [0], [1], [0, 0, 1, 1], [], []>} : vector<8x8xf32>, vector<8x1xf32>, vector<8x1xf32> -> vector<8x1xf32>
    %922 = arith.mulf %920, %921 : vector<8x1xf32>
    %923 = vector.shape_cast %922 : vector<8x1xf32> to vector<1x8x1xf32>
    %cst_257 = arith.constant dense<0.000000e+00> : vector<1xf32>
    %924 = vector.multi_reduction <add>, %923, %cst_257 [1, 2] : vector<1x8x1xf32> to vector<1xf32>
    %925 = vector.shape_cast %924 : vector<1xf32> to vector<1x1x1xf32>
    %926 = vector.extract %925[0, 0, 0] : f32 from vector<1x1x1xf32>
    %927 = vector.broadcast %926 : f32 to vector<8x1xf32>
    %928 = arith.mulf %927, %920 : vector<8x1xf32>
    %929 = arith.subf %921, %928 : vector<8x1xf32>
    %930 = vector.broadcast %911 : f32 to vector<8x1xf32>
    %931 = arith.mulf %930, %893 : vector<8x1xf32>
    %932 = arith.subf %929, %931 : vector<8x1xf32>
    %933 = arith.mulf %932, %932 : vector<8x1xf32>
    %934 = vector.shape_cast %933 : vector<8x1xf32> to vector<1x8x1xf32>
    %cst_258 = arith.constant dense<0.000000e+00> : vector<1xf32>
    %935 = vector.multi_reduction <add>, %934, %cst_258 [1, 2] : vector<1x8x1xf32> to vector<1xf32>
    %936 = vector.shape_cast %935 : vector<1xf32> to vector<1x1x1xf32>
    %937 = vector.extract %936[0, 0, 0] : f32 from vector<1x1x1xf32>
    %938 = math.sqrt %937 : f32
    %cst_259 = arith.constant 9.99999974E-5 : f32
    %939 = arith.cmpf oge, %938, %cst_259 : f32
    %940 = arith.extui %939 : i1 to i32
    %941 = arith.sitofp %940 : i32 to f32
    %942 = arith.mulf %915, %941 : f32
    %943 = vector.broadcast %942 : f32 to vector<8x1xf32>
    %944 = arith.mulf %932, %943 : vector<8x1xf32>
    %cst_260 = arith.constant 1.1920929E-7 : f32
    %945 = arith.addf %938, %cst_260 : f32
    %946 = vector.broadcast %945 : f32 to vector<8x1xf32>
    %947 = arith.divf %944, %946 : vector<8x1xf32>
    %cst_261 = arith.constant dense<0.000000e+00> : vector<8x1xf32>
    %948 = tpu.matmul %747, %947, %cst_261 {dimension_numbers = #tpu.dot_dimension_numbers<[1], [0], [0], [1], [0, 0, 1, 1], [], []>} : vector<8x8xf32>, vector<8x1xf32>, vector<8x1xf32> -> vector<8x1xf32>
    %949 = arith.mulf %947, %948 : vector<8x1xf32>
    %950 = vector.shape_cast %949 : vector<8x1xf32> to vector<1x8x1xf32>
    %cst_262 = arith.constant dense<0.000000e+00> : vector<1xf32>
    %951 = vector.multi_reduction <add>, %950, %cst_262 [1, 2] : vector<1x8x1xf32> to vector<1xf32>
    %952 = vector.shape_cast %951 : vector<1xf32> to vector<1x1x1xf32>
    %953 = vector.extract %952[0, 0, 0] : f32 from vector<1x1x1xf32>
    %954 = vector.broadcast %953 : f32 to vector<8x1xf32>
    %955 = arith.mulf %954, %947 : vector<8x1xf32>
    %956 = arith.subf %948, %955 : vector<8x1xf32>
    %957 = vector.broadcast %938 : f32 to vector<8x1xf32>
    %958 = arith.mulf %957, %920 : vector<8x1xf32>
    %959 = arith.subf %956, %958 : vector<8x1xf32>
    %960 = arith.mulf %959, %959 : vector<8x1xf32>
    %961 = vector.shape_cast %960 : vector<8x1xf32> to vector<1x8x1xf32>
    %cst_263 = arith.constant dense<0.000000e+00> : vector<1xf32>
    %962 = vector.multi_reduction <add>, %961, %cst_263 [1, 2] : vector<1x8x1xf32> to vector<1xf32>
    %963 = vector.shape_cast %962 : vector<1xf32> to vector<1x1x1xf32>
    %964 = vector.extract %963[0, 0, 0] : f32 from vector<1x1x1xf32>
    %965 = math.sqrt %964 : f32
    %cst_264 = arith.constant 9.99999974E-5 : f32
    %966 = arith.cmpf oge, %965, %cst_264 : f32
    %967 = arith.extui %966 : i1 to i32
    %968 = arith.sitofp %967 : i32 to f32
    %969 = arith.mulf %942, %968 : f32
    %cst_265 = arith.constant 0.000000e+00 : f32
    %970 = vector.broadcast %cst_265 : f32 to vector<8x8xf32>
    %971 = arith.mulf %764, %780 : f32
    %972 = vector.broadcast %971 : f32 to vector<8x8xf32>
    %973 = arith.mulf %972, %12 : vector<8x8xf32>
    %974 = arith.addf %970, %973 : vector<8x8xf32>
    %975 = arith.mulf %791, %807 : f32
    %976 = vector.broadcast %975 : f32 to vector<8x8xf32>
    %977 = arith.mulf %976, %19 : vector<8x8xf32>
    %978 = arith.addf %974, %977 : vector<8x8xf32>
    %979 = arith.mulf %818, %834 : f32
    %980 = vector.broadcast %979 : f32 to vector<8x8xf32>
    %981 = arith.mulf %980, %26 : vector<8x8xf32>
    %982 = arith.addf %978, %981 : vector<8x8xf32>
    %983 = arith.mulf %845, %861 : f32
    %984 = vector.broadcast %983 : f32 to vector<8x8xf32>
    %985 = arith.mulf %984, %33 : vector<8x8xf32>
    %986 = arith.addf %982, %985 : vector<8x8xf32>
    %987 = arith.mulf %872, %888 : f32
    %988 = vector.broadcast %987 : f32 to vector<8x8xf32>
    %989 = arith.mulf %988, %40 : vector<8x8xf32>
    %990 = arith.addf %986, %989 : vector<8x8xf32>
    %991 = arith.mulf %899, %915 : f32
    %992 = vector.broadcast %991 : f32 to vector<8x8xf32>
    %993 = arith.mulf %992, %47 : vector<8x8xf32>
    %994 = arith.addf %990, %993 : vector<8x8xf32>
    %995 = arith.mulf %926, %942 : f32
    %996 = vector.broadcast %995 : f32 to vector<8x8xf32>
    %997 = arith.mulf %996, %54 : vector<8x8xf32>
    %998 = arith.addf %994, %997 : vector<8x8xf32>
    %999 = arith.mulf %953, %969 : f32
    %1000 = vector.broadcast %999 : f32 to vector<8x8xf32>
    %1001 = arith.mulf %1000, %61 : vector<8x8xf32>
    %1002 = arith.addf %998, %1001 : vector<8x8xf32>
    %1003 = arith.mulf %776, %780 : f32
    %1004 = vector.broadcast %1003 : f32 to vector<8x8xf32>
    %1005 = arith.mulf %1004, %74 : vector<8x8xf32>
    %1006 = arith.addf %1002, %1005 : vector<8x8xf32>
    %1007 = arith.mulf %803, %807 : f32
    %1008 = vector.broadcast %1007 : f32 to vector<8x8xf32>
    %1009 = arith.mulf %1008, %87 : vector<8x8xf32>
    %1010 = arith.addf %1006, %1009 : vector<8x8xf32>
    %1011 = arith.mulf %830, %834 : f32
    %1012 = vector.broadcast %1011 : f32 to vector<8x8xf32>
    %1013 = arith.mulf %1012, %100 : vector<8x8xf32>
    %1014 = arith.addf %1010, %1013 : vector<8x8xf32>
    %1015 = arith.mulf %857, %861 : f32
    %1016 = vector.broadcast %1015 : f32 to vector<8x8xf32>
    %1017 = arith.mulf %1016, %113 : vector<8x8xf32>
    %1018 = arith.addf %1014, %1017 : vector<8x8xf32>
    %1019 = arith.mulf %884, %888 : f32
    %1020 = vector.broadcast %1019 : f32 to vector<8x8xf32>
    %1021 = arith.mulf %1020, %126 : vector<8x8xf32>
    %1022 = arith.addf %1018, %1021 : vector<8x8xf32>
    %1023 = arith.mulf %911, %915 : f32
    %1024 = vector.broadcast %1023 : f32 to vector<8x8xf32>
    %1025 = arith.mulf %1024, %139 : vector<8x8xf32>
    %1026 = arith.addf %1022, %1025 : vector<8x8xf32>
    %1027 = arith.mulf %938, %942 : f32
    %1028 = vector.broadcast %1027 : f32 to vector<8x8xf32>
    %1029 = arith.mulf %1028, %152 : vector<8x8xf32>
    %1030 = arith.addf %1026, %1029 : vector<8x8xf32>
    %cst_266 = arith.constant 0.000000e+00 : f32
    %1031 = vector.broadcast %cst_266 : f32 to vector<8x8xf32>
    %1032 = vector.broadcast %780 : f32 to vector<8x1xf32>
    %1033 = arith.mulf %757, %1032 : vector<8x1xf32>
    %1034 = vector.broadcast %1033 : vector<8x1xf32> to vector<8x8xf32>
    %1035 = vector.broadcast %156 : vector<1x8xf32> to vector<8x8xf32>
    %1036 = arith.mulf %1034, %1035 : vector<8x8xf32>
    %1037 = arith.addf %1031, %1036 : vector<8x8xf32>
    %1038 = vector.broadcast %807 : f32 to vector<8x1xf32>
    %1039 = arith.mulf %785, %1038 : vector<8x1xf32>
    %1040 = vector.broadcast %1039 : vector<8x1xf32> to vector<8x8xf32>
    %1041 = vector.broadcast %160 : vector<1x8xf32> to vector<8x8xf32>
    %1042 = arith.mulf %1040, %1041 : vector<8x8xf32>
    %1043 = arith.addf %1037, %1042 : vector<8x8xf32>
    %1044 = vector.broadcast %834 : f32 to vector<8x1xf32>
    %1045 = arith.mulf %812, %1044 : vector<8x1xf32>
    %1046 = vector.broadcast %1045 : vector<8x1xf32> to vector<8x8xf32>
    %1047 = vector.broadcast %164 : vector<1x8xf32> to vector<8x8xf32>
    %1048 = arith.mulf %1046, %1047 : vector<8x8xf32>
    %1049 = arith.addf %1043, %1048 : vector<8x8xf32>
    %1050 = vector.broadcast %861 : f32 to vector<8x1xf32>
    %1051 = arith.mulf %839, %1050 : vector<8x1xf32>
    %1052 = vector.broadcast %1051 : vector<8x1xf32> to vector<8x8xf32>
    %1053 = vector.broadcast %168 : vector<1x8xf32> to vector<8x8xf32>
    %1054 = arith.mulf %1052, %1053 : vector<8x8xf32>
    %1055 = arith.addf %1049, %1054 : vector<8x8xf32>
    %1056 = vector.broadcast %888 : f32 to vector<8x1xf32>
    %1057 = arith.mulf %866, %1056 : vector<8x1xf32>
    %1058 = vector.broadcast %1057 : vector<8x1xf32> to vector<8x8xf32>
    %1059 = vector.broadcast %172 : vector<1x8xf32> to vector<8x8xf32>
    %1060 = arith.mulf %1058, %1059 : vector<8x8xf32>
    %1061 = arith.addf %1055, %1060 : vector<8x8xf32>
    %1062 = vector.broadcast %915 : f32 to vector<8x1xf32>
    %1063 = arith.mulf %893, %1062 : vector<8x1xf32>
    %1064 = vector.broadcast %1063 : vector<8x1xf32> to vector<8x8xf32>
    %1065 = vector.broadcast %176 : vector<1x8xf32> to vector<8x8xf32>
    %1066 = arith.mulf %1064, %1065 : vector<8x8xf32>
    %1067 = arith.addf %1061, %1066 : vector<8x8xf32>
    %1068 = vector.broadcast %942 : f32 to vector<8x1xf32>
    %1069 = arith.mulf %920, %1068 : vector<8x1xf32>
    %1070 = vector.broadcast %1069 : vector<8x1xf32> to vector<8x8xf32>
    %1071 = vector.broadcast %180 : vector<1x8xf32> to vector<8x8xf32>
    %1072 = arith.mulf %1070, %1071 : vector<8x8xf32>
    %1073 = arith.addf %1067, %1072 : vector<8x8xf32>
    %1074 = vector.broadcast %969 : f32 to vector<8x1xf32>
    %1075 = arith.mulf %947, %1074 : vector<8x1xf32>
    %1076 = vector.broadcast %1075 : vector<8x1xf32> to vector<8x8xf32>
    %1077 = vector.broadcast %184 : vector<1x8xf32> to vector<8x8xf32>
    %1078 = arith.mulf %1076, %1077 : vector<8x8xf32>
    %1079 = arith.addf %1073, %1078 : vector<8x8xf32>
    %cst_267 = arith.constant 0.000000e+00 : f32
    %1080 = arith.addf %cst_267, %780 : f32
    %1081 = arith.addf %1080, %807 : f32
    %1082 = arith.addf %1081, %834 : f32
    %1083 = arith.addf %1082, %861 : f32
    %1084 = arith.addf %1083, %888 : f32
    %1085 = arith.addf %1084, %915 : f32
    %1086 = arith.addf %1085, %942 : f32
    %1087 = arith.addf %1086, %969 : f32
    %1088 = vector.broadcast %1087 : f32 to vector<8x1xf32>
    %1089 = arith.cmpf olt, %4, %1088 : vector<8x1xf32>
    %1090 = arith.extui %1089 : vector<8x1xi1> to vector<8x1xi32>
    %1091 = arith.sitofp %1090 : vector<8x1xi32> to vector<8x1xf32>
    %1092 = vector.broadcast %1091 : vector<8x1xf32> to vector<8x8xf32>
    %1093 = arith.mulf %1079, %1092 : vector<8x8xf32>
    %cst_268 = arith.constant dense<0.000000e+00> : vector<8x8xf32>
    %1094 = tpu.matmul %1093, %1030, %cst_268 {dimension_numbers = #tpu.dot_dimension_numbers<[1], [0], [0], [1], [0, 0, 1, 1], [], []>} : vector<8x8xf32>, vector<8x8xf32>, vector<8x8xf32> -> vector<8x8xf32>
    %1095 = tpu.transpose %1093, [1, 0] : vector<8x8xf32> -> vector<8x8xf32>
    %cst_269 = arith.constant dense<0.000000e+00> : vector<8x8xf32>
    %1096 = tpu.matmul %1094, %1095, %cst_269 {dimension_numbers = #tpu.dot_dimension_numbers<[1], [0], [0], [1], [0, 0, 1, 1], [], []>} : vector<8x8xf32>, vector<8x8xf32>, vector<8x8xf32> -> vector<8x8xf32>
    %cst_270 = arith.constant dense<0.000000e+00> : vector<8x8xf32>
    %1097 = tpu.matmul %1030, %1030, %cst_270 {dimension_numbers = #tpu.dot_dimension_numbers<[1], [0], [0], [1], [0, 0, 1, 1], [], []>} : vector<8x8xf32>, vector<8x8xf32>, vector<8x8xf32> -> vector<8x8xf32>
    %cst_271 = arith.constant dense<0.000000e+00> : vector<8x8xf32>
    %1098 = tpu.matmul %1093, %1097, %cst_271 {dimension_numbers = #tpu.dot_dimension_numbers<[1], [0], [0], [1], [0, 0, 1, 1], [], []>} : vector<8x8xf32>, vector<8x8xf32>, vector<8x8xf32> -> vector<8x8xf32>
    %1099 = tpu.transpose %1093, [1, 0] : vector<8x8xf32> -> vector<8x8xf32>
    %cst_272 = arith.constant dense<0.000000e+00> : vector<8x8xf32>
    %1100 = tpu.matmul %1098, %1099, %cst_272 {dimension_numbers = #tpu.dot_dimension_numbers<[1], [0], [0], [1], [0, 0, 1, 1], [], []>} : vector<8x8xf32>, vector<8x8xf32>, vector<8x8xf32> -> vector<8x8xf32>
    %c0_273 = arith.constant 0 : index
    %c0_274 = arith.constant 0 : index
    %1101 = vector.load %arg5[%c0_273, %c0_274] : memref<1x32xf32, #tpu.memory_space<vmem>>, vector<1x32xf32>
    %cst_275 = arith.constant 0.000000e+00 : f32
    %1102 = vector.broadcast %cst_275 : f32 to vector<8x32xf32>
    %cst_276 = arith.constant dense<0.000000e+00> : vector<8x8xf32>
    %1103 = tpu.matmul %701, %699, %cst_276 {dimension_numbers = #tpu.dot_dimension_numbers<[1], [0], [0], [1], [0, 0, 1, 1], [], []>} : vector<8x8xf32>, vector<8x8xf32>, vector<8x8xf32> -> vector<8x8xf32>
    %c0_277 = arith.constant 0 : index
    %c0_278 = arith.constant 0 : index
    %1104 = vector.load %arg4[%c0_277, %c0_278] : memref<56x32xf32, #tpu.memory_space<vmem>>, vector<8x32xf32>
    %cst_279 = arith.constant dense<0.000000e+00> : vector<8x32xf32>
    %1105 = tpu.matmul %1103, %1104, %cst_279 {dimension_numbers = #tpu.dot_dimension_numbers<[1], [0], [0], [1], [0, 0, 1, 1], [], []>} : vector<8x8xf32>, vector<8x32xf32>, vector<8x32xf32> -> vector<8x32xf32>
    %1106 = arith.addf %1102, %1105 : vector<8x32xf32>
    %cst_280 = arith.constant dense<0.000000e+00> : vector<8x8xf32>
    %1107 = tpu.matmul %701, %1103, %cst_280 {dimension_numbers = #tpu.dot_dimension_numbers<[1], [0], [0], [1], [0, 0, 1, 1], [], []>} : vector<8x8xf32>, vector<8x8xf32>, vector<8x8xf32> -> vector<8x8xf32>
    %c8_281 = arith.constant 8 : index
    %c0_282 = arith.constant 0 : index
    %1108 = vector.load %arg4[%c8_281, %c0_282] : memref<56x32xf32, #tpu.memory_space<vmem>>, vector<8x32xf32>
    %cst_283 = arith.constant dense<0.000000e+00> : vector<8x32xf32>
    %1109 = tpu.matmul %1107, %1108, %cst_283 {dimension_numbers = #tpu.dot_dimension_numbers<[1], [0], [0], [1], [0, 0, 1, 1], [], []>} : vector<8x8xf32>, vector<8x32xf32>, vector<8x32xf32> -> vector<8x32xf32>
    %1110 = arith.addf %1106, %1109 : vector<8x32xf32>
    %cst_284 = arith.constant dense<0.000000e+00> : vector<8x8xf32>
    %1111 = tpu.matmul %1096, %699, %cst_284 {dimension_numbers = #tpu.dot_dimension_numbers<[1], [0], [0], [1], [0, 0, 1, 1], [], []>} : vector<8x8xf32>, vector<8x8xf32>, vector<8x8xf32> -> vector<8x8xf32>
    %c16_285 = arith.constant 16 : index
    %c0_286 = arith.constant 0 : index
    %1112 = vector.load %arg4[%c16_285, %c0_286] : memref<56x32xf32, #tpu.memory_space<vmem>>, vector<8x32xf32>
    %cst_287 = arith.constant dense<0.000000e+00> : vector<8x32xf32>
    %1113 = tpu.matmul %1111, %1112, %cst_287 {dimension_numbers = #tpu.dot_dimension_numbers<[1], [0], [0], [1], [0, 0, 1, 1], [], []>} : vector<8x8xf32>, vector<8x32xf32>, vector<8x32xf32> -> vector<8x32xf32>
    %1114 = arith.addf %1110, %1113 : vector<8x32xf32>
    %cst_288 = arith.constant dense<0.000000e+00> : vector<8x8xf32>
    %1115 = tpu.matmul %1100, %699, %cst_288 {dimension_numbers = #tpu.dot_dimension_numbers<[1], [0], [0], [1], [0, 0, 1, 1], [], []>} : vector<8x8xf32>, vector<8x8xf32>, vector<8x8xf32> -> vector<8x8xf32>
    %c24_289 = arith.constant 24 : index
    %c0_290 = arith.constant 0 : index
    %1116 = vector.load %arg4[%c24_289, %c0_290] : memref<56x32xf32, #tpu.memory_space<vmem>>, vector<8x32xf32>
    %cst_291 = arith.constant dense<0.000000e+00> : vector<8x32xf32>
    %1117 = tpu.matmul %1115, %1116, %cst_291 {dimension_numbers = #tpu.dot_dimension_numbers<[1], [0], [0], [1], [0, 0, 1, 1], [], []>} : vector<8x8xf32>, vector<8x32xf32>, vector<8x32xf32> -> vector<8x32xf32>
    %1118 = arith.addf %1114, %1117 : vector<8x32xf32>
    %c32_292 = arith.constant 32 : index
    %c0_293 = arith.constant 0 : index
    %1119 = vector.load %arg4[%c32_292, %c0_293] : memref<56x32xf32, #tpu.memory_space<vmem>>, vector<8x32xf32>
    %cst_294 = arith.constant dense<0.000000e+00> : vector<8x32xf32>
    %1120 = tpu.matmul %1103, %1119, %cst_294 {dimension_numbers = #tpu.dot_dimension_numbers<[1], [0], [0], [1], [0, 0, 1, 1], [], []>} : vector<8x8xf32>, vector<8x32xf32>, vector<8x32xf32> -> vector<8x32xf32>
    %1121 = arith.addf %1118, %1120 : vector<8x32xf32>
    %c3 = arith.constant 3 : index
    %c0_295 = arith.constant 0 : index
    %c0_296 = arith.constant 0 : index
    %1122 = vector.load %arg2[%c3, %c0_295, %c0_296] : memref<6x8x8xf32, #tpu.memory_space<vmem>>, vector<1x8x8xf32>
    %1123 = vector.shape_cast %1122 : vector<1x8x8xf32> to vector<8x8xf32>
    %cst_297 = arith.constant dense<0.000000e+00> : vector<8x8xf32>
    %1124 = tpu.matmul %1123, %699, %cst_297 {dimension_numbers = #tpu.dot_dimension_numbers<[1], [0], [0], [1], [0, 0, 1, 1], [], []>} : vector<8x8xf32>, vector<8x8xf32>, vector<8x8xf32> -> vector<8x8xf32>
    %c40_298 = arith.constant 40 : index
    %c0_299 = arith.constant 0 : index
    %1125 = vector.load %arg4[%c40_298, %c0_299] : memref<56x32xf32, #tpu.memory_space<vmem>>, vector<8x32xf32>
    %cst_300 = arith.constant dense<0.000000e+00> : vector<8x32xf32>
    %1126 = tpu.matmul %1124, %1125, %cst_300 {dimension_numbers = #tpu.dot_dimension_numbers<[1], [0], [0], [1], [0, 0, 1, 1], [], []>} : vector<8x8xf32>, vector<8x32xf32>, vector<8x32xf32> -> vector<8x32xf32>
    %1127 = arith.addf %1121, %1126 : vector<8x32xf32>
    %c5 = arith.constant 5 : index
    %c0_301 = arith.constant 0 : index
    %c0_302 = arith.constant 0 : index
    %1128 = vector.load %arg2[%c5, %c0_301, %c0_302] : memref<6x8x8xf32, #tpu.memory_space<vmem>>, vector<1x8x8xf32>
    %1129 = vector.shape_cast %1128 : vector<1x8x8xf32> to vector<8x8xf32>
    %cst_303 = arith.constant dense<0.000000e+00> : vector<8x8xf32>
    %1130 = tpu.matmul %1129, %699, %cst_303 {dimension_numbers = #tpu.dot_dimension_numbers<[1], [0], [0], [1], [0, 0, 1, 1], [], []>} : vector<8x8xf32>, vector<8x8xf32>, vector<8x8xf32> -> vector<8x8xf32>
    %c48_304 = arith.constant 48 : index
    %c0_305 = arith.constant 0 : index
    %1131 = vector.load %arg4[%c48_304, %c0_305] : memref<56x32xf32, #tpu.memory_space<vmem>>, vector<8x32xf32>
    %cst_306 = arith.constant dense<0.000000e+00> : vector<8x32xf32>
    %1132 = tpu.matmul %1130, %1131, %cst_306 {dimension_numbers = #tpu.dot_dimension_numbers<[1], [0], [0], [1], [0, 0, 1, 1], [], []>} : vector<8x8xf32>, vector<8x32xf32>, vector<8x32xf32> -> vector<8x32xf32>
    %1133 = arith.addf %1127, %1132 : vector<8x32xf32>
    %1134 = vector.broadcast %1101 : vector<1x32xf32> to vector<8x32xf32>
    %1135 = arith.addf %1133, %1134 : vector<8x32xf32>
    %cst_307 = arith.constant 0.000000e+00 : f32
    %1136 = vector.broadcast %cst_307 : f32 to vector<8x32xf32>
    %1137 = arith.maximumf %1135, %1136 : vector<8x32xf32>
    %c0_308 = arith.constant 0 : index
    %c0_309 = arith.constant 0 : index
    %1138 = vector.load %arg7[%c0_308, %c0_309] : memref<1x32xf32, #tpu.memory_space<vmem>>, vector<1x32xf32>
    %cst_310 = arith.constant 0.000000e+00 : f32
    %1139 = vector.broadcast %cst_310 : f32 to vector<8x32xf32>
    %cst_311 = arith.constant dense<0.000000e+00> : vector<8x32xf32>
    %1140 = tpu.matmul %701, %1137, %cst_311 {dimension_numbers = #tpu.dot_dimension_numbers<[1], [0], [0], [1], [0, 0, 1, 1], [], []>} : vector<8x8xf32>, vector<8x32xf32>, vector<8x32xf32> -> vector<8x32xf32>
    %c0_312 = arith.constant 0 : index
    %c0_313 = arith.constant 0 : index
    %1141 = vector.load %arg6[%c0_312, %c0_313] : memref<224x32xf32, #tpu.memory_space<vmem>>, vector<32x32xf32>
    %cst_314 = arith.constant dense<0.000000e+00> : vector<8x32xf32>
    %1142 = tpu.matmul %1140, %1141, %cst_314 {dimension_numbers = #tpu.dot_dimension_numbers<[1], [0], [0], [1], [0, 0, 1, 1], [], []>} : vector<8x32xf32>, vector<32x32xf32>, vector<8x32xf32> -> vector<8x32xf32>
    %1143 = arith.addf %1139, %1142 : vector<8x32xf32>
    %cst_315 = arith.constant dense<0.000000e+00> : vector<8x32xf32>
    %1144 = tpu.matmul %701, %1140, %cst_315 {dimension_numbers = #tpu.dot_dimension_numbers<[1], [0], [0], [1], [0, 0, 1, 1], [], []>} : vector<8x8xf32>, vector<8x32xf32>, vector<8x32xf32> -> vector<8x32xf32>
    %c32_316 = arith.constant 32 : index
    %c0_317 = arith.constant 0 : index
    %1145 = vector.load %arg6[%c32_316, %c0_317] : memref<224x32xf32, #tpu.memory_space<vmem>>, vector<32x32xf32>
    %cst_318 = arith.constant dense<0.000000e+00> : vector<8x32xf32>
    %1146 = tpu.matmul %1144, %1145, %cst_318 {dimension_numbers = #tpu.dot_dimension_numbers<[1], [0], [0], [1], [0, 0, 1, 1], [], []>} : vector<8x32xf32>, vector<32x32xf32>, vector<8x32xf32> -> vector<8x32xf32>
    %1147 = arith.addf %1143, %1146 : vector<8x32xf32>
    %cst_319 = arith.constant dense<0.000000e+00> : vector<8x32xf32>
    %1148 = tpu.matmul %1096, %1137, %cst_319 {dimension_numbers = #tpu.dot_dimension_numbers<[1], [0], [0], [1], [0, 0, 1, 1], [], []>} : vector<8x8xf32>, vector<8x32xf32>, vector<8x32xf32> -> vector<8x32xf32>
    %c64_320 = arith.constant 64 : index
    %c0_321 = arith.constant 0 : index
    %1149 = vector.load %arg6[%c64_320, %c0_321] : memref<224x32xf32, #tpu.memory_space<vmem>>, vector<32x32xf32>
    %cst_322 = arith.constant dense<0.000000e+00> : vector<8x32xf32>
    %1150 = tpu.matmul %1148, %1149, %cst_322 {dimension_numbers = #tpu.dot_dimension_numbers<[1], [0], [0], [1], [0, 0, 1, 1], [], []>} : vector<8x32xf32>, vector<32x32xf32>, vector<8x32xf32> -> vector<8x32xf32>
    %1151 = arith.addf %1147, %1150 : vector<8x32xf32>
    %cst_323 = arith.constant dense<0.000000e+00> : vector<8x32xf32>
    %1152 = tpu.matmul %1100, %1137, %cst_323 {dimension_numbers = #tpu.dot_dimension_numbers<[1], [0], [0], [1], [0, 0, 1, 1], [], []>} : vector<8x8xf32>, vector<8x32xf32>, vector<8x32xf32> -> vector<8x32xf32>
    %c96_324 = arith.constant 96 : index
    %c0_325 = arith.constant 0 : index
    %1153 = vector.load %arg6[%c96_324, %c0_325] : memref<224x32xf32, #tpu.memory_space<vmem>>, vector<32x32xf32>
    %cst_326 = arith.constant dense<0.000000e+00> : vector<8x32xf32>
    %1154 = tpu.matmul %1152, %1153, %cst_326 {dimension_numbers = #tpu.dot_dimension_numbers<[1], [0], [0], [1], [0, 0, 1, 1], [], []>} : vector<8x32xf32>, vector<32x32xf32>, vector<8x32xf32> -> vector<8x32xf32>
    %1155 = arith.addf %1151, %1154 : vector<8x32xf32>
    %c128_327 = arith.constant 128 : index
    %c0_328 = arith.constant 0 : index
    %1156 = vector.load %arg6[%c128_327, %c0_328] : memref<224x32xf32, #tpu.memory_space<vmem>>, vector<32x32xf32>
    %cst_329 = arith.constant dense<0.000000e+00> : vector<8x32xf32>
    %1157 = tpu.matmul %1140, %1156, %cst_329 {dimension_numbers = #tpu.dot_dimension_numbers<[1], [0], [0], [1], [0, 0, 1, 1], [], []>} : vector<8x32xf32>, vector<32x32xf32>, vector<8x32xf32> -> vector<8x32xf32>
    %1158 = arith.addf %1155, %1157 : vector<8x32xf32>
    %c3_330 = arith.constant 3 : index
    %c0_331 = arith.constant 0 : index
    %c0_332 = arith.constant 0 : index
    %1159 = vector.load %arg2[%c3_330, %c0_331, %c0_332] : memref<6x8x8xf32, #tpu.memory_space<vmem>>, vector<1x8x8xf32>
    %1160 = vector.shape_cast %1159 : vector<1x8x8xf32> to vector<8x8xf32>
    %cst_333 = arith.constant dense<0.000000e+00> : vector<8x32xf32>
    %1161 = tpu.matmul %1160, %1137, %cst_333 {dimension_numbers = #tpu.dot_dimension_numbers<[1], [0], [0], [1], [0, 0, 1, 1], [], []>} : vector<8x8xf32>, vector<8x32xf32>, vector<8x32xf32> -> vector<8x32xf32>
    %c160_334 = arith.constant 160 : index
    %c0_335 = arith.constant 0 : index
    %1162 = vector.load %arg6[%c160_334, %c0_335] : memref<224x32xf32, #tpu.memory_space<vmem>>, vector<32x32xf32>
    %cst_336 = arith.constant dense<0.000000e+00> : vector<8x32xf32>
    %1163 = tpu.matmul %1161, %1162, %cst_336 {dimension_numbers = #tpu.dot_dimension_numbers<[1], [0], [0], [1], [0, 0, 1, 1], [], []>} : vector<8x32xf32>, vector<32x32xf32>, vector<8x32xf32> -> vector<8x32xf32>
    %1164 = arith.addf %1158, %1163 : vector<8x32xf32>
    %c5_337 = arith.constant 5 : index
    %c0_338 = arith.constant 0 : index
    %c0_339 = arith.constant 0 : index
    %1165 = vector.load %arg2[%c5_337, %c0_338, %c0_339] : memref<6x8x8xf32, #tpu.memory_space<vmem>>, vector<1x8x8xf32>
    %1166 = vector.shape_cast %1165 : vector<1x8x8xf32> to vector<8x8xf32>
    %cst_340 = arith.constant dense<0.000000e+00> : vector<8x32xf32>
    %1167 = tpu.matmul %1166, %1137, %cst_340 {dimension_numbers = #tpu.dot_dimension_numbers<[1], [0], [0], [1], [0, 0, 1, 1], [], []>} : vector<8x8xf32>, vector<8x32xf32>, vector<8x32xf32> -> vector<8x32xf32>
    %c192_341 = arith.constant 192 : index
    %c0_342 = arith.constant 0 : index
    %1168 = vector.load %arg6[%c192_341, %c0_342] : memref<224x32xf32, #tpu.memory_space<vmem>>, vector<32x32xf32>
    %cst_343 = arith.constant dense<0.000000e+00> : vector<8x32xf32>
    %1169 = tpu.matmul %1167, %1168, %cst_343 {dimension_numbers = #tpu.dot_dimension_numbers<[1], [0], [0], [1], [0, 0, 1, 1], [], []>} : vector<8x32xf32>, vector<32x32xf32>, vector<8x32xf32> -> vector<8x32xf32>
    %1170 = arith.addf %1164, %1169 : vector<8x32xf32>
    %1171 = vector.broadcast %1138 : vector<1x32xf32> to vector<8x32xf32>
    %1172 = arith.addf %1170, %1171 : vector<8x32xf32>
    %cst_344 = arith.constant 0.000000e+00 : f32
    %1173 = vector.broadcast %cst_344 : f32 to vector<8x32xf32>
    %1174 = arith.maximumf %1172, %1173 : vector<8x32xf32>
    %c0_345 = arith.constant 0 : index
    %c0_346 = arith.constant 0 : index
    %1175 = vector.load %arg8[%c0_345, %c0_346] : memref<32x4xf32, #tpu.memory_space<vmem>>, vector<32x4xf32>
    %cst_347 = arith.constant dense<0.000000e+00> : vector<8x4xf32>
    %1176 = tpu.matmul %1174, %1175, %cst_347 {dimension_numbers = #tpu.dot_dimension_numbers<[1], [0], [0], [1], [0, 0, 1, 1], [], []>} : vector<8x32xf32>, vector<32x4xf32>, vector<8x4xf32> -> vector<8x4xf32>
    %c0_348 = arith.constant 0 : index
    %c0_349 = arith.constant 0 : index
    %1177 = vector.load %arg9[%c0_348, %c0_349] : memref<1x4xf32, #tpu.memory_space<vmem>>, vector<1x4xf32>
    %1178 = vector.broadcast %1177 : vector<1x4xf32> to vector<8x4xf32>
    %1179 = arith.addf %1176, %1178 : vector<8x4xf32>
    %c0_350 = arith.constant 0 : index
    %c0_351 = arith.constant 0 : index
    %1180 = vector.load %arg10[%c0_350, %c0_351] : memref<32x1xf32, #tpu.memory_space<vmem>>, vector<32x1xf32>
    %cst_352 = arith.constant dense<0.000000e+00> : vector<8x1xf32>
    %1181 = tpu.matmul %1174, %1180, %cst_352 {dimension_numbers = #tpu.dot_dimension_numbers<[1], [0], [0], [1], [0, 0, 1, 1], [], []>} : vector<8x32xf32>, vector<32x1xf32>, vector<8x1xf32> -> vector<8x1xf32>
    %c0_353 = arith.constant 0 : index
    %c0_354 = arith.constant 0 : index
    %1182 = vector.load %arg11[%c0_353, %c0_354] : memref<1x1xf32, #tpu.memory_space<vmem>>, vector<1x1xf32>
    %1183 = vector.broadcast %1182 : vector<1x1xf32> to vector<8x1xf32>
    %1184 = arith.addf %1181, %1183 : vector<8x1xf32>
    %cst_355 = arith.constant 0.000000e+00 : f32
    %1185 = vector.broadcast %cst_355 : f32 to vector<8x1xf32>
    %1186 = arith.subf %1185, %1184 : vector<8x1xf32>
    %1187 = math.exp %1186 : vector<8x1xf32>
    %cst_356 = arith.constant 1.000000e+00 : f32
    %1188 = vector.broadcast %cst_356 : f32 to vector<8x1xf32>
    %1189 = arith.addf %1188, %1187 : vector<8x1xf32>
    %cst_357 = arith.constant 1.000000e+00 : f32
    %1190 = vector.broadcast %cst_357 : f32 to vector<8x1xf32>
    %1191 = arith.divf %1190, %1189 : vector<8x1xf32>
    %1192 = vector.broadcast %1191 : vector<8x1xf32> to vector<8x4xf32>
    %1193 = arith.mulf %1192, %1179 : vector<8x4xf32>
    %cst_358 = arith.constant dense<0.000000e+00> : vector<4xf32>
    %1194 = vector.multi_reduction <add>, %1193, %cst_358 [0] : vector<8x4xf32> to vector<4xf32>
    %1195 = vector.shape_cast %1194 : vector<4xf32> to vector<1x4xf32>
    %cst_359 = arith.constant 8.000000e+00 : f32
    %1196 = vector.broadcast %cst_359 : f32 to vector<1x4xf32>
    %1197 = arith.divf %1195, %1196 : vector<1x4xf32>
    %c1_360 = arith.constant 1 : index
    %c0_361 = arith.constant 0 : index
    %1198 = vector.load %arg12[%c1_360, %c0_361] : memref<2x4xf32, #tpu.memory_space<vmem>>, vector<1x4xf32>
    tpu.vector_store %arg12[%c1_360, %c0_361], %1197 {strides = array<i32>} : memref<2x4xf32, #tpu.memory_space<vmem>>, vector<1x4xf32>,
    return
  }
}

</mosaic_0001>

<bundles_post_ra>
// kernel: forward.1
= control target key start
LH: loop header
LB: loop body
LE: loop exit
PB: predicated region body
PF: predicated region fallthrough
CT: control target
= control target key end

     0   :  { %s5760_s0 = inlined_call_operand.vmem [shape: s32[2,8,1], index: 0, kind: input, shape index: {}]   ;;  %s5761_s1 = inlined_call_operand.vmem [shape: f32[8,8], index: 1, kind: input, shape index: {}]   ;;  %s5762_s2 = inlined_call_operand.vmem [shape: f32[6,8,8], index: 2, kind: input, shape index: {}]   ;;  %s5763_s3 = inlined_call_operand.vmem [shape: f32[2,8,1], index: 3, kind: input, shape index: {}]   ;;  %s5764_s4 = inlined_call_operand.vmem [shape: f32[56,32], index: 4, kind: input, shape index: {}]   ;;  %s5765_s5 = inlined_call_operand.vmem [shape: f32[1,32], index: 5, kind: input, shape index: {}]   ;;  %s5766_s6 = inlined_call_operand.vmem [shape: f32[224,32], index: 6, kind: input, shape index: {}]   ;;  %s5767_s7 = inlined_call_operand.vmem [shape: f32[1,32], index: 7, kind: input, shape index: {}]   ;;  %s5768_s8 = inlined_call_operand.vmem [shape: f32[32,4], index: 8, kind: input, shape index: {}]   ;;  %s5769_s9 = inlined_call_operand.vmem [shape: f32[1,4], index: 9, kind: input, shape index: {}]   ;;  %s5770_s10 = inlined_call_operand.vmem [shape: f32[32,1], index: 10, kind: input, shape index: {}]   ;;  %s5771_s11 = inlined_call_operand.<no memory space> [shape: f32[1,1], index: 11, kind: input, shape index: {}]   ;;  %s5772_s12 = inlined_call_operand.hbm [shape: f32[2,4], index: 12, kind: output, shape index: {}]  }
   0x1   :  { %5798 = sst [smem:[#allocation7_spill]] %s5763_s3  ;;  %v17_v0 = vstv %s5771_s11 }
   0x2   :  { %5799 = sst [smem:[#allocation8_spill]] %s5765_s5  ;;  %18 = vst [vmem:[#allocation2] sm:$0x1] %v17_v0 }
   0x3   :  { %5800 = sst [smem:[#allocation9_spill]] %s5766_s6 }
   0x4   :  { %5801 = sst [smem:[#allocation10_spill]] %s5767_s7 }
   0x5   :  { %5802 = sst [smem:[#allocation11_spill]] %s5768_s8 }
   0x6   :  { %5803 = sst [smem:[#allocation12_spill]] %s5769_s9 }
   0x7   :  { %5804 = sst [smem:[#allocation13_spill]] %s5770_s10 }
   0x8   :  { %5805 = sst [smem:[#allocation14_spill]] %s5772_s12 }
   0x9   :  { %v140_v1 = vld [vmem:[%s5760_s0] sm:$0xff]  ;;  %v4318_v2 = vmov 0  }
   0xa   :  { %4183 = vset.pattern.permute.xlu0 %v4318_v2 }
   0xb   :  { %142 = vperm.xlu0 %4183, %v140_v1  }
   0xc   :  { %19 = vsyncpa [#allocation4], 0  ;;  %v147_v3 = vld [vmem:[%s5761_s1] sm:$0xff]  ;;  %v44_v4 = vlaneseq  ;;  %vm5783_vm0 = vcmask 64512   ;;  %v4319_v7 = vmov 0.0   ;;  %vm5780_vm2 = vcmask 7168  }
   0xd   :  { %167 = vmatpush.msra.mxu0 %v147_v3  ;;  %v4419_v21 = vld [vmem:[%s5763_s3] sm:$0xff]  ;;  %v4320_v24 = vmov 64.0   ;;  %s5773_s13 = smov 1.1920929e-07  }
   0xe   :  { %v4400_v5 = vand.u32 127, %v44_v4  ;;  %v349_v22 = vmul.f32 %v4419_v21, %v4419_v21  ;;  %4194 = vrcp.f32 %v4320_v24  ;;  %v172_v51 = vld [vmem:[%s5762_s2] sm:$0xff] }
   0xf   :  { %vm173_vm8 = vcmp.ne.f32.partialorder %v172_v51, 0.0 }
  0x10   :  { %v351_v23 = vsel %vm5780_vm2, %v349_v22, 0.0  ;;  %v3964_v53 = vsel %vm173_vm8, 1.0, %v4319_v7 }
  0x11   :  { %352 = vadd.xlane.f32.xlu2 %v351_v23 }
  0x14   :  { %v4195_v25 = vpop.eup %4194 }
  0x15   :  { %v251_v26 = vmul.f32 64.0, %v4195_v25  ;;  %vm255_vm3 = vweird.f32 %v4195_v25 }
  0x17   :  { %v252_v27 = vsub.f32 1.0, %v251_v26 }
  0x19   :  { %v253_v31 = vmul.f32 %v4195_v25, %v252_v27 }
  0x1b   :  { %v254_v34 = vadd.f32 %v4195_v25, %v253_v31 }
  0x1d   :  { %v256_v37 = vsel %vm255_vm3, %v4195_v25, %v254_v34 }
  0x7d   :  { %v143_v6 = vpop.permute.xlu0 %142 }
  0x7e   :  { %vm144_vm1 = vcmp.eq.s32.totalorder %v143_v6, %v4400_v5 }
  0x7f   :  { %v3962_v8 = vsel %vm144_vm1, 1.0, %v4319_v7 }
  0x80   :  { %3963 = vmatmul.msk.f32.vlgmr.msra.gmra.mxu0 %vm5783_vm0, %v3962_v8 }
  0x84   :  { %v353_v57 = vpop.xlane.xlu2 %352 }
  0x85   :  { %v354_v58 = vrot.slane %v353_v57, 4 }
  0x87   :  { %v355_v59 = vadd.f32 %v354_v58, %v353_v57 }
  0x89   :  { %v356_v60 = vrot.slane %v355_v59, 2 }
  0x8b   :  { %v357_v61 = vadd.f32 %v356_v60, %v355_v59 }
  0x8d   :  { %v358_v62 = vrot.slane %v357_v61, 1 }
  0x8f   :  { %v359_v63 = vadd.f32 %v358_v62, %v357_v61 }
  0xfd   :  { %v4405_v9 = vpop.f32.mrf.mxu0 }
  0xfe   :  { %3965 = vmatpush.xpose.msk.msra.mxu1 %vm5783_vm0, %v4405_v9  ;;  %v176_v10 = vmul.f32 %v4405_v9, %v4405_v9 }
 0x100   :  { %v177_v11 = vsel %vm5783_vm0, %v176_v10, 0.0 }
 0x101   :  { %3966 = vmatmul.msk.f32.vlgmr.msra.gmra.mxu1 %vm5783_vm0, %v4405_v9  ;;  %178 = vadd.xlane.f32.xlu0 %v177_v11 }
 0x174   :  { %v179_v12 = vpop.xlane.xlu0 %178 }
 0x175   :  { %203 = vxpose.xlu1.b32.start.end [1/1] (short) (narrow) %v179_v12, 8 }
 0x17e   :  { %v200_v13 = vpop.f32.mrf.mxu1 }
 0x17f   :  { %v237_v16 = vmul.f32 2.0, %v200_v13 }
 0x1c8   :  { %4184 = vset.pattern.permute.xlu1 %v4318_v2 }
 0x219   :  { %v219_v14 = vpop.trf.xlu1 }
 0x21a   :  { %v235_v15 = vperm.slane %v219_v14, 0 }
 0x21c   :  { %v236_v17 = vadd.f32 %v235_v15, %v179_v12 }
 0x21e   :  { %v238_v18 = vsub.f32 %v236_v17, %v237_v16 }
 0x220   :  { %v239_v19 = vmax.f32 %v238_v18, 0.0 }
 0x222   :  { %v240_v20 = vsel %vm5783_vm0, %v239_v19, 0.0  ;;  %v260_v47 = vsub.f32 0.0, %v239_v19 }
 0x223   :  { %241 = vadd.xlane.f32.xlu1 %v240_v20 }
 0x296   :  { %v242_v28 = vpop.xlane.xlu1 %241 }
 0x297   :  { %v243_v29 = vrot.slane %v242_v28, 4 }
 0x299   :  { %v244_v30 = vadd.f32 %v243_v29, %v242_v28 }
 0x29b   :  { %v245_v32 = vrot.slane %v244_v30, 2 }
 0x29d   :  { %v246_v33 = vadd.f32 %v245_v32, %v244_v30 }
 0x29f   :  { %v247_v35 = vrot.slane %v246_v33, 1 }
 0x2a1   :  { %v248_v36 = vadd.f32 %v247_v35, %v246_v33 }
 0x2a3   :  { %4067 = vpush %v248_v36 }
 0x2a4   :  { %4069 = vpush %v256_v37 }
 0x2a5   :  { %4071 = vpush %v359_v63 }
 0x2d4   :  { %s4068_s28 = spop %4067 }
 0x2d5   :  { %s4424_s29 = spop %4069 }
 0x2d6   :  { %5806 = sst [smem:[#allocation6_spill]] %s4424_s29  ;;  %s258_s30 = smul.f32 %s4424_s29, %s4068_s28 }
 0x2d7   :  { %s4072_s17 = spop %4071 }
 0x2d8   :  { %s259_s14 = smax.f32 %s5773_s13, %s258_s30  ;;  %v361_v0 = vstv %s4072_s17 }
 0x2d9   :  { %v261_v38 = vstv %s259_s14  ;;  %vm369_vm9 = vcmp.eq.f32.partialorder %v361_v0, inf  ;;  %v372_v12 = vand.u32 2147483648, %v361_v0  ;;  %vm371_vm10 = vcmp.eq.f32.partialorder %v361_v0, 0.0 }
 0x2da   :  { %4196 = vrcp.f32 %v261_v38  ;;  %v273_v42 = vand.u32 2147483648, %v261_v38  ;;  %v271_v44 = vand.u32 2147483647, %v261_v38  ;;  %vm267_vm5 = vweird.f32 %v261_v38 }
 0x2dc   :  { %v274_v46 = vor.u32 1.1754944e-38, %v273_v42  ;;  %vm272_vm7 = vcmp.eq.f32.partialorder %v271_v44, 8.507059e+37 }
 0x2e0   :  { %v4197_v39 = vpop.eup %4196 }
 0x2e1   :  { %v263_v40 = vmul.f32 %v4197_v39, %v261_v38  ;;  %vm268_vm4 = vweird.f32 %v4197_v39 }
 0x2e2   :  { %vm269_vm6 = vmor %vm267_vm5, %vm268_vm4 }
 0x2e3   :  { %v264_v41 = vsub.f32 1.0, %v263_v40 }
 0x2e5   :  { %v265_v43 = vmul.f32 %v4197_v39, %v264_v41 }
 0x2e7   :  { %v266_v45 = vadd.f32 %v4197_v39, %v265_v43 }
 0x2e9   :  { %v270_v48 = vsel %vm269_vm6, %v4197_v39, %v266_v45 }
 0x2ea   :  { %v275_v49 = vsel %vm272_vm7, %v274_v46, %v270_v48 }
 0x2eb   :  { %v276_v50 = vmul.f32 %v275_v49, %v260_v47 }
 0x2ed   :  { %v277_v52 = vmul.f32 1.442695, %v276_v50 }
 0x2ef   :  { %4198 = vpow2.f32 %v277_v52 }
 0x2f0   :  { %4200 = vrsqrt.f32 %v361_v0 }
 0x2f5   :  { %v4199_v54 = vpop.eup %4198 }
 0x2f6   :  { %v4432_v55 = vmul.f32 %v4199_v54, %v3964_v53  ;;  %v4201_v1 = vpop.eup %4200 }
 0x2f7   :  { %v363_v3 = vmul.f32 %v4201_v1, %v361_v0 }
 0x2f8   :  { %v280_v56 = vsel %vm5783_vm0, %v4432_v55, 0.0 }
 0x2f9   :  { %281 = vadd.xlane.f32.xlu2 %v280_v56  ;;  %v364_v6 = vmul.f32 %v4201_v1, %v363_v3 }
 0x2fb   :  { %v365_v8 = vmul.f32 0.5, %v364_v6 }
 0x2fd   :  { %v366_v10 = vsub.f32 1.5, %v365_v8 }
 0x2ff   :  { %v367_v11 = vmul.f32 %v4201_v1, %v366_v10 }
 0x301   :  { %v368_v13 = vmul.f32 %v367_v11, %v361_v0 }
 0x303   :  { %v370_v14 = vsel %vm369_vm9, %v361_v0, %v368_v13 }
 0x304   :  { %v373_v15 = vsel %vm371_vm10, %v372_v12, %v370_v14 }
 0x305   :  { %4073 = vpush %v373_v15 }
 0x336   :  { %s4074_s18 = spop %4073 }
 0x337   :  { %v375_v40 = vstv %s4074_s18 }
 0x338   :  { %v387_v43 = vand.u32 2147483648, %v375_v40  ;;  %vm381_vm4 = vweird.f32 %v375_v40  ;;  %v385_v45 = vand.u32 2147483647, %v375_v40 }
 0x33a   :  { %v388_v47 = vor.u32 1.1754944e-38, %v387_v43  ;;  %vm386_vm7 = vcmp.eq.f32.partialorder %v385_v45, 8.507059e+37 }
 0x36c   :  { %v282_v16 = vpop.xlane.xlu2 %281 }
 0x36d   :  { %vm283_vm11 = vcmp.eq.f32.partialorder %v282_v16, 0.0 }
 0x36e   :  { %v284_v17 = vsel %vm283_vm11, 1.0, %v4319_v7 }
 0x36f   :  { %v285_v18 = vadd.f32 %v284_v17, %v282_v16 }
 0x371   :  { %4202 = vrsqrt.f32 %v285_v18  ;;  %vm293_vm12 = vcmp.eq.f32.partialorder %v285_v18, inf  ;;  %v296_v27 = vand.u32 2147483648, %v285_v18  ;;  %vm295_vm13 = vcmp.eq.f32.partialorder %v285_v18, 0.0 }
 0x377   :  { %v4203_v19 = vpop.eup %4202 }
 0x378   :  { %v287_v20 = vmul.f32 %v4203_v19, %v285_v18 }
 0x37a   :  { %v288_v22 = vmul.f32 %v4203_v19, %v287_v20 }
 0x37c   :  { %v289_v23 = vmul.f32 0.5, %v288_v22 }
 0x37e   :  { %v290_v24 = vsub.f32 1.5, %v289_v23 }
 0x380   :  { %v291_v25 = vmul.f32 %v4203_v19, %v290_v24 }
 0x382   :  { %v292_v26 = vmul.f32 %v291_v25, %v285_v18 }
 0x384   :  { %v294_v28 = vsel %vm293_vm12, %v285_v18, %v292_v26 }
 0x385   :  { %v297_v29 = vsel %vm295_vm13, %v296_v27, %v294_v28 }
 0x386   :  { %4204 = vrcp.f32 %v297_v29  ;;  %v309_v33 = vand.u32 2147483648, %v297_v29  ;;  %v307_v35 = vand.u32 2147483647, %v297_v29  ;;  %vm303_vm15 = vweird.f32 %v297_v29 }
 0x387   :  { %4206 = vrcp.f32 %v375_v40 }
 0x388   :  { %v310_v37 = vor.u32 1.1754944e-38, %v309_v33  ;;  %vm308_vm3 = vcmp.eq.f32.partialorder %v307_v35, 8.507059e+37 }
 0x38c   :  { %v4205_v30 = vpop.eup %4204 }
 0x38d   :  { %v299_v31 = vmul.f32 %v4205_v30, %v297_v29  ;;  %vm304_vm14 = vweird.f32 %v4205_v30  ;;  %v4207_v41 = vpop.eup %4206 }
 0x38e   :  { %vm305_vm1 = vmor %vm303_vm15, %vm304_vm14  ;;  %v377_v42 = vmul.f32 %v4207_v41, %v375_v40  ;;  %vm382_vm5 = vweird.f32 %v4207_v41 }
 0x38f   :  { %v300_v32 = vsub.f32 1.0, %v299_v31  ;;  %vm383_vm6 = vmor %vm381_vm4, %vm382_vm5 }
 0x390   :  { %v378_v44 = vsub.f32 1.0, %v377_v42 }
 0x391   :  { %v301_v34 = vmul.f32 %v4205_v30, %v300_v32 }
 0x392   :  { %v379_v46 = vmul.f32 %v4207_v41, %v378_v44 }
 0x393   :  { %v302_v36 = vadd.f32 %v4205_v30, %v301_v34 }
 0x394   :  { %v380_v48 = vadd.f32 %v4207_v41, %v379_v46 }
 0x395   :  { %v306_v38 = vsel %vm305_vm1, %v4205_v30, %v302_v36 }
 0x396   :  { %v311_v39 = vsel %vm308_vm3, %v310_v37, %v306_v38  ;;  %v384_v49 = vsel %vm383_vm6, %v4207_v41, %v380_v48 }
 0x397   :  { %314 = vxpose.xlu2.b32.start.end [1/1] (short) (narrow) %v311_v39, 8  ;;  %v389_v50 = vsel %vm386_vm7, %v388_v47, %v384_v49  ;;  %v313_v53 = vmul.f32 %v311_v39, %v4432_v55 }
 0x398   :  { %v4438_v51 = vmul.f32 %v389_v50, %v4419_v21 }
 0x39a   :  { %409 = vmatpush.msra.mxu2 %v4438_v51 }
 0x3f9   :  { %4185 = vset.pattern.permute.xlu2 %v4318_v2 }
 0x430   :  { %v330_v52 = vpop.trf.xlu2 }
 0x431   :  { %v346_v54 = vperm.slane %v330_v52, 0 }
 0x433   :  { %v4443_v56 = vmul.f32 %v346_v54, %v313_v53 }
 0x435   :  { %3967 = vmatmul.msk.f32.vlgmr.msra.gmra.mxu2 %vm5783_vm0, %v4443_v56 }
 0x4b8   :  { %v411_v57 = vpop.f32.mrf.mxu2 }
 0x4b9   :  { %v414_v58 = vmul.f32 %v411_v57, %v4438_v51 }
 0x4bb   :  { %v415_v59 = vsel %vm5780_vm2, %v414_v58, 0.0 }
 0x4bc   :  { %416 = vadd.xlane.f32.xlu0 %v415_v59 }
 0x52f   :  { %v417_v21 = vpop.xlane.xlu0 %416 }
 0x530   :  { %v418_v60 = vrot.slane %v417_v21, 4 }
 0x532   :  { %v419_v61 = vadd.f32 %v418_v60, %v417_v21 }
 0x534   :  { %v420_v62 = vrot.slane %v419_v61, 2 }
 0x536   :  { %v421_v2 = vadd.f32 %v420_v62, %v419_v61 }
 0x538   :  { %v422_v63 = vrot.slane %v421_v2, 1 }
 0x53a   :  { %v423_v0 = vadd.f32 %v422_v63, %v421_v2 }
 0x53c   :  { %4075 = vpush %v423_v0 }
 0x56d   :  { %s4449_s19 = spop %4075 }
 0x56e   :  { %v425_v55 = vstv %s4449_s19 }
 0x56f   :  { %v426_v1 = vmul.f32 %v425_v55, %v4438_v51 }
 0x571   :  { %v427_v3 = vsub.f32 %v411_v57, %v426_v1 }
 0x573   :  { %v428_v6 = vmul.f32 %v427_v3, %v427_v3 }
 0x575   :  { %v429_v8 = vsel %vm5780_vm2, %v428_v6, 0.0 }
 0x576   :  { %430 = vadd.xlane.f32.xlu2 %v429_v8 }
 0x5e9   :  { %v431_v10 = vpop.xlane.xlu2 %430 }
 0x5ea   :  { %v432_v11 = vrot.slane %v431_v10, 4 }
 0x5ec   :  { %v433_v12 = vadd.f32 %v432_v11, %v431_v10 }
 0x5ee   :  { %v434_v13 = vrot.slane %v433_v12, 2 }
 0x5f0   :  { %v435_v14 = vadd.f32 %v434_v13, %v433_v12 }
 0x5f2   :  { %v436_v15 = vrot.slane %v435_v14, 1 }
 0x5f4   :  { %v437_v16 = vadd.f32 %v436_v15, %v435_v14 }
 0x5f6   :  { %4077 = vpush %v437_v16 }
 0x627   :  { %s4078_s20 = spop %4077 }
 0x628   :  { %v439_v17 = vstv %s4078_s20 }
 0x629   :  { %4208 = vrsqrt.f32 %v439_v17  ;;  %vm447_vm8 = vcmp.eq.f32.partialorder %v439_v17, inf  ;;  %v450_v26 = vand.u32 2147483648, %v439_v17  ;;  %vm449_vm9 = vcmp.eq.f32.partialorder %v439_v17, 0.0 }
 0x62f   :  { %v4209_v18 = vpop.eup %4208 }
 0x630   :  { %v441_v19 = vmul.f32 %v4209_v18, %v439_v17 }
 0x632   :  { %v442_v20 = vmul.f32 %v4209_v18, %v441_v19 }
 0x634   :  { %v443_v22 = vmul.f32 0.5, %v442_v20 }
 0x636   :  { %v444_v23 = vsub.f32 1.5, %v443_v22 }
 0x638   :  { %v445_v24 = vmul.f32 %v4209_v18, %v444_v23 }
 0x63a   :  { %v446_v25 = vmul.f32 %v445_v24, %v439_v17 }
 0x63c   :  { %v448_v27 = vsel %vm447_vm8, %v439_v17, %v446_v25 }
 0x63d   :  { %v451_v28 = vsel %vm449_vm9, %v450_v26, %v448_v27 }
 0x63e   :  { %4079 = vpush %v451_v28 }
 0x66f   :  { %s4454_s21 = spop %4079 }
 0x670   :  { %s458_s22 = sadd.f32 1.1920929e-07, %s4454_s21  ;;  %p453_p0 = scmp.ge.f32.partialorder %s4454_s21, 0.0001  ;;  %v509_v54 = vstv %s4454_s21 }
 0x671   :  { %v510_v21 = vmul.f32 %v509_v54, %v4438_v51 }
 0x672   :  { %v459_v29 = vstv %s458_s22  ;;  %s454_s23 = scalar_select %p453_p0, 1, 0 }
 0x673   :  { %4210 = vrcp.f32 %v459_v29  ;;  %v471_v33 = vand.u32 2147483648, %v459_v29  ;;  %v469_v35 = vand.u32 2147483647, %v459_v29  ;;  %vm465_vm11 = vweird.f32 %v459_v29 }
 0x674   :  { %s4458_s24 = scvt.s32.f32 %s454_s23 }
 0x675   :  { %v472_v38 = vor.u32 1.1754944e-38, %v471_v33  ;;  %vm470_vm13 = vcmp.eq.f32.partialorder %v469_v35, 8.507059e+37 }
 0x676   :  { %v456_v36 = vstv %s4458_s24 }
 0x677   :  { %v457_v39 = vmul.f32 %v456_v36, %v427_v3 }
 0x679   :  { %v4211_v30 = vpop.eup %4210 }
 0x67a   :  { %v461_v31 = vmul.f32 %v4211_v30, %v459_v29  ;;  %vm466_vm10 = vweird.f32 %v4211_v30 }
 0x67b   :  { %vm467_vm12 = vmor %vm465_vm11, %vm466_vm10 }
 0x67c   :  { %v462_v32 = vsub.f32 1.0, %v461_v31 }
 0x67e   :  { %v463_v34 = vmul.f32 %v4211_v30, %v462_v32 }
 0x680   :  { %v464_v37 = vadd.f32 %v4211_v30, %v463_v34 }
 0x682   :  { %v468_v40 = vsel %vm467_vm12, %v4211_v30, %v464_v37 }
 0x683   :  { %v473_v41 = vsel %vm470_vm13, %v472_v38, %v468_v40 }
 0x684   :  { %v4463_v42 = vmul.f32 %v473_v41, %v457_v39 }
 0x686   :  { %490 = vmatpush.msra.mxu3 %v4463_v42 }
 0x687   :  { %3968 = vmatmul.msk.f32.vlgmr.msra.gmra.mxu3 %vm5783_vm0, %v4443_v56 }
 0x70a   :  { %v492_v43 = vpop.f32.mrf.mxu3 }
 0x70b   :  { %v495_v44 = vmul.f32 %v492_v43, %v4463_v42 }
 0x70d   :  { %v496_v45 = vsel %vm5780_vm2, %v495_v44, 0.0 }
 0x70e   :  { %497 = vadd.xlane.f32.xlu0 %v496_v45 }
 0x781   :  { %v498_v46 = vpop.xlane.xlu0 %497 }
 0x782   :  { %v499_v47 = vrot.slane %v498_v46, 4 }
 0x784   :  { %v500_v48 = vadd.f32 %v499_v47, %v498_v46 }
 0x786   :  { %v501_v49 = vrot.slane %v500_v48, 2 }
 0x788   :  { %v502_v50 = vadd.f32 %v501_v49, %v500_v48 }
 0x78a   :  { %v503_v52 = vrot.slane %v502_v50, 1 }
 0x78c   :  { %v504_v53 = vadd.f32 %v503_v52, %v502_v50 }
 0x78e   :  { %4081 = vpush %v504_v53 }
 0x7bf   :  { %s4470_s25 = spop %4081 }
 0x7c0   :  { %v506_v57 = vstv %s4470_s25 }
 0x7c1   :  { %v507_v58 = vmul.f32 %v506_v57, %v4463_v42 }
 0x7c3   :  { %v508_v59 = vsub.f32 %v492_v43, %v507_v58 }
 0x7c5   :  { %v511_v60 = vsub.f32 %v508_v59, %v510_v21 }
 0x7c7   :  { %v512_v61 = vmul.f32 %v511_v60, %v511_v60 }
 0x7c9   :  { %v513_v62 = vsel %vm5780_vm2, %v512_v61, 0.0 }
 0x7ca   :  { %514 = vadd.xlane.f32.xlu0 %v513_v62 }
 0x83d   :  { %v515_v2 = vpop.xlane.xlu0 %514 }
 0x83e   :  { %v516_v63 = vrot.slane %v515_v2, 4 }
 0x840   :  { %v517_v0 = vadd.f32 %v516_v63, %v515_v2 }
 0x842   :  { %v518_v55 = vrot.slane %v517_v0, 2 }
 0x844   :  { %v519_v1 = vadd.f32 %v518_v55, %v517_v0 }
 0x846   :  { %v520_v3 = vrot.slane %v519_v1, 1 }
 0x848   :  { %v521_v6 = vadd.f32 %v520_v3, %v519_v1 }
 0x84a   :  { %4083 = vpush %v521_v6 }
 0x87b   :  { %s4084_s26 = spop %4083 }
 0x87c   :  { %v523_v8 = vstv %s4084_s26 }
 0x87d   :  { %4212 = vrsqrt.f32 %v523_v8  ;;  %vm531_vm14 = vcmp.eq.f32.partialorder %v523_v8, inf  ;;  %v534_v17 = vand.u32 2147483648, %v523_v8  ;;  %vm533_vm15 = vcmp.eq.f32.partialorder %v523_v8, 0.0 }
 0x883   :  { %v4213_v10 = vpop.eup %4212 }
 0x884   :  { %v525_v11 = vmul.f32 %v4213_v10, %v523_v8 }
 0x886   :  { %v526_v12 = vmul.f32 %v4213_v10, %v525_v11 }
 0x888   :  { %v527_v13 = vmul.f32 0.5, %v526_v12 }
 0x88a   :  { %v528_v14 = vsub.f32 1.5, %v527_v13 }
 0x88c   :  { %v529_v15 = vmul.f32 %v4213_v10, %v528_v14 }
 0x88e   :  { %v530_v16 = vmul.f32 %v529_v15, %v523_v8 }
 0x890   :  { %v532_v18 = vsel %vm531_vm14, %v523_v8, %v530_v16 }
 0x891   :  { %v535_v19 = vsel %vm533_vm15, %v534_v17, %v532_v18 }
 0x892   :  { %4085 = vpush %v535_v19 }
 0x8c3   :  { %s4477_s11 = spop %4085 }
 0x8c4   :  { %p537_p1 = scmp.ge.f32.partialorder %s4477_s11, 0.0001  ;;  %s543_s27 = sadd.f32 1.1920929e-07, %s4477_s11  ;;  %v594_v47 = vstv %s4477_s11 }
 0x8c5   :  { %v595_v52 = vmul.f32 %v594_v47, %v4463_v42 }
 0x8c6   :  { %v544_v20 = vstv %s543_s27  ;;  %s538_s28 = scalar_select %p537_p1, 1, 0 }
 0x8c7   :  { %4214 = vrcp.f32 %v544_v20  ;;  %v556_v25 = vand.u32 2147483648, %v544_v20  ;;  %v554_v27 = vand.u32 2147483647, %v544_v20  ;;  %vm550_vm3 = vweird.f32 %v544_v20 }
 0x8c8   :  { %s539_s30 = scvt.s32.f32 %s538_s28 }
 0x8c9   :  { %v557_v30 = vor.u32 1.1754944e-38, %v556_v25  ;;  %vm555_vm5 = vcmp.eq.f32.partialorder %v554_v27, 8.507059e+37 }
 0x8ca   :  { %s4482_s14 = smul.f32 %s539_s30, %s4458_s24 }
 0x8cc   :  { %v541_v28 = vstv %s4482_s14 }
 0x8cd   :  { %v4215_v22 = vpop.eup %4214  ;;  %v542_v31 = vmul.f32 %v541_v28, %v511_v60 }
 0x8ce   :  { %v546_v23 = vmul.f32 %v4215_v22, %v544_v20  ;;  %vm551_vm1 = vweird.f32 %v4215_v22 }
 0x8cf   :  { %vm552_vm4 = vmor %vm550_vm3, %vm551_vm1 }
 0x8d0   :  { %v547_v24 = vsub.f32 1.0, %v546_v23 }
 0x8d2   :  { %v548_v26 = vmul.f32 %v4215_v22, %v547_v24 }
 0x8d4   :  { %v549_v29 = vadd.f32 %v4215_v22, %v548_v26 }
 0x8d6   :  { %v553_v32 = vsel %vm552_vm4, %v4215_v22, %v549_v29 }
 0x8d7   :  { %v558_v33 = vsel %vm555_vm5, %v557_v30, %v553_v32 }
 0x8d8   :  { %v4487_v34 = vmul.f32 %v558_v33, %v542_v31 }
 0x8da   :  { %575 = vmatpush.msrb.mxu0 %v4487_v34 }
 0x8db   :  { %3969 = vmatmul.msk.f32.vlgmr.msrb.gmra.mxu0 %vm5783_vm0, %v4443_v56 }
 0x958   :  { %v577_v35 = vpop.f32.mrf.mxu0 }
 0x959   :  { %v580_v37 = vmul.f32 %v577_v35, %v4487_v34 }
 0x95b   :  { %v581_v38 = vsel %vm5780_vm2, %v580_v37, 0.0 }
 0x95c   :  { %582 = vadd.xlane.f32.xlu0 %v581_v38 }
 0x9cf   :  { %v583_v39 = vpop.xlane.xlu0 %582 }
 0x9d0   :  { %v584_v40 = vrot.slane %v583_v39, 4 }
 0x9d2   :  { %v585_v41 = vadd.f32 %v584_v40, %v583_v39 }
 0x9d4   :  { %v586_v43 = vrot.slane %v585_v41, 2 }
 0x9d6   :  { %v587_v44 = vadd.f32 %v586_v43, %v585_v41 }
 0x9d8   :  { %v588_v45 = vrot.slane %v587_v44, 1 }
 0x9da   :  { %v589_v46 = vadd.f32 %v588_v45, %v587_v44 }
 0x9dc   :  { %4087 = vpush %v589_v46 }
 0xa0d   :  { %s4494_s15 = spop %4087 }
 0xa0e   :  { %v591_v48 = vstv %s4494_s15 }
 0xa0f   :  { %v592_v49 = vmul.f32 %v591_v48, %v4487_v34 }
 0xa11   :  { %v593_v50 = vsub.f32 %v577_v35, %v592_v49 }
 0xa13   :  { %v596_v53 = vsub.f32 %v593_v50, %v595_v52 }
 0xa15   :  { %v597_v54 = vmul.f32 %v596_v53, %v596_v53 }
 0xa17   :  { %v598_v57 = vsel %vm5780_vm2, %v597_v54, 0.0 }
 0xa18   :  { %599 = vadd.xlane.f32.xlu0 %v598_v57 }
 0xa8b   :  { %v600_v58 = vpop.xlane.xlu0 %599 }
 0xa8c   :  { %v601_v59 = vrot.slane %v600_v58, 4 }
 0xa8e   :  { %v602_v21 = vadd.f32 %v601_v59, %v600_v58 }
 0xa90   :  { %v603_v60 = vrot.slane %v602_v21, 2 }
 0xa92   :  { %v604_v61 = vadd.f32 %v603_v60, %v602_v21 }
 0xa94   :  { %v605_v62 = vrot.slane %v604_v61, 1 }
 0xa96   :  { %v606_v2 = vadd.f32 %v605_v62, %v604_v61 }
 0xa98   :  { %4089 = vpush %v606_v2 }
 0xac9   :  { %s4090_s16 = spop %4089 }
 0xaca   :  { %v608_v63 = vstv %s4090_s16 }
 0xacb   :  { %4216 = vrsqrt.f32 %v608_v63  ;;  %vm616_vm6 = vcmp.eq.f32.partialorder %v608_v63, inf  ;;  %v619_v11 = vand.u32 2147483648, %v608_v63  ;;  %vm618_vm7 = vcmp.eq.f32.partialorder %v608_v63, 0.0 }
 0xad1   :  { %v4217_v0 = vpop.eup %4216 }
 0xad2   :  { %v610_v55 = vmul.f32 %v4217_v0, %v608_v63 }
 0xad4   :  { %v611_v1 = vmul.f32 %v4217_v0, %v610_v55 }
 0xad6   :  { %v612_v3 = vmul.f32 0.5, %v611_v1 }
 0xad8   :  { %v613_v6 = vsub.f32 1.5, %v612_v3 }
 0xada   :  { %v614_v8 = vmul.f32 %v4217_v0, %v613_v6 }
 0xadc   :  { %v615_v10 = vmul.f32 %v614_v8, %v608_v63 }
 0xade   :  { %v617_v12 = vsel %vm616_vm6, %v608_v63, %v615_v10 }
 0xadf   :  { %v620_v13 = vsel %vm618_vm7, %v619_v11, %v617_v12 }
 0xae0   :  { %4091 = vpush %v620_v13 }
 0xb11   :  { %s4501_s17 = spop %4091 }
 0xb12   :  { %p622_p2 = scmp.ge.f32.partialorder %s4501_s17, 0.0001  ;;  %s628_s18 = sadd.f32 1.1920929e-07, %s4501_s17  ;;  %v679_v43 = vstv %s4501_s17 }
 0xb13   :  { %v680_v47 = vmul.f32 %v679_v43, %v4487_v34 }
 0xb14   :  { %v629_v14 = vstv %s628_s18  ;;  %s623_s20 = scalar_select %p622_p2, 1, 0 }
 0xb15   :  { %4218 = vrcp.f32 %v629_v14  ;;  %v641_v18 = vand.u32 2147483648, %v629_v14  ;;  %v639_v20 = vand.u32 2147483647, %v629_v14  ;;  %vm635_vm9 = vweird.f32 %v629_v14 }
 0xb16   :  { %s624_s22 = scvt.s32.f32 %s623_s20 }
 0xb17   :  { %v642_v24 = vor.u32 1.1754944e-38, %v641_v18  ;;  %vm640_vm11 = vcmp.eq.f32.partialorder %v639_v20, 8.507059e+37 }
 0xb18   :  { %s4506_s23 = smul.f32 %s624_s22, %s4482_s14 }
 0xb1a   :  { %v626_v22 = vstv %s4506_s23 }
 0xb1b   :  { %v4219_v15 = vpop.eup %4218  ;;  %v627_v25 = vmul.f32 %v626_v22, %v596_v53 }
 0xb1c   :  { %v631_v16 = vmul.f32 %v4219_v15, %v629_v14  ;;  %vm636_vm8 = vweird.f32 %v4219_v15 }
 0xb1d   :  { %vm637_vm10 = vmor %vm635_vm9, %vm636_vm8 }
 0xb1e   :  { %v632_v17 = vsub.f32 1.0, %v631_v16 }
 0xb20   :  { %v633_v19 = vmul.f32 %v4219_v15, %v632_v17 }
 0xb22   :  { %v634_v23 = vadd.f32 %v4219_v15, %v633_v19 }
 0xb24   :  { %v638_v26 = vsel %vm637_vm10, %v4219_v15, %v634_v23 }
 0xb25   :  { %v643_v27 = vsel %vm640_vm11, %v642_v24, %v638_v26 }
 0xb26   :  { %v4511_v29 = vmul.f32 %v643_v27, %v627_v25 }
 0xb28   :  { %660 = vmatpush.msrb.mxu2 %v4511_v29 }
 0xb29   :  { %3970 = vmatmul.msk.f32.vlgmr.msrb.gmra.mxu2 %vm5783_vm0, %v4443_v56 }
 0xbac   :  { %v662_v30 = vpop.f32.mrf.mxu2 }
 0xbad   :  { %v665_v31 = vmul.f32 %v662_v30, %v4511_v29 }
 0xbaf   :  { %v666_v32 = vsel %vm5780_vm2, %v665_v31, 0.0 }
 0xbb0   :  { %667 = vadd.xlane.f32.xlu0 %v666_v32 }
 0xc23   :  { %v668_v33 = vpop.xlane.xlu0 %667 }
 0xc24   :  { %v669_v35 = vrot.slane %v668_v33, 4 }
 0xc26   :  { %v670_v37 = vadd.f32 %v669_v35, %v668_v33 }
 0xc28   :  { %v671_v38 = vrot.slane %v670_v37, 2 }
 0xc2a   :  { %v672_v39 = vadd.f32 %v671_v38, %v670_v37 }
 0xc2c   :  { %v673_v40 = vrot.slane %v672_v39, 1 }
 0xc2e   :  { %v674_v41 = vadd.f32 %v673_v40, %v672_v39 }
 0xc30   :  { %4093 = vpush %v674_v41 }
 0xc61   :  { %s4518_s26 = spop %4093 }
 0xc62   :  { %v676_v44 = vstv %s4518_s26 }
 0xc63   :  { %v677_v45 = vmul.f32 %v676_v44, %v4511_v29 }
 0xc65   :  { %v678_v46 = vsub.f32 %v662_v30, %v677_v45 }
 0xc67   :  { %v681_v48 = vsub.f32 %v678_v46, %v680_v47 }
 0xc69   :  { %v682_v49 = vmul.f32 %v681_v48, %v681_v48 }
 0xc6b   :  { %v683_v50 = vsel %vm5780_vm2, %v682_v49, 0.0 }
 0xc6c   :  { %684 = vadd.xlane.f32.xlu0 %v683_v50 }
 0xcdf   :  { %v685_v52 = vpop.xlane.xlu0 %684 }
 0xce0   :  { %v686_v53 = vrot.slane %v685_v52, 4 }
 0xce2   :  { %v687_v54 = vadd.f32 %v686_v53, %v685_v52 }
 0xce4   :  { %v688_v57 = vrot.slane %v687_v54, 2 }
 0xce6   :  { %v689_v58 = vadd.f32 %v688_v57, %v687_v54 }
 0xce8   :  { %v690_v59 = vrot.slane %v689_v58, 1 }
 0xcea   :  { %v691_v21 = vadd.f32 %v690_v59, %v689_v58 }
 0xcec   :  { %4095 = vpush %v691_v21 }
 0xd1d   :  { %s4096_s27 = spop %4095 }
 0xd1e   :  { %v693_v60 = vstv %s4096_s27 }
 0xd1f   :  { %4220 = vrsqrt.f32 %v693_v60  ;;  %vm701_vm12 = vcmp.eq.f32.partialorder %v693_v60, inf  ;;  %v704_v3 = vand.u32 2147483648, %v693_v60  ;;  %vm703_vm13 = vcmp.eq.f32.partialorder %v693_v60, 0.0 }
 0xd25   :  { %v4221_v61 = vpop.eup %4220 }
 0xd26   :  { %v695_v62 = vmul.f32 %v4221_v61, %v693_v60 }
 0xd28   :  { %v696_v2 = vmul.f32 %v4221_v61, %v695_v62 }
 0xd2a   :  { %v697_v63 = vmul.f32 0.5, %v696_v2 }
 0xd2c   :  { %v698_v0 = vsub.f32 1.5, %v697_v63 }
 0xd2e   :  { %v699_v55 = vmul.f32 %v4221_v61, %v698_v0 }
 0xd30   :  { %v700_v1 = vmul.f32 %v699_v55, %v693_v60 }
 0xd32   :  { %v702_v6 = vsel %vm701_vm12, %v693_v60, %v700_v1 }
 0xd33   :  { %v705_v8 = vsel %vm703_vm13, %v704_v3, %v702_v6 }
 0xd34   :  { %4097 = vpush %v705_v8 }
 0xd65   :  { %s4525_s28 = spop %4097 }
 0xd66   :  { %p707_p3 = scmp.ge.f32.partialorder %s4525_s28, 0.0001  ;;  %s713_s30 = sadd.f32 1.1920929e-07, %s4525_s28  ;;  %v764_v40 = vstv %s4525_s28 }
 0xd67   :  { %v765_v45 = vmul.f32 %v764_v40, %v4511_v29 }
 0xd68   :  { %v714_v10 = vstv %s713_s30  ;;  %s708_s16 = scalar_select %p707_p3, 1, 0 }
 0xd69   :  { %4222 = vrcp.f32 %v714_v10  ;;  %v726_v14 = vand.u32 2147483648, %v714_v10  ;;  %v724_v16 = vand.u32 2147483647, %v714_v10  ;;  %vm720_vm15 = vweird.f32 %v714_v10 }
 0xd6a   :  { %s709_s18 = scvt.s32.f32 %s708_s16 }
 0xd6b   :  { %v727_v19 = vor.u32 1.1754944e-38, %v726_v14  ;;  %vm725_vm3 = vcmp.eq.f32.partialorder %v724_v16, 8.507059e+37 }
 0xd6c   :  { %s4530_s20 = smul.f32 %s709_s18, %s4506_s23 }
 0xd6e   :  { %v711_v17 = vstv %s4530_s20 }
 0xd6f   :  { %v4223_v11 = vpop.eup %4222  ;;  %v712_v20 = vmul.f32 %v711_v17, %v681_v48 }
 0xd70   :  { %v716_v12 = vmul.f32 %v4223_v11, %v714_v10  ;;  %vm721_vm14 = vweird.f32 %v4223_v11 }
 0xd71   :  { %vm722_vm1 = vmor %vm720_vm15, %vm721_vm14 }
 0xd72   :  { %v717_v13 = vsub.f32 1.0, %v716_v12 }
 0xd74   :  { %v718_v15 = vmul.f32 %v4223_v11, %v717_v13 }
 0xd76   :  { %v719_v18 = vadd.f32 %v4223_v11, %v718_v15 }
 0xd78   :  { %v723_v23 = vsel %vm722_vm1, %v4223_v11, %v719_v18 }
 0xd79   :  { %v728_v24 = vsel %vm725_vm3, %v727_v19, %v723_v23 }
 0xd7a   :  { %v4535_v25 = vmul.f32 %v728_v24, %v712_v20 }
 0xd7c   :  { %745 = vmatpush.msrb.mxu3 %v4535_v25 }
 0xd7d   :  { %3971 = vmatmul.msk.f32.vlgmr.msrb.gmra.mxu3 %vm5783_vm0, %v4443_v56 }
 0xe00   :  { %v747_v26 = vpop.f32.mrf.mxu3 }
 0xe01   :  { %v750_v27 = vmul.f32 %v747_v26, %v4535_v25 }
 0xe03   :  { %v751_v30 = vsel %vm5780_vm2, %v750_v27, 0.0 }
 0xe04   :  { %752 = vadd.xlane.f32.xlu1 %v751_v30 }
 0xe77   :  { %v753_v31 = vpop.xlane.xlu1 %752 }
 0xe78   :  { %v754_v32 = vrot.slane %v753_v31, 4 }
 0xe7a   :  { %v755_v33 = vadd.f32 %v754_v32, %v753_v31 }
 0xe7c   :  { %v756_v35 = vrot.slane %v755_v33, 2 }
 0xe7e   :  { %v757_v37 = vadd.f32 %v756_v35, %v755_v33 }
 0xe80   :  { %v758_v38 = vrot.slane %v757_v37, 1 }
 0xe82   :  { %v759_v39 = vadd.f32 %v758_v38, %v757_v37 }
 0xe84   :  { %4099 = vpush %v759_v39 }
 0xeb5   :  { %s4542_s22 = spop %4099 }
 0xeb6   :  { %v761_v41 = vstv %s4542_s22 }
 0xeb7   :  { %v762_v43 = vmul.f32 %v761_v41, %v4535_v25 }
 0xeb9   :  { %v763_v44 = vsub.f32 %v747_v26, %v762_v43 }
 0xebb   :  { %v766_v46 = vsub.f32 %v763_v44, %v765_v45 }
 0xebd   :  { %v767_v47 = vmul.f32 %v766_v46, %v766_v46 }
 0xebf   :  { %v768_v48 = vsel %vm5780_vm2, %v767_v47, 0.0 }
 0xec0   :  { %769 = vadd.xlane.f32.xlu0 %v768_v48 }
 0xf33   :  { %v770_v49 = vpop.xlane.xlu0 %769 }
 0xf34   :  { %v771_v50 = vrot.slane %v770_v49, 4 }
 0xf36   :  { %v772_v52 = vadd.f32 %v771_v50, %v770_v49 }
 0xf38   :  { %v773_v53 = vrot.slane %v772_v52, 2 }
 0xf3a   :  { %v774_v54 = vadd.f32 %v773_v53, %v772_v52 }
 0xf3c   :  { %v775_v57 = vrot.slane %v774_v54, 1 }
 0xf3e   :  { %v776_v58 = vadd.f32 %v775_v57, %v774_v54 }
 0xf40   :  { %4101 = vpush %v776_v58 }
 0xf71   :  { %s4102_s27 = spop %4101 }
 0xf72   :  { %v778_v59 = vstv %s4102_s27 }
 0xf73   :  { %4224 = vrsqrt.f32 %v778_v59  ;;  %vm786_vm4 = vcmp.eq.f32.partialorder %v778_v59, inf  ;;  %v789_v55 = vand.u32 2147483648, %v778_v59  ;;  %vm788_vm5 = vcmp.eq.f32.partialorder %v778_v59, 0.0 }
 0xf79   :  { %v4225_v21 = vpop.eup %4224 }
 0xf7a   :  { %v780_v60 = vmul.f32 %v4225_v21, %v778_v59 }
 0xf7c   :  { %v781_v61 = vmul.f32 %v4225_v21, %v780_v60 }
 0xf7e   :  { %v782_v62 = vmul.f32 0.5, %v781_v61 }
 0xf80   :  { %v783_v2 = vsub.f32 1.5, %v782_v62 }
 0xf82   :  { %v784_v63 = vmul.f32 %v4225_v21, %v783_v2 }
 0xf84   :  { %v785_v0 = vmul.f32 %v784_v63, %v778_v59 }
 0xf86   :  { %v787_v1 = vsel %vm786_vm4, %v778_v59, %v785_v0 }
 0xf87   :  { %v790_v3 = vsel %vm788_vm5, %v789_v55, %v787_v1 }
 0xf88   :  { %4103 = vpush %v790_v3 }
 0xfb9   :  { %s4549_s30 = spop %4103 }
 0xfba   :  { %p792_p4 = scmp.ge.f32.partialorder %s4549_s30, 0.0001  ;;  %s798_s16 = sadd.f32 1.1920929e-07, %s4549_s30  ;;  %v849_v40 = vstv %s4549_s30 }
 0xfbb   :  { %v850_v45 = vmul.f32 %v849_v40, %v4535_v25 }
 0xfbc   :  { %v799_v6 = vstv %s798_s16  ;;  %s793_s18 = scalar_select %p792_p4, 1, 0 }
 0xfbd   :  { %4226 = vrcp.f32 %v799_v6  ;;  %v811_v12 = vand.u32 2147483648, %v799_v6  ;;  %v809_v14 = vand.u32 2147483647, %v799_v6  ;;  %vm805_vm7 = vweird.f32 %v799_v6 }
 0xfbe   :  { %s794_s27 = scvt.s32.f32 %s793_s18 }
 0xfbf   :  { %v812_v18 = vor.u32 1.1754944e-38, %v811_v12  ;;  %vm810_vm9 = vcmp.eq.f32.partialorder %v809_v14, 8.507059e+37 }
 0xfc0   :  { %s4554_s13 = smul.f32 %s794_s27, %s4530_s20 }
 0xfc2   :  { %v796_v15 = vstv %s4554_s13 }
 0xfc3   :  { %v4227_v8 = vpop.eup %4226  ;;  %v797_v19 = vmul.f32 %v796_v15, %v766_v46 }
 0xfc4   :  { %v801_v10 = vmul.f32 %v4227_v8, %v799_v6  ;;  %vm806_vm6 = vweird.f32 %v4227_v8 }
 0xfc5   :  { %vm807_vm8 = vmor %vm805_vm7, %vm806_vm6 }
 0xfc6   :  { %v802_v11 = vsub.f32 1.0, %v801_v10 }
 0xfc8   :  { %v803_v13 = vmul.f32 %v4227_v8, %v802_v11 }
 0xfca   :  { %v804_v16 = vadd.f32 %v4227_v8, %v803_v13 }
 0xfcc   :  { %v808_v20 = vsel %vm807_vm8, %v4227_v8, %v804_v16 }
 0xfcd   :  { %v813_v23 = vsel %vm810_vm9, %v812_v18, %v808_v20 }
 0xfce   :  { %v4559_v24 = vmul.f32 %v813_v23, %v797_v19 }
 0xfd0   :  { %830 = vmatpush.msrb.mxu1 %v4559_v24 }
 0xfd1   :  { %3972 = vmatmul.msk.f32.vlgmr.msrb.gmra.mxu1 %vm5783_vm0, %v4443_v56 }
0x104e   :  { %v832_v26 = vpop.f32.mrf.mxu1 }
0x104f   :  { %v835_v27 = vmul.f32 %v832_v26, %v4559_v24 }
0x1051   :  { %v836_v30 = vsel %vm5780_vm2, %v835_v27, 0.0 }
0x1052   :  { %837 = vadd.xlane.f32.xlu1 %v836_v30 }
0x10c5   :  { %v838_v31 = vpop.xlane.xlu1 %837 }
0x10c6   :  { %v839_v32 = vrot.slane %v838_v31, 4 }
0x10c8   :  { %v840_v33 = vadd.f32 %v839_v32, %v838_v31 }
0x10ca   :  { %v841_v35 = vrot.slane %v840_v33, 2 }
0x10cc   :  { %v842_v37 = vadd.f32 %v841_v35, %v840_v33 }
0x10ce   :  { %v843_v38 = vrot.slane %v842_v37, 1 }
0x10d0   :  { %v844_v39 = vadd.f32 %v843_v38, %v842_v37 }
0x10d2   :  { %4105 = vpush %v844_v39 }
0x1103   :  { %s4566_s16 = spop %4105 }
0x1104   :  { %v846_v41 = vstv %s4566_s16 }
0x1105   :  { %v847_v43 = vmul.f32 %v846_v41, %v4559_v24 }
0x1107   :  { %v848_v44 = vsub.f32 %v832_v26, %v847_v43 }
0x1109   :  { %v851_v46 = vsub.f32 %v848_v44, %v850_v45 }
0x110b   :  { %v852_v47 = vmul.f32 %v851_v46, %v851_v46 }
0x110d   :  { %v853_v48 = vsel %vm5780_vm2, %v852_v47, 0.0 }
0x110e   :  { %854 = vadd.xlane.f32.xlu0 %v853_v48 }
0x1181   :  { %v855_v49 = vpop.xlane.xlu0 %854 }
0x1182   :  { %v856_v50 = vrot.slane %v855_v49, 4 }
0x1184   :  { %v857_v52 = vadd.f32 %v856_v50, %v855_v49 }
0x1186   :  { %v858_v53 = vrot.slane %v857_v52, 2 }
0x1188   :  { %v859_v54 = vadd.f32 %v858_v53, %v857_v52 }
0x118a   :  { %v860_v57 = vrot.slane %v859_v54, 1 }
0x118c   :  { %v861_v58 = vadd.f32 %v860_v57, %v859_v54 }
0x118e   :  { %4107 = vpush %v861_v58 }
0x11bf   :  { %s4108_s18 = spop %4107 }
0x11c0   :  { %v863_v59 = vstv %s4108_s18 }
0x11c1   :  { %4228 = vrsqrt.f32 %v863_v59  ;;  %vm871_vm10 = vcmp.eq.f32.partialorder %v863_v59, inf  ;;  %v874_v55 = vand.u32 2147483648, %v863_v59  ;;  %vm873_vm11 = vcmp.eq.f32.partialorder %v863_v59, 0.0 }
0x11c7   :  { %v4229_v21 = vpop.eup %4228 }
0x11c8   :  { %v865_v60 = vmul.f32 %v4229_v21, %v863_v59 }
0x11ca   :  { %v866_v61 = vmul.f32 %v4229_v21, %v865_v60 }
0x11cc   :  { %v867_v62 = vmul.f32 0.5, %v866_v61 }
0x11ce   :  { %v868_v2 = vsub.f32 1.5, %v867_v62 }
0x11d0   :  { %v869_v63 = vmul.f32 %v4229_v21, %v868_v2 }
0x11d2   :  { %v870_v0 = vmul.f32 %v869_v63, %v863_v59 }
0x11d4   :  { %v872_v1 = vsel %vm871_vm10, %v863_v59, %v870_v0  ;;  %vm5781_vm10 = vcmp.eq.s32.totalorder %v4400_v5, 0 }
0x11d5   :  { %v875_v3 = vsel %vm873_vm11, %v874_v55, %v872_v1 }
0x11d6   :  { %4109 = vpush %v875_v3 }
0x1207   :  { %s4573_s27 = spop %4109 }
0x1208   :  { %p877_p5 = scmp.ge.f32.partialorder %s4573_s27, 0.0001  ;;  %s883_s18 = sadd.f32 1.1920929e-07, %s4573_s27  ;;  %v934_v43 = vstv %s4573_s27 }
0x1209   :  { %v935_v47 = vmul.f32 %v934_v43, %v4559_v24 }
0x120a   :  { %v884_v6 = vstv %s883_s18  ;;  %s878_s12 = scalar_select %p877_p5, 1, 0 }
0x120b   :  { %4230 = vrcp.f32 %v884_v6  ;;  %v896_v12 = vand.u32 2147483648, %v884_v6  ;;  %v894_v14 = vand.u32 2147483647, %v884_v6  ;;  %vm890_vm13 = vweird.f32 %v884_v6 }
0x120c   :  { %s879_s9 = scvt.s32.f32 %s878_s12 }
0x120d   :  { %v897_v19 = vor.u32 1.1754944e-38, %v896_v12  ;;  %vm895_vm15 = vcmp.eq.f32.partialorder %v894_v14, 8.507059e+37 }
0x120e   :  { %s4578_s3 = smul.f32 %s879_s9, %s4554_s13 }
0x1210   :  { %v881_v16 = vstv %s4578_s3 }
0x1211   :  { %v4231_v8 = vpop.eup %4230  ;;  %v882_v20 = vmul.f32 %v881_v16, %v851_v46  ;;  %v1151_v43 = vmul.f32 %v881_v16, %v4559_v24 }
0x1212   :  { %v886_v10 = vmul.f32 %v4231_v8, %v884_v6  ;;  %vm891_vm12 = vweird.f32 %v4231_v8 }
0x1213   :  { %vm892_vm14 = vmor %vm890_vm13, %vm891_vm12 }
0x1214   :  { %v887_v11 = vsub.f32 1.0, %v886_v10 }
0x1216   :  { %v888_v13 = vmul.f32 %v4231_v8, %v887_v11 }
0x1218   :  { %v889_v18 = vadd.f32 %v4231_v8, %v888_v13 }
0x121a   :  { %v893_v23 = vsel %vm892_vm14, %v4231_v8, %v889_v18  ;;  %vm5782_vm14 = vcmp.eq.s32.totalorder %v4400_v5, 1 }
0x121b   :  { %v898_v26 = vsel %vm895_vm15, %v897_v19, %v893_v23 }
0x121c   :  { %v4583_v27 = vmul.f32 %v898_v26, %v882_v20 }
0x121e   :  { %915 = vmatpush.msra.mxu0 %v4583_v27 }
0x121f   :  { %3973 = vmatmul.msk.f32.vlgmr.msra.gmra.mxu0 %vm5783_vm0, %v4443_v56 }
0x129c   :  { %v917_v30 = vpop.f32.mrf.mxu0 }
0x129d   :  { %v920_v31 = vmul.f32 %v917_v30, %v4583_v27 }
0x129f   :  { %v921_v32 = vsel %vm5780_vm2, %v920_v31, 0.0 }
0x12a0   :  { %922 = vadd.xlane.f32.xlu1 %v921_v32 }
0x1313   :  { %v923_v33 = vpop.xlane.xlu1 %922 }
0x1314   :  { %v924_v35 = vrot.slane %v923_v33, 4 }
0x1316   :  { %v925_v37 = vadd.f32 %v924_v35, %v923_v33 }
0x1318   :  { %v926_v38 = vrot.slane %v925_v37, 2 }
0x131a   :  { %v927_v39 = vadd.f32 %v926_v38, %v925_v37 }
0x131c   :  { %v928_v40 = vrot.slane %v927_v39, 1 }
0x131e   :  { %v929_v41 = vadd.f32 %v928_v40, %v927_v39  ;;  %v1111_v40 = vmul.f32 %v456_v36, %v4438_v51 }
0x1320   :  { %4111 = vpush %v929_v41  ;;  %v1135_v41 = vmul.f32 %v711_v17, %v4511_v29 }
0x1351   :  { %s4590_s9 = spop %4111 }
0x1352   :  { %v931_v44 = vstv %s4590_s9 }
0x1353   :  { %v932_v45 = vmul.f32 %v931_v44, %v4583_v27 }
0x1355   :  { %v933_v46 = vsub.f32 %v917_v30, %v932_v45 }
0x1357   :  { %v936_v48 = vsub.f32 %v933_v46, %v935_v47 }
0x1359   :  { %v937_v49 = vmul.f32 %v936_v48, %v936_v48 }
0x135b   :  { %v938_v50 = vsel %vm5780_vm2, %v937_v49, 0.0 }
0x135c   :  { %939 = vadd.xlane.f32.xlu0 %v938_v50 }
0x13cf   :  { %v940_v52 = vpop.xlane.xlu0 %939 }
0x13d0   :  { %v941_v53 = vrot.slane %v940_v52, 4 }
0x13d2   :  { %v942_v54 = vadd.f32 %v941_v53, %v940_v52  ;;  %v1119_v53 = vmul.f32 %v541_v28, %v4463_v42  ;;  %v4013_v42 = vld [vmem:[%s5760_s0 + $0x8] sm:$0xff]  ;;  %s1055_s0 = smul.f32 %s4470_s25, %s4482_s14 }
0x13d3   :  { %s1067_s25 = smul.f32 %s4542_s22, %s4554_s13 }
0x13d4   :  { %v943_v57 = vrot.slane %v942_v54, 2 }
0x13d6   :  { %v944_v58 = vadd.f32 %v943_v57, %v942_v54  ;;  %v1127_v54 = vmul.f32 %v626_v22, %v4487_v34  ;;  %v1143_v57 = vmul.f32 %v796_v15, %v4535_v25 }
0x13d8   :  { %v945_v59 = vrot.slane %v944_v58, 1 }
0x13da   :  { %v946_v21 = vadd.f32 %v945_v59, %v944_v58 }
0x13dc   :  { %4113 = vpush %v946_v21 }
0x140d   :  { %s4114_s12 = spop %4113 }
0x140e   :  { %v948_v60 = vstv %s4114_s12 }
0x140f   :  { %4232 = vrsqrt.f32 %v948_v60  ;;  %vm956_vm1 = vcmp.eq.f32.partialorder %v948_v60, inf  ;;  %v959_v3 = vand.u32 2147483648, %v948_v60  ;;  %vm958_vm3 = vcmp.eq.f32.partialorder %v948_v60, 0.0 }
0x1415   :  { %v4233_v61 = vpop.eup %4232 }
0x1416   :  { %v950_v62 = vmul.f32 %v4233_v61, %v948_v60 }
0x1418   :  { %v951_v2 = vmul.f32 %v4233_v61, %v950_v62 }
0x141a   :  { %v952_v63 = vmul.f32 0.5, %v951_v2 }
0x141c   :  { %v953_v0 = vsub.f32 1.5, %v952_v63 }
0x141e   :  { %v954_v55 = vmul.f32 %v4233_v61, %v953_v0 }
0x1420   :  { %v955_v1 = vmul.f32 %v954_v55, %v948_v60 }
0x1422   :  { %v957_v6 = vsel %vm956_vm1, %v948_v60, %v955_v1 }
0x1423   :  { %v960_v8 = vsel %vm958_vm3, %v959_v3, %v957_v6  ;;  %v4642_v6 = vshrl.u32 %v44_v4, 7  ;;  %v1056_v4 = vstv %s1055_s0 }
0x1424   :  { %4115 = vpush %v960_v8 }
0x1425   :  { %vm54_vm11 = vcmp.eq.s32.totalorder %v4642_v6, 1  ;;  %vm49_vm12 = vcmp.eq.s32.totalorder %v4642_v6, 0  ;;  %vm59_vm3 = vcmp.eq.s32.totalorder %v4642_v6, 2 }
0x1426   :  { %vm4651_vm13 = vmand %vm54_vm11, %vm5781_vm10 }
0x1427   :  { %vm56_vm15 = vmand %vm54_vm11, %vm5782_vm14 }
0x1428   :  { %vm51_vm1 = vmand %vm49_vm12, %vm5781_vm10  ;;  %vm5785_vm10 = vcmp.eq.s32.totalorder %v4642_v6, 5 }
0x1455   :  { %s4597_s18 = spop %4115 }
0x1456   :  { %p962_p6 = scmp.ge.f32.partialorder %s4597_s18, 0.0001  ;;  %s968_s12 = sadd.f32 1.1920929e-07, %s4597_s18  ;;  %v1019_v51 = vstv %s4597_s18 }
0x1457   :  { %v1020_v24 = vmul.f32 %v1019_v51, %v4583_v27 }
0x1458   :  { %s963_s29 = scalar_select %p962_p6, 1, 0  ;;  %v969_v10 = vstv %s968_s12 }
0x1459   :  { %4234 = vrcp.f32 %v969_v10  ;;  %v981_v19 = vand.u32 2147483648, %v969_v10  ;;  %v979_v23 = vand.u32 2147483647, %v969_v10  ;;  %vm975_vm5 = vweird.f32 %v969_v10  ;;  %s1083_s12 = smul.f32 %s4454_s21, %s4458_s24 }
0x145a   :  { %s964_s7 = scvt.s32.f32 %s963_s29  ;;  %s1059_s29 = smul.f32 %s4494_s15, %s4506_s23 }
0x145b   :  { %v982_v30 = vor.u32 1.1754944e-38, %v981_v19  ;;  %vm980_vm7 = vcmp.eq.f32.partialorder %v979_v23, 8.507059e+37  ;;  %s1071_s15 = smul.f32 %s4566_s16, %s4578_s3 }
0x145c   :  { %s4602_s10 = smul.f32 %s964_s7, %s4578_s3 }
0x145d   :  { %s1087_s21 = smul.f32 %s4477_s11, %s4482_s14 }
0x145e   :  { %v966_v11 = vstv %s4602_s10  ;;  %s1075_s22 = smul.f32 %s4590_s9, %s4602_s10 }
0x145f   :  { %v4235_v12 = vpop.eup %4234  ;;  %v1159_v13 = vmul.f32 %v966_v11, %v4583_v27  ;;  %v967_v31 = vmul.f32 %v966_v11, %v936_v48 }
0x1460   :  { %v971_v14 = vmul.f32 %v4235_v12, %v969_v10  ;;  %vm976_vm4 = vweird.f32 %v4235_v12  ;;  %v4681_v10 = vsel %vm56_vm15, 1.0, %v4319_v7  ;;  %vm69_vm15 = vcmp.eq.s32.totalorder %v4642_v6, 4 }
0x1461   :  { %1162 = vperm.xlu2 %4185, %v1159_v13   ;;  %vm977_vm6 = vmor %vm975_vm5, %vm976_vm4  ;;  %vm5788_vm4 = vcmp.eq.s32.totalorder %v4400_v5, 2  ;;  %v4692_v13 = vsel %vm51_vm1, 1.0, %v4319_v7 }
0x1462   :  { %v972_v18 = vsub.f32 1.0, %v971_v14  ;;  %vm61_vm5 = vmand %vm59_vm3, %vm5788_vm4 }
0x1463   :  { %v4708_v19 = vsel %vm61_vm5, 1.0, %v4319_v7  ;;  %vm5792_vm5 = vcmp.eq.s32.totalorder %v4400_v5, 5 }
0x1464   :  { %v973_v20 = vmul.f32 %v4235_v12, %v972_v18  ;;  %v1060_v18 = vstv %s1059_s29 }
0x1466   :  { %v974_v26 = vadd.f32 %v4235_v12, %v973_v20  ;;  %v1057_v20 = vmul.f32 %v4681_v10, %v1056_v4 }
0x1468   :  { %v978_v32 = vsel %vm977_vm6, %v4235_v12, %v974_v26  ;;  %vm64_vm6 = vcmp.eq.s32.totalorder %v4642_v6, 3 }
0x1469   :  { %v983_v33 = vsel %vm980_vm7, %v982_v30, %v978_v32  ;;  %vm5790_vm7 = vcmp.eq.s32.totalorder %v4400_v5, 3 }
0x146a   :  { %v4606_v35 = vmul.f32 %v983_v33, %v967_v31  ;;  %v1061_v33 = vmul.f32 %v4708_v19, %v1060_v18 }
0x146c   :  { %1000 = vmatpush.msra.mxu2 %v4606_v35 }
0x146d   :  { %3974 = vmatmul.msk.f32.vlgmr.msra.gmra.mxu2 %vm5783_vm0, %v4443_v56  ;;  %vm76_vm0 = vmand %vm5785_vm10, %vm5792_vm5 }
0x14f0   :  { %v1002_v37 = vpop.f32.mrf.mxu2 }
0x14f1   :  { %v1005_v38 = vmul.f32 %v1002_v37, %v4606_v35 }
0x14f3   :  { %v1006_v39 = vsel %vm5780_vm2, %v1005_v38, 0.0 }
0x14f4   :  { %1007 = vadd.xlane.f32.xlu1 %v1006_v39 }
0x150d   :  { %1114 = vperm.xlu1 %4184, %v1111_v40  }
0x1515   :  { %1138 = vperm.xlu1 %4184, %v1135_v41   ;;  %v1072_v41 = vstv %s1071_s15 }
0x151d   :  { %1154 = vperm.xlu1 %4184, %v1151_v43   ;;  %v4762_v43 = vsel %vm76_vm0, 1.0, %v4319_v7  ;;  %vm5789_vm0 = vcmp.eq.s32.totalorder %v4642_v6, 7 }
0x1525   :  { %2039 = vperm.xlu1 %4184, %v4013_v42  }
0x1567   :  { %v1008_v56 = vpop.xlane.xlu1 %1007 }
0x1568   :  { %v1009_v44 = vrot.slane %v1008_v56, 4 }
0x156a   :  { %v1010_v45 = vadd.f32 %v1009_v44, %v1008_v56 }
0x156c   :  { %v1011_v46 = vrot.slane %v1010_v45, 2 }
0x156e   :  { %v1012_v47 = vadd.f32 %v1011_v46, %v1010_v45  ;;  %v1076_v46 = vstv %s1075_s22 }
0x1570   :  { %v1013_v48 = vrot.slane %v1012_v47, 1 }
0x1572   :  { %v1014_v49 = vadd.f32 %v1013_v48, %v1012_v47 }
0x1574   :  { %4117 = vpush %v1014_v49  ;;  %v1073_v49 = vmul.f32 %v4762_v43, %v1072_v41 }
0x15a5   :  { %s4622_s7 = spop %4117 }
0x15a6   :  { %v1016_v36 = vstv %s4622_s7 }
0x15a7   :  { %v1017_v29 = vmul.f32 %v1016_v36, %v4606_v35 }
0x15a9   :  { %v1018_v17 = vsub.f32 %v1002_v37, %v1017_v29  ;;  %v1068_v37 = vstv %s1067_s25 }
0x15ab   :  { %v1021_v16 = vsub.f32 %v1018_v17, %v1020_v24 }
0x15ad   :  { %v1022_v50 = vmul.f32 %v1021_v16, %v1021_v16 }
0x15af   :  { %v1023_v52 = vsel %vm5780_vm2, %v1022_v50, 0.0  ;;  %vm4703_vm2 = vmand %vm59_vm3, %vm5782_vm14 }
0x15b0   :  { %1024 = vadd.xlane.f32.xlu0 %v1023_v52 }
0x15c4   :  { %1122 = vperm.xlu0 %4183, %v1119_v53  }
0x15cc   :  { %1130 = vperm.xlu0 %4183, %v1127_v54  }
0x15d4   :  { %1146 = vperm.xlu0 %4183, %v1143_v57  }
0x1623   :  { %v1025_v58 = vpop.xlane.xlu0 %1024 }
0x1624   :  { %v1026_v59 = vrot.slane %v1025_v58, 4 }
0x1626   :  { %v1027_v27 = vadd.f32 %v1026_v59, %v1025_v58  ;;  %v1084_v58 = vstv %s1083_s12 }
0x1628   :  { %v1028_v21 = vrot.slane %v1027_v27, 2 }
0x162a   :  { %v1029_v60 = vadd.f32 %v1028_v21, %v1027_v27 }
0x162c   :  { %v1030_v61 = vrot.slane %v1029_v60, 1 }
0x162e   :  { %v1031_v62 = vadd.f32 %v1030_v61, %v1029_v60  ;;  %v1088_v60 = vstv %s1087_s21 }
0x1630   :  { %4119 = vpush %v1031_v62 }
0x1636   :  { %v1123_v56 = vpop.permute.xlu0 %1122 }
0x1661   :  { %s4120_s8 = spop %4119 }
0x1662   :  { %v1033_v28 = vstv %s4120_s8  ;;  %s1051_s8 = smul.f32 %s4449_s19, %s4458_s24 }
0x1663   :  { %4236 = vrsqrt.f32 %v1033_v28  ;;  %vm1041_vm8 = vcmp.eq.f32.partialorder %v1033_v28, inf  ;;  %v1044_v55 = vand.u32 2147483648, %v1033_v28  ;;  %vm1043_vm9 = vcmp.eq.f32.partialorder %v1033_v28, 0.0  ;;  %s1063_s19 = smul.f32 %s4518_s26, %s4530_s20 }
0x1664   :  { %v1052_v12 = vstv %s1051_s8  ;;  %s1091_s8 = smul.f32 %s4501_s17, %s4506_s23 }
0x1665   :  { %v1064_v26 = vstv %s1063_s19  ;;  %v1053_v32 = vmul.f32 %v4692_v13, %v1052_v12  ;;  %s1095_s17 = smul.f32 %s4525_s28, %s4530_s20 }
0x1666   :  { %s1099_s28 = smul.f32 %s4549_s30, %s4554_s13 }
0x1667   :  { %v1058_v40 = vadd.f32 %v1057_v20, %v1053_v32  ;;  %s1103_s30 = smul.f32 %s4573_s27, %s4578_s3 }
0x1668   :  { %v1100_v4 = vstv %s1099_s28  ;;  %s1107_s27 = smul.f32 %s4597_s18, %s4602_s10  ;;  %s1177_s18 = sadd.f32 %s4482_s14, %s4458_s24 }
0x1669   :  { %v4237_v34 = vpop.eup %4236  ;;  %v1062_v44 = vadd.f32 %v1061_v33, %v1058_v40  ;;  %v1104_v18 = vstv %s1103_s30 }
0x166a   :  { %v1035_v22 = vmul.f32 %v4237_v34, %v1033_v28  ;;  %v1108_v31 = vstv %s1107_s27 }
0x166c   :  { %v1036_v25 = vmul.f32 %v4237_v34, %v1035_v22  ;;  %v48_v22 = vcvt.s32.f32 %v4642_v6 }
0x166e   :  { %v1037_v15 = vmul.f32 0.5, %v1036_v25 }
0x1670   :  { %v1038_v2 = vsub.f32 1.5, %v1037_v15 }
0x1672   :  { %v1039_v63 = vmul.f32 %v4237_v34, %v1038_v2  ;;  %v1092_v34 = vstv %s1091_s8 }
0x1674   :  { %v1040_v0 = vmul.f32 %v1039_v63, %v1033_v28 }
0x1676   :  { %v1042_v1 = vsel %vm1041_vm8, %v1033_v28, %v1040_v0  ;;  %vm4687_vm8 = vmand %vm49_vm12, %vm5782_vm14  ;;  %vm5784_vm12 = vcmp.eq.s32.totalorder %v4400_v5, 4  ;;  %v1096_v0 = vstv %s1095_s17 }
0x1677   :  { %v1045_v3 = vsel %vm1043_vm9, %v1044_v55, %v1042_v1  ;;  %vm66_vm9 = vmand %vm64_vm6, %vm5790_vm7 }
0x1678   :  { %4121 = vpush %v1045_v3  ;;  %vm4718_vm1 = vmand %vm69_vm15, %vm5784_vm12  ;;  %v4724_v30 = vsel %vm66_vm9, 1.0, %v4319_v7  ;;  %vm5786_vm9 = vcmp.eq.s32.totalorder %v4642_v6, 6  ;;  %vm5787_vm12 = vcmp.eq.s32.totalorder %v4400_v5, 6 }
0x1679   :  { %vm4733_vm14 = vmand %vm54_vm11, %vm5788_vm4  ;;  %v4754_v38 = vsel %vm4718_vm1, 1.0, %v4319_v7  ;;  %v1065_v39 = vmul.f32 %v4724_v30, %v1064_v26  ;;  %vm5823_vm1 = vcmp.eq.s32.totalorder %v4400_v5, 4 }
0x167a   :  { %vm91_vm11 = vmor %vm4687_vm8, %vm4651_vm13  ;;  %v1069_v45 = vmul.f32 %v4754_v38, %v1068_v37 }
0x167b   :  { %vm81_vm10 = vmand %vm5786_vm9, %vm5787_vm12  ;;  %vm5791_vm12 = vcmp.eq.s32.totalorder %v4400_v5, 7  ;;  %v1066_v51 = vadd.f32 %v1065_v39, %v1062_v44  ;;  %v4850_v59 = vsel %vm91_vm11, 1.0, %v4319_v7  ;;  %vm5833_vm11 = vcmp.eq.s32.totalorder %v4400_v5, 6  ;;  %v1115_v44 = vpop.permute.xlu1 %1114 }
0x167c   :  { %vm4772_vm9 = vmand %vm59_vm3, %vm5790_vm7  ;;  %v4778_v47 = vsel %vm81_vm10, 1.0, %v4319_v7  ;;  %v1085_v42 = vmul.f32 %v4850_v59, %v1084_v58 }
0x167d   :  { %vm4786_vm3 = vmand %vm64_vm6, %vm5788_vm4  ;;  %v1077_v29 = vmul.f32 %v4778_v47, %v1076_v46  ;;  %v1070_v24 = vadd.f32 %v1069_v45, %v1066_v51  ;;  %v1131_v45 = vpop.permute.xlu0 %1130 }
0x167e   :  { %vm86_vm10 = vmand %vm5789_vm0, %vm5791_vm12 }
0x167f   :  { %vm4801_vm4 = vmand %vm69_vm15, %vm5790_vm7  ;;  %v4828_v50 = vsel %vm86_vm10, 1.0, %v4319_v7  ;;  %v1074_v54 = vadd.f32 %v1073_v49, %v1070_v24 }
0x1680   :  { %vm4815_vm0 = vmand %vm64_vm6, %vm5823_vm1 }
0x1681   :  { %vm4823_vm7 = vmand %vm69_vm15, %vm5792_vm5 }
0x1682   :  { %vm5828_vm6 = vmmov %vm5823_vm1  ;;  %vm5829_vm1 = vcmp.eq.s32.totalorder %v4642_v6, 5 }
0x1683   :  { %vm4837_vm12 = vmand %vm5829_vm1, %vm5828_vm6  ;;  %v1139_v36 = vpop.permute.xlu1 %1138 }
0x1684   :  { %vm101_vm15 = vmor %vm4772_vm9, %vm4786_vm3 }
0x1685   :  { %vm106_vm10 = vmor %vm4815_vm0, %vm4801_vm4  ;;  %v4900_v25 = vsel %vm101_vm15, 1.0, %v4319_v7  ;;  %vm5851_vm0 = vcmp.eq.s32.totalorder %v4400_v5, 2  ;;  %vm5852_vm15 = vcmp.eq.s32.totalorder %v4400_v5, 3 }
0x1686   :  { %vm5832_vm13 = vmor %vm4733_vm14, %vm4703_vm2  ;;  %vm5837_vm2 = vcmp.eq.s32.totalorder %v4642_v6, 6  ;;  %v4927_v1 = vsel %vm106_vm10, 1.0, %v4319_v7  ;;  %v1093_v3 = vmul.f32 %v4900_v25, %v1092_v34  ;;  %v4972_v49 = vsel %vm5851_vm0, 1.0, %v4319_v7 }
0x1687   :  { %v4869_v61 = vsel %vm5832_vm13, 1.0, %v4319_v7  ;;  %vm111_vm8 = vmor %vm4823_vm7, %vm4837_vm12  ;;  %vm5840_vm13 = vcmp.eq.s32.totalorder %v4400_v5, 7  ;;  %v1097_v12 = vmul.f32 %v4927_v1, %v1096_v0  ;;  %vm5848_vm7 = vcmask 64512  }
0x1688   :  { %vm5834_vm6 = vmmov %vm5829_vm1  ;;  %v1089_v2 = vmul.f32 %v4869_v61, %v1088_v60  ;;  %v4942_v11 = vsel %vm111_vm8, 1.0, %v4319_v7  ;;  %vm5849_vm12 = vcmp.eq.s32.totalorder %v4400_v5, 1  ;;  %v1133_v17 = vmul.f32 %v4972_v49, %v1131_v45  ;;  %v5064_v45 = vld [vmem:[%s5762_s2 + $0x10] sm:$0xff] }
0x1689   :  { %vm4879_vm1 = vmand %vm5834_vm6, %vm5833_vm11  ;;  %v1101_v23 = vmul.f32 %v4942_v11, %v1100_v4  ;;  %v4962_v46 = vsel %vm5849_vm12, 1.0, %v4319_v7  ;;  %v4983_v16 = vsel %vm5852_vm15, 1.0, %v4319_v7  ;;  %vm5853_vm10 = vcmp.eq.s32.totalorder %v4400_v5, 4 }
0x168a   :  { %vm4890_vm14 = vmand %vm5837_vm2, %vm5792_vm5  ;;  %vm5845_vm5 = vcmp.eq.s32.totalorder %v4642_v6, 7  ;;  %v1125_v51 = vmul.f32 %v4962_v46, %v1123_v56  ;;  %v4988_v53 = vsel %vm5853_vm10, 1.0, %v4319_v7  ;;  %vm5854_vm8 = vcmp.eq.s32.totalorder %v4400_v5, 5  ;;  %v1416_v56 = vld [vmem:[%s5764_s4 + $0x10] sm:$0xff]  ;;  %v3243_v6 = vld [vmem:[%s5764_s4 + $0x8] sm:$0xff] }
0x168b   :  { %vm5841_vm11 = vmmov %vm5837_vm2  ;;  %vm5844_vm2 = vcmp.eq.s32.totalorder %v4400_v5, 6 }
0x168c   :  { %vm4906_vm6 = vmand %vm5841_vm11, %vm5840_vm13 }
0x168d   :  { %vm4917_vm9 = vmand %vm5845_vm5, %vm5844_vm2  ;;  %vm5850_vm5 = vcmp.eq.s32.totalorder %v4400_v5, 0 }
0x168e   :  { %vm116_vm3 = vmor %vm4879_vm1, %vm4890_vm14  ;;  %v4967_v48 = vsel %vm5850_vm5, 1.0, %v4319_v7 }
0x168f   :  { %vm121_vm4 = vmor %vm4906_vm6, %vm4917_vm9  ;;  %v4950_v20 = vsel %vm116_vm3, 1.0, %v4319_v7 }
0x1690   :  { %v4954_v32 = vsel %vm121_vm4, 1.0, %v4319_v7  ;;  %v1105_v37 = vmul.f32 %v4950_v20, %v1104_v18  ;;  %vm5855_vm1 = vmmov %vm5844_vm2  ;;  %v1346_v18 = vld [vmem:[%s5764_s4 + $0x8] sm:$0xff] }
0x1691   :  { %v1109_v40 = vmul.f32 %v4954_v32, %v1108_v31  ;;  %vm5856_vm14 = vmmov %vm5840_vm13 }
0x1692   :  { %vm5857_vm11 = vmmov %vm5848_vm7 }
0x1693   :  { %vm5858_vm6 = vmmov %vm5848_vm7 }
0x1694   :  { %vm5859_vm2 = vmmov %vm5858_vm6 }
0x1695   :  { %vm5860_vm9 = vmmov %vm5859_vm2 }
0x1696   :  { %vm5861_vm3 = vmmov %vm5859_vm2 }
0x1697   :  { %vm5862_vm4 = vmmov %vm5859_vm2 }
0x1698   :  { %vm5864_vm12 = vmmov %vm5859_vm2 }
0x1699   :  { %vm5865_vm5 = vmmov %vm5859_vm2 }
0x169a   :  { %vm5866_vm0 = vmmov %vm5859_vm2 }
0x169b   :  { %vm5867_vm15 = vmmov %vm5866_vm0 }
0x169c   :  { %vm5868_vm10 = vmmov %vm5866_vm0 }
0x16a9   :  { %s4122_s26 = spop %4121 }
0x16aa   :  { %p1047_p7 = scmp.ge.f32.partialorder %s4122_s26, 0.0001  ;;  %s5886_s26 = sld [smem:[#allocation13_spill]] }
0x16ac   :  { %s1048_s16 = scalar_select %p1047_p7, 1, 0 }
0x16ae   :  { %s1049_s9 = scvt.s32.f32 %s1048_s16 }
0x16b0   :  { %s4806_s0 = smul.f32 %s1049_s9, %s4602_s10 }
0x16b2   :  { %s1079_s11 = smul.f32 %s4622_s7, %s4806_s0  ;;  %v1167_v52 = vstv %s4806_s0  ;;  %s1178_s7 = sadd.f32 %s1177_s18, %s4506_s23 }
0x16b3   :  { %v1168_v57 = vmul.f32 %v1167_v52, %v4606_v35  ;;  %v1078_v35 = vadd.f32 %v1077_v29, %v1074_v54  ;;  %v1117_v29 = vmul.f32 %v4967_v48, %v1115_v44  ;;  %v1147_v52 = vpop.permute.xlu0 %1146 }
0x16b4   :  { %v1080_v27 = vstv %s1079_s11  ;;  %s1179_s24 = sadd.f32 %s1178_s7, %s4530_s20  ;;  %v1149_v58 = vmul.f32 %v4988_v53, %v1147_v52 }
0x16b5   :  { %v1081_v21 = vmul.f32 %v4828_v50, %v1080_v27  ;;  %1171 = vperm.xlu0 %4183, %v1168_v57   ;;  %v1126_v24 = vadd.f32 %v1125_v51, %v1117_v29  ;;  %v1141_v57 = vmul.f32 %v4983_v16, %v1139_v36  ;;  %s5885_s20 = sld [smem:[#allocation11_spill]] }
0x16b6   :  { %s1180_s14 = sadd.f32 %s1179_s24, %s4554_s13 }
0x16b7   :  { %v1082_v28 = vadd.f32 %v1081_v21, %v1078_v35  ;;  %v1134_v54 = vadd.f32 %v1133_v17, %v1126_v24  ;;  %v1155_v35 = vpop.permute.xlu1 %1154  ;;  %v4998_v21 = vsel %vm5854_vm8, 1.0, %v4319_v7  ;;  %vm5869_vm8 = vmmov %vm5866_vm0  ;;  %s5887_s24 = sld [smem:[#allocation10_spill]] }
0x16b8   :  { %s1181_s23 = sadd.f32 %s1180_s14, %s4578_s3  ;;  %v1157_v62 = vmul.f32 %v4998_v21, %v1155_v35  ;;  %v1586_v35 = vld [vmem:[%s5764_s4 + $0x30] sm:$0xff] }
0x16b9   :  { %v1086_v63 = vadd.f32 %v1085_v42, %v1082_v28  ;;  %v1142_v27 = vadd.f32 %v1141_v57, %v1134_v54  ;;  %v1163_v42 = vpop.permute.xlu2 %1162  ;;  %v5006_v28 = vsel %vm5855_vm1, 1.0, %v4319_v7  ;;  %vm5870_vm1 = vmmov %vm5866_vm0 }
0x16ba   :  { %s1182_s29 = sadd.f32 %s1181_s23, %s4602_s10  ;;  %s5892_s10 = smov 1.1920929e-07  }
0x16bb   :  { %v1090_v8 = vadd.f32 %v1089_v2, %v1086_v63  ;;  %v1150_v60 = vadd.f32 %v1149_v58, %v1142_v27  ;;  %v5012_v2 = vsel %vm5856_vm14, 1.0, %v4319_v7  ;;  %v1165_v63 = vmul.f32 %v5006_v28, %v1163_v42  ;;  %vm5871_vm14 = vmmov %vm5866_vm0  ;;  %v5081_v27 = vld [vmem:[%s5762_s2 + $0x20] sm:$0xff] }
0x16bc   :  { %s1183_s19 = sadd.f32 %s1182_s29, %s4806_s0 }
0x16bd   :  { %v1094_v14 = vadd.f32 %v1093_v3, %v1090_v8  ;;  %v1158_v34 = vadd.f32 %v1157_v62, %v1150_v60  ;;  %s5890_s29 = sld [smem:[#allocation7_spill]] }
0x16be   :  { %v1184_v15 = vstv %s1183_s19 }
0x16bf   :  { %v1098_v26 = vadd.f32 %v1097_v12, %v1094_v14  ;;  %v1166_v55 = vadd.f32 %v1165_v63, %v1158_v34  ;;  %vm1185_vm13 = vcmp.lt.f32.partialorder %v48_v22, %v1184_v15  ;;  %v1664_v34 = vld [vmem:[%s5766_s6 + $0x38] sm:$0xff]  ;;  %v1663_v15 = vld [vmem:[%s5766_s6 + $0x30] sm:$0xff]  ;;  %v1662_v63 = vld [vmem:[%s5766_s6 + $0x28] sm:$0xff] }
0x16c0   :  { %v3975_v4 = vsel %vm1185_vm13, 1.0, %v4319_v7  ;;  %vm5872_vm13 = vmmov %vm5866_vm0 }
0x16c1   :  { %v1102_v33 = vadd.f32 %v1101_v23, %v1098_v26  ;;  %v5033_v26 = vld [vmem:[%s5762_s2] sm:$0xff] }
0x16c3   :  { %v1106_v39 = vadd.f32 %v1105_v37, %v1102_v33  ;;  %v1325_v33 = vld [vmem:[%s5764_s4] sm:$0xff]  ;;  %v1464_v37 = vld [vmem:[%s5764_s4 + $0x18] sm:$0xff] }
0x16c5   :  { %v1110_v41 = vadd.f32 %v1109_v40, %v1106_v39  ;;  %v1489_v39 = vld [vmem:[%s5764_s4 + $0x20] sm:$0xff] }
0x16c7   :  { %1207 = vmatpush.msra.mxu3 %v1110_v41  ;;  %1253 = vmatpush.msrb.mxu0 %v1110_v41 }
0x16c8   :  { %3979 = vmatmul.msk.f32.vlgmr.msrb.gmra.mxu0 %vm5848_vm7, %v1110_v41  ;;  %vm5863_vm7 = vmmov %vm5859_vm2 }
0x1727   :  { %v1172_v0 = vpop.permute.xlu0 %1171 }
0x1728   :  { %v1174_v3 = vmul.f32 %v5012_v2, %v1172_v0  ;;  %v1661_v0 = vld [vmem:[%s5766_s6 + $0x20] sm:$0xff] }
0x172a   :  { %v1175_v8 = vadd.f32 %v1174_v3, %v1166_v55  ;;  %v1640_v55 = vld [vmem:[%s5766_s6 + $0x18] sm:$0xff]  ;;  %v1639_v3 = vld [vmem:[%s5766_s6 + $0x10] sm:$0xff] }
0x172c   :  { %v1188_v12 = vmul.f32 %v3975_v4, %v1175_v8  ;;  %v1638_v8 = vld [vmem:[%s5766_s6 + $0x8] sm:$0xff]  ;;  %v1637_v4 = vld [vmem:[%s5766_s6] sm:$0xff] }
0x172e   :  { %3976 = vmatmul.msk.f32.vlgmr.msra.gmra.mxu3 %vm5857_vm11, %v1188_v12  ;;  %3977 = vmatpush.xpose.msk.msra.mxu1 %vm5858_vm6, %v1188_v12  ;;  %vm5873_vm11 = vmmov %vm5866_vm0 }
0x172f   :  { %3981 = vmatpush.xpose.msk.msrb.mxu3 %vm5859_vm2, %v1188_v12  ;;  %vm5874_vm6 = vmmov %vm5866_vm0 }
0x1730   :  { %vm5875_vm2 = vmmov %vm5866_vm0 }
0x1732   :  { %1320 = vmatpush.msrb.mxu1 %v4405_v9 }
0x1733   :  { %1388 = vmatpush.msra.mxu3 %v1325_v33 }
0x1745   :  { %v1255_v14 = vpop.f32.mrf.mxu0 }
0x1746   :  { %1273 = vmatpush.msrb.mxu2 %v1255_v14  ;;  %v1782_v14 = vld [vmem:[%s5766_s6 + $0x70] sm:$0xff] }
0x1747   :  { %3980 = vmatmul.msk.f32.vlgmr.msrb.gmra.mxu2 %vm5860_vm9, %v1188_v12  ;;  %v1783_v12 = vld [vmem:[%s5766_s6 + $0x78] sm:$0xff]  ;;  %vm5876_vm9 = vmmov %vm5866_vm0 }
0x1748   :  { %1365 = vmatpush.msra.mxu2 %v1346_v18 }
0x174a   :  { %1459 = vmatpush.msrb.mxu2 %v4405_v9 }
0x17b1   :  { %v1209_v23 = vpop.f32.mrf.mxu3 }
0x17b2   :  { %3978 = vmatmul.msk.f32.vlgmr.msra.gmra.mxu1 %vm5861_vm3, %v1209_v23  ;;  %v1781_v23 = vld [vmem:[%s5766_s6 + $0x68] sm:$0xff]  ;;  %vm5877_vm3 = vmmov %vm5866_vm0 }
0x17b3   :  { %1411 = vmatpush.msra.mxu1 %v4405_v9 }
0x17ba   :  { %3983 = vmatmul.msk.f32.vlgmr.msrb.gmra.mxu1 %vm5862_vm4, %v5033_v26  ;;  %vm1665_vm4 = vcmask 261120  }
0x17bb   :  { %1505 = vmatpush.msrb.mxu1 %v1489_v39  ;;  %v4186_v39 = vld [vmem:[%s5765_s5] ss:$0 sm:$0xff] }
0x17ca   :  { %v1275_v31 = vpop.f32.mrf.mxu2 }
0x17cb   :  { %3982 = vmatmul.msk.f32.vlgmr.msrb.gmra.mxu3 %vm5863_vm7, %v1275_v31  ;;  %vm5878_vm7 = vmmov %vm5866_vm0 }
0x17cc   :  { %1483 = vmatpush.msrb.mxu3 %v1464_v37 }
0x182f   :  { %v5047_v40 = vpop.f32.mrf.mxu1 }
0x1830   :  { %3987 = vmatmul.msk.f32.vlgmr.msra.gmra.mxu1 %vm5864_vm12, %v5047_v40  ;;  %vm5879_vm12 = vmmov %vm5866_vm0 }
0x1831   :  { %1605 = vmatpush.msra.mxu1 %v1586_v35  ;;  %v1732_v35 = vld [vmem:[%s5766_s6 + $0x40] sm:$0xff] }
0x1837   :  { %v1322_v41 = vpop.f32.mrf.mxu1 }
0x1838   :  { %1341 = vmatpush.msra.mxu0 %v1322_v41  ;;  %3986 = vmatmul.msk.f32.vlgmr.msra.gmra.mxu3 %vm5865_vm5, %v1322_v41  ;;  %vm5880_vm5 = vmmov %vm5866_vm0 }
0x1839   :  { %3991 = vmatmul.msk.f32.vlgmr.msrb.gmra.mxu1 %vm5866_vm0, %v1322_v41  ;;  %1581 = vmatpush.msra.mxu3 %v4405_v9 }
0x183a   :  { %3984 = vmatmul.msk.f32.vlgmr.msra.gmra.mxu0 %vm5867_vm15, %v5033_v26  ;;  %1704 = vmatpush.msrb.mxu1 %v1640_v55 }
0x183b   :  { %1435 = vmatpush.msrb.mxu0 %v1416_v56 }
0x183c   :  { %1705 = vmatpush.msrb.mxu1 %v1639_v3 }
0x183d   :  { %1531 = vmatpush.msra.mxu0 %v4405_v9  ;;  %v1536_v9 = vld [vmem:[%s5764_s4 + $0x28] sm:$0xff] }
0x183e   :  { %1706 = vmatpush.msrb.mxu1 %v1638_v8  ;;  %v2044_v8 = vld [vmem:[%s5761_s1] sm:$0xff]  ;;  %s5889_s1 = sld [smem:[#allocation6_spill]] }
0x1840   :  { %1707 = vmatpush.msrb.mxu1 %v1637_v4 }
0x184e   :  { %v5069_v36 = vpop.f32.mrf.mxu3 }
0x18ad   :  { %v1413_v44 = vpop.f32.mrf.mxu1 }
0x18ae   :  { %3988 = vmatmul.msk.f32.vlgmr.msrb.gmra.mxu0 %vm5868_vm10, %v1413_v44  ;;  %vm5881_vm10 = vmmov %vm5866_vm0 }
0x18b6   :  { %3993 = vmatmul.msk.f32.vlgmr.msra.gmra.mxu0 %vm5869_vm8, %v5064_v45  ;;  %v1507_v18 = vpop.f32.mrf.mxu1  ;;  %vm5882_vm8 = vmmov %vm5866_vm0 }
0x18b7   :  { %v1343_v51 = vpop.f32.mrf.mxu0 }
0x18b8   :  { %3985 = vmatmul.msk.f32.vlgmr.msra.gmra.mxu2 %vm5870_vm1, %v1343_v51  ;;  %vm5883_vm1 = vmmov %vm5866_vm0 }
0x18b9   :  { %1555 = vmatpush.msra.mxu2 %v1536_v9  ;;  %v1811_v9 = vld [vmem:[%s5766_s6 + $0x98] sm:$0xff] }
0x18bb   :  { %v1390_v24 = vpop.f32.mrf.mxu3 }
0x18c0   :  { %3989 = vmatmul.msk.f32.vlgmr.msrb.gmra.mxu2 %vm5871_vm14, %v5069_v36  ;;  %vm5884_vm14 = vmmov %vm5866_vm0 }
0x192b   :  { %v1437_v29 = vpop.f32.mrf.mxu0 }
0x1933   :  { %v1533_v17 = vpop.f32.mrf.mxu0 }
0x1934   :  { %3994 = vmatmul.msk.f32.vlgmr.msra.gmra.mxu2 %vm5872_vm13, %v1533_v17  ;;  %v1809_v17 = vld [vmem:[%s5766_s6 + $0x88] sm:$0xff]  ;;  %vm5888_vm13 = vmmov %vm5866_vm0 }
0x193b   :  { %v1367_v52 = vpop.f32.mrf.mxu2 }
0x193c   :  { %v1391_v54 = vadd.f32 %v1390_v24, %v1367_v52  ;;  %v1780_v24 = vld [vmem:[%s5766_s6 + $0x60] sm:$0xff] }
0x193d   :  { %v1808_v52 = vld [vmem:[%s5766_s6 + $0x80] sm:$0xff] }
0x193e   :  { %v1440_v57 = vadd.f32 %v1437_v29, %v1391_v54  ;;  %v1810_v29 = vld [vmem:[%s5766_s6 + $0x90] sm:$0xff] }
0x1943   :  { %v1461_v58 = vpop.f32.mrf.mxu2 }
0x1944   :  { %3990 = vmatmul.msk.f32.vlgmr.msrb.gmra.mxu3 %vm5873_vm11, %v1461_v58  ;;  %v1733_v58 = vld [vmem:[%s5766_s6 + $0x48] sm:$0xff]  ;;  %vm5891_vm11 = vcmask 7168  }
0x1945   :  { %1681 = vmatpush.msrb.mxu3 %v1664_v34  ;;  %v1855_v34 = vld [vmem:[%s5766_s6 + $0xb0] sm:$0xff] }
0x1947   :  { %1682 = vmatpush.msrb.mxu3 %v1663_v15  ;;  %v1853_v15 = vld [vmem:[%s5766_s6 + $0xa0] sm:$0xff] }
0x1949   :  { %1683 = vmatpush.msrb.mxu3 %v1662_v63 }
0x194b   :  { %1684 = vmatpush.msrb.mxu3 %v1661_v0 }
0x194c   :  { %3996 = vmatmul.msk.f32.vlgmr.msra.gmra.mxu3 %vm5874_vm6, %v5081_v27 }
0x19b7   :  { %v1557_v33 = vpop.f32.mrf.mxu2 }
0x19c7   :  { %v1485_v60 = vpop.f32.mrf.mxu3 }
0x19c8   :  { %v1488_v62 = vadd.f32 %v1485_v60, %v1440_v57  ;;  %v1735_v57 = vld [vmem:[%s5766_s6 + $0x58] sm:$0xff] }
0x19ca   :  { %v1510_v31 = vadd.f32 %v1507_v18, %v1488_v62  ;;  %v1904_v18 = vld [vmem:[%s5766_s6 + $0xd8] sm:$0xff] }
0x19cc   :  { %v1560_v37 = vadd.f32 %v1557_v33, %v1510_v31 }
0x19cf   :  { %v1583_v42 = vpop.f32.mrf.mxu3 }
0x19d0   :  { %3997 = vmatmul.msk.f32.vlgmr.msra.gmra.mxu1 %vm5875_vm2, %v1583_v42  ;;  %v1856_v42 = vld [vmem:[%s5766_s6 + $0xb8] sm:$0xff] }
0x19d1   :  { %1799 = vmatpush.msra.mxu1 %v1783_v12  ;;  %v2040_v12 = vpop.permute.xlu1 %2039 }
0x19d2   :  { %vm2041_vm15 = vcmp.eq.s32.totalorder %v2040_v12, %v4400_v5  ;;  %v1901_v5 = vld [vmem:[%s5766_s6 + $0xc0] sm:$0xff]  ;;  %v5243_v12 = vld [vmem:[%s5890_s29 + $0x8] sm:$0xff] }
0x19d3   :  { %1800 = vmatpush.msra.mxu1 %v1782_v14  ;;  %v4014_v14 = vsel %vm2041_vm15, 1.0, %v4319_v7 }
0x19d5   :  { %1801 = vmatpush.msra.mxu1 %v1781_v23  ;;  %v1903_v23 = vld [vmem:[%s5766_s6 + $0xd0] sm:$0xff] }
0x19d7   :  { %1802 = vmatpush.msra.mxu1 %v1780_v24  ;;  %v1966_v24 = vld [vmem:[%s5886_s26 + $0x8] sm:$0xff] }
0x1a4d   :  { %v1607_v41 = vpop.f32.mrf.mxu1 }
0x1a4e   :  { %v1610_v56 = vadd.f32 %v1607_v41, %v1560_v37 }
0x1a50   :  { %v1614_v44 = vadd.f32 %v4186_v39, %v1610_v56 }
0x1a52   :  { %v1615_v51 = vmax.f32 %v1614_v44, 0.0  ;;  %v1937_v44 = vld [vmem:[%s5885_s20 + $0x18] sm:$0xff] }
0x1a54   :  { %1632 = vmatpush.msrb.mxu0 %v1615_v51  ;;  %1775 = vmatpush.msra.mxu3 %v1615_v51 }
0x1a55   :  { %3998 = vmatmul.msk.f32.vlgmr.msrb.gmra.mxu0 %vm5876_vm9, %v5033_v26 }
0x1a56   :  { %1727 = vmatpush.msra.mxu0 %v1615_v51 }
0x1a58   :  { %1824 = vmatpush.msrb.mxu0 %v1811_v9  ;;  %v1936_v9 = vld [vmem:[%s5885_s20 + $0x10] sm:$0xff] }
0x1a5a   :  { %1825 = vmatpush.msrb.mxu0 %v1810_v29  ;;  %v1967_v29 = vld [vmem:[%s5886_s26 + $0x10] sm:$0xff] }
0x1a5c   :  { %1826 = vmatpush.msrb.mxu0 %v1809_v17  ;;  %v1935_v17 = vld [vmem:[%s5885_s20 + $0x8] sm:$0xff] }
0x1a5d   :  { %4002 = vmatmul.msk.f32.vlgmr.msra.gmra.mxu0 %vm5877_vm3, %v5047_v40  ;;  %v1734_v40 = vld [vmem:[%s5766_s6 + $0x50] sm:$0xff] }
0x1a5e   :  { %1827 = vmatpush.msrb.mxu0 %v1808_v52  ;;  %v1934_v52 = vld [vmem:[%s5885_s20] sm:$0xff] }
0x1a60   :  { %1920 = vmatpush.msra.mxu0 %v1904_v18 }
0x1a62   :  { %1921 = vmatpush.msra.mxu0 %v1903_v23 }
0x1ad2   :  { %v1634_v54 = vpop.f32.mrf.mxu0 }
0x1ad3   :  { %1656 = vmatpush.msrb.mxu2 %v1634_v54  ;;  %4001 = vmatmul.msk.f32.vlgmr.msrb.gmra.mxu1 %vm1665_vm4, %v1634_v54 }
0x1ad4   :  { %4006 = vmatmul.msk.f32.vlgmr.msrb.gmra.mxu0 %vm1665_vm4, %v1634_v54  ;;  %1896 = vmatpush.msrb.mxu1 %v1615_v51  ;;  %v1965_v54 = vld [vmem:[%s5886_s26] sm:$0xff] }
0x1ad5   :  { %3999 = vmatmul.msk.f32.vlgmr.msrb.gmra.mxu2 %vm5878_vm7, %v5033_v26 }
0x1ad6   :  { %1751 = vmatpush.msra.mxu2 %v1735_v57 }
0x1ad8   :  { %1752 = vmatpush.msra.mxu2 %v1734_v40 }
0x1ada   :  { %1753 = vmatpush.msra.mxu2 %v1733_v58  ;;  %v1729_v60 = vpop.f32.mrf.mxu0 }
0x1adc   :  { %1754 = vmatpush.msra.mxu2 %v1732_v35 }
0x1add   :  { %4003 = vmatmul.msk.f32.vlgmr.msra.gmra.mxu2 %vm1665_vm4, %v1729_v60  ;;  %v4187_v60 = vld [vmem:[%s5887_s24] ss:$0 sm:$0xff]  ;;  %s5918_s24 = sld [smem:[#allocation12_spill]] }
0x1ade   :  { %1848 = vmatpush.msrb.mxu2 %v1615_v51  ;;  %v1968_v51 = vld [vmem:[%s5886_s26 + $0x18] sm:$0xff] }
0x1ae0   :  { %1957 = vmatpush.msra.mxu2 %v1937_v44 }
0x1ae2   :  { %1958 = vmatpush.msra.mxu2 %v1936_v9 }
0x1ae4   :  { %1959 = vmatpush.msra.mxu2 %v1935_v17 }
0x1ae5   :  { %4007 = vmatmul.msk.f32.vlgmr.msrb.gmra.mxu2 %vm5879_vm12, %v5064_v45  ;;  %v1854_v45 = vld [vmem:[%s5766_s6 + $0xa8] sm:$0xff]  ;;  %vm5893_vm12 = vmmov %vm5866_vm0 }
0x1ae6   :  { %1960 = vmatpush.msra.mxu2 %v1934_v52 }
0x1b50   :  { %v1709_v63 = vpop.f32.mrf.mxu1 }
0x1b51   :  { %v1829_v57 = vpop.f32.mrf.mxu0 }
0x1b58   :  { %v1658_v26 = vpop.f32.mrf.mxu2 }
0x1b59   :  { %4000 = vmatmul.msk.f32.vlgmr.msrb.gmra.mxu3 %vm1665_vm4, %v1658_v26 }
0x1b5a   :  { %1872 = vmatpush.msrb.mxu3 %v1856_v42 }
0x1b5c   :  { %1873 = vmatpush.msrb.mxu3 %v1855_v34 }
0x1b5e   :  { %1874 = vmatpush.msrb.mxu3 %v1854_v45 }
0x1b60   :  { %v1756_v62 = vpop.f32.mrf.mxu2  ;;  %1875 = vmatpush.msrb.mxu3 %v1853_v15 }
0x1b61   :  { %4004 = vmatmul.msk.f32.vlgmr.msra.gmra.mxu3 %vm5880_vm5, %v5069_v36 }
0x1b62   :  { %1985 = vmatpush.msra.mxu3 %v1968_v51 }
0x1b64   :  { %1986 = vmatpush.msra.mxu3 %v1967_v29 }
0x1b66   :  { %1987 = vmatpush.msra.mxu3 %v1966_v24 }
0x1b68   :  { %v1850_v36 = vpop.f32.mrf.mxu2  ;;  %1988 = vmatpush.msra.mxu3 %v1965_v54 }
0x1b69   :  { %4008 = vmatmul.msk.f32.vlgmr.msrb.gmra.mxu3 %vm1665_vm4, %v1850_v36 }
0x1bdc   :  { %v1686_v0 = vpop.f32.mrf.mxu3 }
0x1bdd   :  { %v1710_v55 = vadd.f32 %v1709_v63, %v1686_v0 }
0x1bdf   :  { %v1759_v3 = vadd.f32 %v1756_v62, %v1710_v55 }
0x1be4   :  { %v1777_v4 = vpop.f32.mrf.mxu3 }
0x1be5   :  { %4005 = vmatmul.msk.f32.vlgmr.msra.gmra.mxu1 %vm1665_vm4, %v1777_v4 }
0x1be6   :  { %2063 = vmatpush.msra.mxu1 %v2044_v8 }
0x1bec   :  { %v1877_v58 = vpop.f32.mrf.mxu3 }
0x1bed   :  { %4009 = vmatmul.msk.f32.vlgmr.msrb.gmra.mxu1 %vm5866_vm0, %v5081_v27  ;;  %v1902_v27 = vld [vmem:[%s5766_s6 + $0xc8] sm:$0xff] }
0x1bee   :  { %1922 = vmatpush.msra.mxu0 %v1902_v27 }
0x1bf0   :  { %1923 = vmatpush.msra.mxu0 %v1901_v5 }
0x1bf5   :  { %4015 = vmatmul.msk.f32.vlgmr.msra.gmra.mxu1 %vm5881_vm10, %v4014_v14  ;;  %v2247_v14 = vmul.f32 %v5243_v12, %v5243_v12 }
0x1bf7   :  { %v2248_v18 = vsel %vm5891_vm11, %v2247_v14, 0.0 }
0x1c62   :  { %v1804_v31 = vpop.f32.mrf.mxu1 }
0x1c63   :  { %v1807_v33 = vadd.f32 %v1804_v31, %v1759_v3 }
0x1c65   :  { %v1832_v40 = vadd.f32 %v1829_v57, %v1807_v33 }
0x1c67   :  { %v1880_v35 = vadd.f32 %v1877_v58, %v1832_v40 }
0x1c6a   :  { %v1898_v37 = vpop.f32.mrf.mxu1 }
0x1c6b   :  { %4010 = vmatmul.msk.f32.vlgmr.msra.gmra.mxu0 %vm1665_vm4, %v1898_v37 }
0x1c72   :  { %v5201_v39 = vpop.f32.mrf.mxu1 }
0x1c73   :  { %4018 = vmatpush.xpose.msk.msrb.mxu0 %vm5882_vm8, %v5201_v39  ;;  %v2073_v41 = vmul.f32 %v5201_v39, %v5201_v39 }
0x1c75   :  { %v2074_v56 = vsel %vm5883_vm1, %v2073_v41, 0.0 }
0x1c76   :  { %2075 = vadd.xlane.f32.xlu0 %v2074_v56  ;;  %4019 = vmatmul.msk.f32.vlgmr.msrb.gmra.mxu0 %vm5884_vm14, %v5201_v39 }
0x1c7e   :  { %2249 = vadd.xlane.f32.xlu0 %v2248_v18 }
0x1ce8   :  { %v1925_v26 = vpop.f32.mrf.mxu0 }
0x1ce9   :  { %v1928_v62 = vadd.f32 %v1925_v26, %v1880_v35  ;;  %v2076_v42 = vpop.xlane.xlu0 %2075 }
0x1cea   :  { %2100 = vxpose.xlu1.b32.start.end [1/1] (short) (narrow) %v2076_v42, 8 }
0x1ceb   :  { %v1932_v34 = vadd.f32 %v4187_v60, %v1928_v62  ;;  %v4016_v60 = vld [vmem:[%s5762_s2 + $0x8] sm:$0xff] }
0x1cec   :  { %vm2070_vm7 = vcmp.ne.f32.partialorder %v4016_v60, 0.0 }
0x1ced   :  { %v1933_v45 = vmax.f32 %v1932_v34, 0.0  ;;  %v4017_v62 = vsel %vm2070_vm7, 1.0, %v4319_v7  ;;  %vm5894_vm7 = vmmov %vm5893_vm12 }
0x1cef   :  { %4011 = vmatmul.msk.f32.vlgmr.msra.gmra.mxu2 %vm1665_vm4, %v1933_v45  ;;  %4012 = vmatmul.msk.f32.vlgmr.msra.gmra.mxu3 %vm1665_vm4, %v1933_v45 }
0x1cf3   :  { %v2097_v15 = vpop.f32.mrf.mxu0 }
0x1cf4   :  { %v2134_v0 = vmul.f32 2.0, %v2097_v15  ;;  %v2250_v15 = vpop.xlane.xlu0 %2249 }
0x1d8e   :  { %v2116_v36 = vpop.trf.xlu1 }
0x1d8f   :  { %v2132_v63 = vperm.slane %v2116_v36, 0  ;;  %v2251_v36 = vrot.slane %v2250_v15, 4 }
0x1d91   :  { %v2133_v55 = vadd.f32 %v2132_v63, %v2076_v42  ;;  %v2252_v63 = vadd.f32 %v2251_v36, %v2250_v15 }
0x1d93   :  { %v2135_v3 = vsub.f32 %v2133_v55, %v2134_v0  ;;  %v2253_v0 = vrot.slane %v2252_v63, 2 }
0x1d95   :  { %v2136_v8 = vmax.f32 %v2135_v3, 0.0  ;;  %v2254_v55 = vadd.f32 %v2253_v0, %v2252_v63 }
0x1d97   :  { %v2137_v4 = vsel %vm5888_vm13, %v2136_v8, 0.0  ;;  %v2157_v57 = vsub.f32 0.0, %v2136_v8  ;;  %v2255_v3 = vrot.slane %v2254_v55, 1 }
0x1d98   :  { %2138 = vadd.xlane.f32.xlu2 %v2137_v4 }
0x1d99   :  { %v2256_v8 = vadd.f32 %v2255_v3, %v2254_v55 }
0x1e0b   :  { %v2139_v23 = vpop.xlane.xlu2 %2138 }
0x1e0c   :  { %v2140_v27 = vrot.slane %v2139_v23, 4 }
0x1e0e   :  { %v2141_v5 = vadd.f32 %v2140_v27, %v2139_v23 }
0x1e10   :  { %v2142_v31 = vrot.slane %v2141_v5, 2 }
0x1e12   :  { %v2143_v33 = vadd.f32 %v2142_v31, %v2141_v5 }
0x1e14   :  { %v2144_v37 = vrot.slane %v2143_v33, 1 }
0x1e16   :  { %v2145_v41 = vadd.f32 %v2144_v37, %v2143_v33 }
0x1e18   :  { %4123 = vpush %v2145_v41 }
0x1e19   :  { %4125 = vpush %v2256_v8 }
0x1e49   :  { %s4124_s19 = spop %4123 }
0x1e4a   :  { %s2155_s3 = smul.f32 %s4124_s19, %s5889_s1  ;;  %s4126_s22 = spop %4125 }
0x1e4b   :  { %v2258_v4 = vstv %s4126_s22 }
0x1e4c   :  { %s2156_s13 = smax.f32 %s5892_s10, %s2155_s3  ;;  %vm2266_vm5 = vcmp.eq.f32.partialorder %v2258_v4, inf  ;;  %v2269_v33 = vand.u32 2147483648, %v2258_v4  ;;  %vm2268_vm0 = vcmp.eq.f32.partialorder %v2258_v4, 0.0 }
0x1e4d   :  { %v2158_v56 = vstv %s2156_s13 }
0x1e4e   :  { %4238 = vrcp.f32 %v2158_v56  ;;  %v2170_v29 = vand.u32 2147483648, %v2158_v56  ;;  %v2168_v24 = vand.u32 2147483647, %v2158_v56  ;;  %vm2164_vm2 = vweird.f32 %v2158_v56 }
0x1e50   :  { %v2171_v54 = vor.u32 1.1754944e-38, %v2170_v29  ;;  %vm2169_vm3 = vcmp.eq.f32.partialorder %v2168_v24, 8.507059e+37 }
0x1e54   :  { %v4239_v44 = vpop.eup %4238 }
0x1e55   :  { %v2160_v51 = vmul.f32 %v4239_v44, %v2158_v56  ;;  %vm2165_vm6 = vweird.f32 %v4239_v44 }
0x1e56   :  { %vm2166_vm9 = vmor %vm2164_vm2, %vm2165_vm6 }
0x1e57   :  { %v2161_v9 = vsub.f32 1.0, %v2160_v51 }
0x1e59   :  { %v2162_v17 = vmul.f32 %v4239_v44, %v2161_v9 }
0x1e5b   :  { %v2163_v52 = vadd.f32 %v4239_v44, %v2162_v17 }
0x1e5d   :  { %v2167_v40 = vsel %vm2166_vm9, %v4239_v44, %v2163_v52 }
0x1e5e   :  { %v2172_v58 = vsel %vm2169_vm3, %v2171_v54, %v2167_v40 }
0x1e5f   :  { %v2173_v35 = vmul.f32 %v2172_v58, %v2157_v57 }
0x1e61   :  { %v2174_v26 = vmul.f32 1.442695, %v2173_v35 }
0x1e63   :  { %4240 = vpow2.f32 %v2174_v26 }
0x1e64   :  { %4242 = vrsqrt.f32 %v2258_v4 }
0x1e69   :  { %v4241_v42 = vpop.eup %4240 }
0x1e6a   :  { %v5254_v34 = vmul.f32 %v4241_v42, %v4017_v62  ;;  %v4243_v14 = vpop.eup %4242 }
0x1e6b   :  { %v2260_v18 = vmul.f32 %v4243_v14, %v2258_v4 }
0x1e6c   :  { %v2177_v45 = vsel %vm5893_vm12, %v5254_v34, 0.0  ;;  %vm5895_vm12 = vcmask 7168  }
0x1e6d   :  { %2178 = vadd.xlane.f32.xlu0 %v2177_v45  ;;  %v2261_v23 = vmul.f32 %v4243_v14, %v2260_v18 }
0x1e6f   :  { %v2262_v27 = vmul.f32 0.5, %v2261_v23 }
0x1e71   :  { %v2263_v5 = vsub.f32 1.5, %v2262_v27 }
0x1e73   :  { %v2264_v31 = vmul.f32 %v4243_v14, %v2263_v5 }
0x1e75   :  { %v2265_v37 = vmul.f32 %v2264_v31, %v2258_v4 }
0x1e77   :  { %v2267_v41 = vsel %vm2266_vm5, %v2258_v4, %v2265_v37  ;;  %vm5896_vm5 = vmmov %vm5895_vm12 }
0x1e78   :  { %v2270_v56 = vsel %vm2268_vm0, %v2269_v33, %v2267_v41 }
0x1e79   :  { %4127 = vpush %v2270_v56 }
0x1eaa   :  { %s4128_s16 = spop %4127 }
0x1eab   :  { %v2272_v8 = vstv %s4128_s16 }
0x1eac   :  { %v2284_v18 = vand.u32 2147483648, %v2272_v8  ;;  %vm2278_vm6 = vweird.f32 %v2272_v8  ;;  %v2282_v27 = vand.u32 2147483647, %v2272_v8 }
0x1eae   :  { %v2285_v31 = vor.u32 1.1754944e-38, %v2284_v18  ;;  %vm2283_vm3 = vcmp.eq.f32.partialorder %v2282_v27, 8.507059e+37 }
0x1ee0   :  { %v2179_v44 = vpop.xlane.xlu0 %2178 }
0x1ee1   :  { %vm2180_vm15 = vcmp.eq.f32.partialorder %v2179_v44, 0.0 }
0x1ee2   :  { %v2181_v51 = vsel %vm2180_vm15, 1.0, %v4319_v7 }
0x1ee3   :  { %v2182_v9 = vadd.f32 %v2181_v51, %v2179_v44 }
0x1ee5   :  { %4244 = vrsqrt.f32 %v2182_v9  ;;  %vm2190_vm10 = vcmp.eq.f32.partialorder %v2182_v9, inf  ;;  %v2193_v58 = vand.u32 2147483648, %v2182_v9  ;;  %vm2192_vm8 = vcmp.eq.f32.partialorder %v2182_v9, 0.0 }
0x1eeb   :  { %v4245_v29 = vpop.eup %4244 }
0x1eec   :  { %v2184_v17 = vmul.f32 %v4245_v29, %v2182_v9 }
0x1eee   :  { %v2185_v24 = vmul.f32 %v4245_v29, %v2184_v17  ;;  %v5268_v17 = vpop.f32.mrf.mxu2 }
0x1ef0   :  { %v2186_v52 = vmul.f32 0.5, %v2185_v24 }
0x1ef2   :  { %v2187_v54 = vsub.f32 1.5, %v2186_v52 }
0x1ef4   :  { %v2188_v57 = vmul.f32 %v4245_v29, %v2187_v54 }
0x1ef6   :  { %v2189_v40 = vmul.f32 %v2188_v57, %v2182_v9 }
0x1ef8   :  { %v2191_v35 = vsel %vm2190_vm10, %v2182_v9, %v2189_v40 }
0x1ef9   :  { %v2194_v60 = vsel %vm2192_vm8, %v2193_v58, %v2191_v35 }
0x1efa   :  { %4246 = vrcp.f32 %v2194_v60  ;;  %v2206_v45 = vand.u32 2147483648, %v2194_v60  ;;  %v2204_v36 = vand.u32 2147483647, %v2194_v60  ;;  %vm2200_vm14 = vweird.f32 %v2194_v60 }
0x1efb   :  { %4248 = vrcp.f32 %v2272_v8 }
0x1efc   :  { %v2207_v0 = vor.u32 1.1754944e-38, %v2206_v45  ;;  %vm2205_vm11 = vcmp.eq.f32.partialorder %v2204_v36, 8.507059e+37 }
0x1f00   :  { %v4247_v26 = vpop.eup %4246 }
0x1f01   :  { %v2196_v62 = vmul.f32 %v4247_v26, %v2194_v60  ;;  %vm2201_vm1 = vweird.f32 %v4247_v26  ;;  %v4249_v4 = vpop.eup %4248 }
0x1f02   :  { %vm2202_vm13 = vmor %vm2200_vm14, %vm2201_vm1  ;;  %v2274_v14 = vmul.f32 %v4249_v4, %v2272_v8  ;;  %vm2279_vm2 = vweird.f32 %v4249_v4 }
0x1f03   :  { %v2197_v42 = vsub.f32 1.0, %v2196_v62  ;;  %vm2280_vm9 = vmor %vm2278_vm6, %vm2279_vm2 }
0x1f04   :  { %v2275_v23 = vsub.f32 1.0, %v2274_v14  ;;  %vm5899_vm6 = vmmov %vm5896_vm5 }
0x1f05   :  { %v2198_v15 = vmul.f32 %v4247_v26, %v2197_v42 }
0x1f06   :  { %v2276_v5 = vmul.f32 %v4249_v4, %v2275_v23 }
0x1f07   :  { %v2199_v63 = vadd.f32 %v4247_v26, %v2198_v15 }
0x1f08   :  { %v2277_v33 = vadd.f32 %v4249_v4, %v2276_v5 }
0x1f09   :  { %v2203_v55 = vsel %vm2202_vm13, %v4247_v26, %v2199_v63  ;;  %vm5897_vm13 = vmmov %vm5894_vm7 }
0x1f0a   :  { %v2208_v3 = vsel %vm2205_vm11, %v2207_v0, %v2203_v55  ;;  %v2281_v37 = vsel %vm2280_vm9, %v4249_v4, %v2277_v33  ;;  %vm5898_vm11 = vmmov %vm5896_vm5 }
0x1f0b   :  { %2211 = vxpose.xlu2.b32.start.end [1/1] (short) (narrow) %v2208_v3, 8  ;;  %v2286_v41 = vsel %vm2283_vm3, %v2285_v31, %v2281_v37  ;;  %v2210_v51 = vmul.f32 %v2208_v3, %v5254_v34 }
0x1f0c   :  { %v5260_v56 = vmul.f32 %v5243_v12, %v2286_v41 }
0x1f0e   :  { %2306 = vmatpush.msrb.mxu2 %v5260_v56 }
0x1fa4   :  { %v2227_v44 = vpop.trf.xlu2 }
0x1fa5   :  { %v2243_v9 = vperm.slane %v2227_v44, 0 }
0x1fa7   :  { %v5264_v29 = vmul.f32 %v2243_v9, %v2210_v51 }
0x1fa9   :  { %4021 = vmatmul.msk.f32.vlgmr.msrb.gmra.mxu2 %vm5894_vm7, %v5264_v29 }
0x202c   :  { %v2308_v24 = vpop.f32.mrf.mxu2 }
0x202d   :  { %v2311_v52 = vmul.f32 %v2308_v24, %v5260_v56 }
0x202f   :  { %v2312_v54 = vsel %vm5895_vm12, %v2311_v52, 0.0 }
0x2030   :  { %2313 = vadd.xlane.f32.xlu1 %v2312_v54 }
0x20a3   :  { %v2314_v12 = vpop.xlane.xlu1 %2313 }
0x20a4   :  { %v2315_v57 = vrot.slane %v2314_v12, 4 }
0x20a6   :  { %v2316_v40 = vadd.f32 %v2315_v57, %v2314_v12 }
0x20a8   :  { %v2317_v58 = vrot.slane %v2316_v40, 2 }
0x20aa   :  { %v2318_v35 = vadd.f32 %v2317_v58, %v2316_v40 }
0x20ac   :  { %v2319_v34 = vrot.slane %v2318_v35, 1 }
0x20ae   :  { %v2320_v60 = vadd.f32 %v2319_v34, %v2318_v35 }
0x20b0   :  { %4129 = vpush %v2320_v60 }
0x20e1   :  { %s5272_s9 = spop %4129 }
0x20e2   :  { %v2322_v26 = vstv %s5272_s9 }
0x20e3   :  { %v2323_v62 = vmul.f32 %v2322_v26, %v5260_v56 }
0x20e5   :  { %v2324_v42 = vsub.f32 %v2308_v24, %v2323_v62 }
0x20e7   :  { %v2325_v45 = vmul.f32 %v2324_v42, %v2324_v42 }
0x20e9   :  { %v2326_v15 = vsel %vm5896_vm5, %v2325_v45, 0.0 }
0x20ea   :  { %2327 = vadd.xlane.f32.xlu0 %v2326_v15  ;;  %v5291_v15 = vpop.f32.mrf.mxu3 }
0x215d   :  { %v2328_v36 = vpop.xlane.xlu0 %2327 }
0x215e   :  { %v2329_v63 = vrot.slane %v2328_v36, 4 }
0x2160   :  { %v2330_v0 = vadd.f32 %v2329_v63, %v2328_v36 }
0x2162   :  { %v2331_v55 = vrot.slane %v2330_v0, 2 }
0x2164   :  { %v2332_v3 = vadd.f32 %v2331_v55, %v2330_v0 }
0x2166   :  { %v2333_v8 = vrot.slane %v2332_v3, 1 }
0x2168   :  { %v2334_v4 = vadd.f32 %v2333_v8, %v2332_v3 }
0x216a   :  { %4131 = vpush %v2334_v4 }
0x219b   :  { %s4132_s12 = spop %4131 }
0x219c   :  { %v2336_v14 = vstv %s4132_s12 }
0x219d   :  { %4250 = vrsqrt.f32 %v2336_v14  ;;  %vm2344_vm0 = vcmp.eq.f32.partialorder %v2336_v14, inf  ;;  %v2347_v41 = vand.u32 2147483648, %v2336_v14  ;;  %vm2346_vm15 = vcmp.eq.f32.partialorder %v2336_v14, 0.0 }
0x21a3   :  { %v4251_v18 = vpop.eup %4250 }
0x21a4   :  { %v2338_v23 = vmul.f32 %v4251_v18, %v2336_v14 }
0x21a6   :  { %v2339_v27 = vmul.f32 %v4251_v18, %v2338_v23 }
0x21a8   :  { %v2340_v5 = vmul.f32 0.5, %v2339_v27 }
0x21aa   :  { %v2341_v31 = vsub.f32 1.5, %v2340_v5 }
0x21ac   :  { %v2342_v33 = vmul.f32 %v4251_v18, %v2341_v31 }
0x21ae   :  { %v2343_v37 = vmul.f32 %v2342_v33, %v2336_v14 }
0x21b0   :  { %v2345_v44 = vsel %vm2344_vm0, %v2336_v14, %v2343_v37  ;;  %vm5900_vm0 = vmmov %vm5897_vm13 }
0x21b1   :  { %v2348_v51 = vsel %vm2346_vm15, %v2347_v41, %v2345_v44  ;;  %vm5901_vm15 = vmmov %vm5899_vm6 }
0x21b2   :  { %4133 = vpush %v2348_v51 }
0x21e3   :  { %s5277_s0 = spop %4133 }
0x21e4   :  { %s2355_s21 = sadd.f32 1.1920929e-07, %s5277_s0  ;;  %p2350_p8 = scmp.ge.f32.partialorder %s5277_s0, 0.0001  ;;  %v2406_v23 = vstv %s5277_s0 }
0x21e5   :  { %v2407_v33 = vmul.f32 %v2406_v23, %v5260_v56 }
0x21e6   :  { %v2356_v9 = vstv %s2355_s21  ;;  %s2351_s11 = scalar_select %p2350_p8, 1, 0 }
0x21e7   :  { %4252 = vrcp.f32 %v2356_v9  ;;  %v2368_v12 = vand.u32 2147483648, %v2356_v9  ;;  %v2366_v40 = vand.u32 2147483647, %v2356_v9  ;;  %vm2362_vm8 = vweird.f32 %v2356_v9 }
0x21e8   :  { %s5281_s8 = scvt.s32.f32 %s2351_s11 }
0x21e9   :  { %v2369_v34 = vor.u32 1.1754944e-38, %v2368_v12  ;;  %vm2367_vm14 = vcmp.eq.f32.partialorder %v2366_v40, 8.507059e+37 }
0x21ea   :  { %v2353_v58 = vstv %s5281_s8 }
0x21eb   :  { %v2354_v60 = vmul.f32 %v2353_v58, %v2324_v42 }
0x21ed   :  { %v4253_v24 = vpop.eup %4252 }
0x21ee   :  { %v2358_v52 = vmul.f32 %v4253_v24, %v2356_v9  ;;  %vm2363_vm10 = vweird.f32 %v4253_v24 }
0x21ef   :  { %vm2364_vm1 = vmor %vm2362_vm8, %vm2363_vm10 }
0x21f0   :  { %v2359_v54 = vsub.f32 1.0, %v2358_v52  ;;  %vm5902_vm10 = vmmov %vm5899_vm6 }
0x21f2   :  { %v2360_v57 = vmul.f32 %v4253_v24, %v2359_v54 }
0x21f4   :  { %v2361_v35 = vadd.f32 %v4253_v24, %v2360_v57 }
0x21f6   :  { %v2365_v26 = vsel %vm2364_vm1, %v4253_v24, %v2361_v35 }
0x21f7   :  { %v2370_v62 = vsel %vm2367_vm14, %v2369_v34, %v2365_v26 }
0x21f8   :  { %v5286_v45 = vmul.f32 %v2370_v62, %v2354_v60 }
0x21fa   :  { %2387 = vmatpush.msrb.mxu3 %v5286_v45 }
0x21fb   :  { %4022 = vmatmul.msk.f32.vlgmr.msrb.gmra.mxu3 %vm5897_vm13, %v5264_v29 }
0x227e   :  { %v2389_v36 = vpop.f32.mrf.mxu3 }
0x227f   :  { %v2392_v63 = vmul.f32 %v2389_v36, %v5286_v45 }
0x2281   :  { %v2393_v0 = vsel %vm5898_vm11, %v2392_v63, 0.0 }
0x2282   :  { %2394 = vadd.xlane.f32.xlu0 %v2393_v0 }
0x22f5   :  { %v2395_v55 = vpop.xlane.xlu0 %2394 }
0x22f6   :  { %v2396_v42 = vrot.slane %v2395_v55, 4 }
0x22f8   :  { %v2397_v3 = vadd.f32 %v2396_v42, %v2395_v55 }
0x22fa   :  { %v2398_v8 = vrot.slane %v2397_v3, 2 }
0x22fc   :  { %v2399_v4 = vadd.f32 %v2398_v8, %v2397_v3 }
0x22fe   :  { %v2400_v14 = vrot.slane %v2399_v4, 1 }
0x2300   :  { %v2401_v18 = vadd.f32 %v2400_v14, %v2399_v4 }
0x2302   :  { %4135 = vpush %v2401_v18 }
0x2333   :  { %s5295_s17 = spop %4135 }
0x2334   :  { %v2403_v27 = vstv %s5295_s17 }
0x2335   :  { %v2404_v5 = vmul.f32 %v2403_v27, %v5286_v45 }
0x2337   :  { %v2405_v31 = vsub.f32 %v2389_v36, %v2404_v5 }
0x2339   :  { %v2408_v37 = vsub.f32 %v2405_v31, %v2407_v33 }
0x233b   :  { %v2409_v41 = vmul.f32 %v2408_v37, %v2408_v37 }
0x233d   :  { %v2410_v44 = vsel %vm5899_vm6, %v2409_v41, 0.0 }
0x233e   :  { %2411 = vadd.xlane.f32.xlu0 %v2410_v44 }
0x23b1   :  { %v2412_v51 = vpop.xlane.xlu0 %2411 }
0x23b2   :  { %v2413_v9 = vrot.slane %v2412_v51, 4 }
0x23b4   :  { %v2414_v24 = vadd.f32 %v2413_v9, %v2412_v51 }
0x23b6   :  { %v2415_v52 = vrot.slane %v2414_v24, 2 }
0x23b8   :  { %v2416_v54 = vadd.f32 %v2415_v52, %v2414_v24 }
0x23ba   :  { %v2417_v12 = vrot.slane %v2416_v54, 1 }
0x23bc   :  { %v2418_v57 = vadd.f32 %v2417_v12, %v2416_v54 }
0x23be   :  { %4137 = vpush %v2418_v57 }
0x23ef   :  { %s4138_s28 = spop %4137 }
0x23f0   :  { %v2420_v40 = vstv %s4138_s28 }
0x23f1   :  { %4254 = vrsqrt.f32 %v2420_v40  ;;  %vm2428_vm2 = vcmp.eq.f32.partialorder %v2420_v40, inf  ;;  %v2431_v0 = vand.u32 2147483648, %v2420_v40  ;;  %vm2430_vm9 = vcmp.eq.f32.partialorder %v2420_v40, 0.0 }
0x23f7   :  { %v4255_v35 = vpop.eup %4254 }
0x23f8   :  { %v2422_v34 = vmul.f32 %v4255_v35, %v2420_v40 }
0x23fa   :  { %v2423_v60 = vmul.f32 %v4255_v35, %v2422_v34 }
0x23fc   :  { %v2424_v26 = vmul.f32 0.5, %v2423_v60 }
0x23fe   :  { %v2425_v62 = vsub.f32 1.5, %v2424_v26 }
0x2400   :  { %v2426_v36 = vmul.f32 %v4255_v35, %v2425_v62 }
0x2402   :  { %v2427_v63 = vmul.f32 %v2426_v36, %v2420_v40 }
0x2404   :  { %v2429_v55 = vsel %vm2428_vm2, %v2420_v40, %v2427_v63  ;;  %vm5903_vm2 = vmmov %vm5900_vm0 }
0x2405   :  { %v2432_v42 = vsel %vm2430_vm9, %v2431_v0, %v2429_v55  ;;  %vm5904_vm9 = vmmov %vm5902_vm10 }
0x2406   :  { %4139 = vpush %v2432_v42 }
0x2437   :  { %s5302_s30 = spop %4139 }
0x2438   :  { %p2434_p9 = scmp.ge.f32.partialorder %s5302_s30, 0.0001  ;;  %s2440_s27 = sadd.f32 1.1920929e-07, %s5302_s30  ;;  %v2491_v26 = vstv %s5302_s30 }
0x2439   :  { %v2492_v0 = vmul.f32 %v2491_v26, %v5286_v45 }
0x243a   :  { %v2441_v3 = vstv %s2440_s27  ;;  %s2435_s18 = scalar_select %p2434_p9, 1, 0 }
0x243b   :  { %4256 = vrcp.f32 %v2441_v3  ;;  %v2453_v18 = vand.u32 2147483648, %v2441_v3  ;;  %v2451_v27 = vand.u32 2147483647, %v2441_v3  ;;  %vm2447_vm7 = vweird.f32 %v2441_v3 }
0x243c   :  { %s2436_s7 = scvt.s32.f32 %s2435_s18 }
0x243d   :  { %v2454_v33 = vor.u32 1.1754944e-38, %v2453_v18  ;;  %vm2452_vm5 = vcmp.eq.f32.partialorder %v2451_v27, 8.507059e+37 }
0x243e   :  { %s5307_s1 = smul.f32 %s2436_s7, %s5281_s8 }
0x2440   :  { %v2438_v5 = vstv %s5307_s1 }
0x2441   :  { %v4257_v8 = vpop.eup %4256  ;;  %v2439_v41 = vmul.f32 %v2438_v5, %v2408_v37 }
0x2442   :  { %v2443_v4 = vmul.f32 %v4257_v8, %v2441_v3  ;;  %vm2448_vm3 = vweird.f32 %v4257_v8 }
0x2443   :  { %vm2449_vm12 = vmor %vm2447_vm7, %vm2448_vm3 }
0x2444   :  { %v2444_v14 = vsub.f32 1.0, %v2443_v4  ;;  %vm5905_vm3 = vmmov %vm5904_vm9 }
0x2446   :  { %v2445_v23 = vmul.f32 %v4257_v8, %v2444_v14 }
0x2448   :  { %v2446_v31 = vadd.f32 %v4257_v8, %v2445_v23 }
0x244a   :  { %v2450_v44 = vsel %vm2449_vm12, %v4257_v8, %v2446_v31 }
0x244b   :  { %v2455_v51 = vsel %vm2452_vm5, %v2454_v33, %v2450_v44 }
0x244c   :  { %v5312_v9 = vmul.f32 %v2455_v51, %v2439_v41 }
0x244e   :  { %2472 = vmatpush.msrb.mxu1 %v5312_v9 }
0x244f   :  { %4023 = vmatmul.msk.f32.vlgmr.msrb.gmra.mxu1 %vm5900_vm0, %v5264_v29 }
0x24cc   :  { %v2474_v24 = vpop.f32.mrf.mxu1 }
0x24cd   :  { %v2477_v52 = vmul.f32 %v2474_v24, %v5312_v9 }
0x24cf   :  { %v2478_v54 = vsel %vm5901_vm15, %v2477_v52, 0.0 }
0x24d0   :  { %2479 = vadd.xlane.f32.xlu0 %v2478_v54 }
0x2543   :  { %v2480_v12 = vpop.xlane.xlu0 %2479 }
0x2544   :  { %v2481_v57 = vrot.slane %v2480_v12, 4 }
0x2546   :  { %v2482_v40 = vadd.f32 %v2481_v57, %v2480_v12 }
0x2548   :  { %v2483_v37 = vrot.slane %v2482_v40, 2 }
0x254a   :  { %v2484_v35 = vadd.f32 %v2483_v37, %v2482_v40 }
0x254c   :  { %v2485_v34 = vrot.slane %v2484_v35, 1 }
0x254e   :  { %v2486_v60 = vadd.f32 %v2485_v34, %v2484_v35 }
0x2550   :  { %4141 = vpush %v2486_v60 }
0x2581   :  { %s5319_s14 = spop %4141 }
0x2582   :  { %v2488_v62 = vstv %s5319_s14 }
0x2583   :  { %v2489_v36 = vmul.f32 %v2488_v62, %v5312_v9 }
0x2585   :  { %v2490_v63 = vsub.f32 %v2474_v24, %v2489_v36 }
0x2587   :  { %v2493_v55 = vsub.f32 %v2490_v63, %v2492_v0 }
0x2589   :  { %v2494_v42 = vmul.f32 %v2493_v55, %v2493_v55 }
0x258b   :  { %v2495_v3 = vsel %vm5902_vm10, %v2494_v42, 0.0 }
0x258c   :  { %2496 = vadd.xlane.f32.xlu0 %v2495_v3 }
0x25ff   :  { %v2497_v8 = vpop.xlane.xlu0 %2496 }
0x2600   :  { %v2498_v4 = vrot.slane %v2497_v8, 4 }
0x2602   :  { %v2499_v14 = vadd.f32 %v2498_v4, %v2497_v8 }
0x2604   :  { %v2500_v18 = vrot.slane %v2499_v14, 2 }
0x2606   :  { %v2501_v23 = vadd.f32 %v2500_v18, %v2499_v14 }
0x2608   :  { %v2502_v27 = vrot.slane %v2501_v23, 1 }
0x260a   :  { %v2503_v31 = vadd.f32 %v2502_v27, %v2501_v23 }
0x260c   :  { %4143 = vpush %v2503_v31 }
0x263d   :  { %s4144_s23 = spop %4143 }
0x263e   :  { %v2505_v33 = vstv %s4144_s23 }
0x263f   :  { %4258 = vrsqrt.f32 %v2505_v33  ;;  %vm2513_vm8 = vcmp.eq.f32.partialorder %v2505_v33, inf  ;;  %v2516_v57 = vand.u32 2147483648, %v2505_v33  ;;  %vm2515_vm1 = vcmp.eq.f32.partialorder %v2505_v33, 0.0 }
0x2645   :  { %v4259_v41 = vpop.eup %4258 }
0x2646   :  { %v2507_v44 = vmul.f32 %v4259_v41, %v2505_v33 }
0x2648   :  { %v2508_v51 = vmul.f32 %v4259_v41, %v2507_v44 }
0x264a   :  { %v2509_v24 = vmul.f32 0.5, %v2508_v51 }
0x264c   :  { %v2510_v52 = vsub.f32 1.5, %v2509_v24 }
0x264e   :  { %v2511_v54 = vmul.f32 %v4259_v41, %v2510_v52 }
0x2650   :  { %v2512_v12 = vmul.f32 %v2511_v54, %v2505_v33 }
0x2652   :  { %v2514_v40 = vsel %vm2513_vm8, %v2505_v33, %v2512_v12  ;;  %vm5906_vm8 = vmmov %vm5903_vm2 }
0x2653   :  { %v2517_v37 = vsel %vm2515_vm1, %v2516_v57, %v2514_v40  ;;  %vm5907_vm1 = vmmov %vm5905_vm3 }
0x2654   :  { %4145 = vpush %v2517_v37 }
0x2685   :  { %s5326_s29 = spop %4145 }
0x2686   :  { %p2519_p10 = scmp.ge.f32.partialorder %s5326_s29, 0.0001  ;;  %s2525_s19 = sadd.f32 1.1920929e-07, %s5326_s29  ;;  %v2576_v54 = vstv %s5326_s29 }
0x2687   :  { %v2577_v37 = vmul.f32 %v2576_v54, %v5312_v9 }
0x2688   :  { %v2526_v35 = vstv %s2525_s19  ;;  %s2520_s3 = scalar_select %p2519_p10, 1, 0 }
0x2689   :  { %4260 = vrcp.f32 %v2526_v35  ;;  %v2538_v62 = vand.u32 2147483648, %v2526_v35  ;;  %v2536_v63 = vand.u32 2147483647, %v2526_v35  ;;  %vm2532_vm13 = vweird.f32 %v2526_v35 }
0x268a   :  { %s2521_s10 = scvt.s32.f32 %s2520_s3 }
0x268b   :  { %v2539_v3 = vor.u32 1.1754944e-38, %v2538_v62  ;;  %vm2537_vm6 = vcmp.eq.f32.partialorder %v2536_v63, 8.507059e+37 }
0x268c   :  { %s5331_s13 = smul.f32 %s2521_s10, %s5307_s1 }
0x268e   :  { %v2523_v0 = vstv %s5331_s13 }
0x268f   :  { %v4261_v34 = vpop.eup %4260  ;;  %v2524_v8 = vmul.f32 %v2523_v0, %v2493_v55 }
0x2690   :  { %v2528_v60 = vmul.f32 %v4261_v34, %v2526_v35  ;;  %vm2533_vm14 = vweird.f32 %v4261_v34 }
0x2691   :  { %vm2534_vm11 = vmor %vm2532_vm13, %vm2533_vm14 }
0x2692   :  { %v2529_v26 = vsub.f32 1.0, %v2528_v60  ;;  %vm5908_vm14 = vmmov %vm5907_vm1 }
0x2694   :  { %v2530_v36 = vmul.f32 %v4261_v34, %v2529_v26 }
0x2696   :  { %v2531_v42 = vadd.f32 %v4261_v34, %v2530_v36 }
0x2698   :  { %v2535_v4 = vsel %vm2534_vm11, %v4261_v34, %v2531_v42 }
0x2699   :  { %v2540_v14 = vsel %vm2537_vm6, %v2539_v3, %v2535_v4 }
0x269a   :  { %v5336_v18 = vmul.f32 %v2540_v14, %v2524_v8 }
0x269c   :  { %2557 = vmatpush.msra.mxu0 %v5336_v18 }
0x269d   :  { %4024 = vmatmul.msk.f32.vlgmr.msra.gmra.mxu0 %vm5903_vm2, %v5264_v29 }
0x271a   :  { %v2559_v23 = vpop.f32.mrf.mxu0 }
0x271b   :  { %v2562_v27 = vmul.f32 %v2559_v23, %v5336_v18 }
0x271d   :  { %v2563_v31 = vsel %vm5904_vm9, %v2562_v27, 0.0 }
0x271e   :  { %2564 = vadd.xlane.f32.xlu2 %v2563_v31 }
0x2791   :  { %v2565_v33 = vpop.xlane.xlu2 %2564 }
0x2792   :  { %v2566_v41 = vrot.slane %v2565_v33, 4 }
0x2794   :  { %v2567_v44 = vadd.f32 %v2566_v41, %v2565_v33 }
0x2796   :  { %v2568_v55 = vrot.slane %v2567_v44, 2 }
0x2798   :  { %v2569_v51 = vadd.f32 %v2568_v55, %v2567_v44 }
0x279a   :  { %v2570_v24 = vrot.slane %v2569_v51, 1 }
0x279c   :  { %v2571_v52 = vadd.f32 %v2570_v24, %v2569_v51 }
0x279e   :  { %4147 = vpush %v2571_v52 }
0x27cf   :  { %s5343_s25 = spop %4147 }
0x27d0   :  { %v2573_v12 = vstv %s5343_s25 }
0x27d1   :  { %v2574_v57 = vmul.f32 %v2573_v12, %v5336_v18 }
0x27d3   :  { %v2575_v40 = vsub.f32 %v2559_v23, %v2574_v57 }
0x27d5   :  { %v2578_v35 = vsub.f32 %v2575_v40, %v2577_v37 }
0x27d7   :  { %v2579_v34 = vmul.f32 %v2578_v35, %v2578_v35 }
0x27d9   :  { %v2580_v60 = vsel %vm5905_vm3, %v2579_v34, 0.0 }
0x27da   :  { %2581 = vadd.xlane.f32.xlu0 %v2580_v60 }
0x284d   :  { %v2582_v26 = vpop.xlane.xlu0 %2581 }
0x284e   :  { %v2583_v62 = vrot.slane %v2582_v26, 4 }
0x2850   :  { %v2584_v36 = vadd.f32 %v2583_v62, %v2582_v26 }
0x2852   :  { %v2585_v63 = vrot.slane %v2584_v36, 2 }
0x2854   :  { %v2586_v42 = vadd.f32 %v2585_v63, %v2584_v36 }
0x2856   :  { %v2587_v3 = vrot.slane %v2586_v42, 1 }
0x2858   :  { %v2588_v8 = vadd.f32 %v2587_v3, %v2586_v42 }
0x285a   :  { %4149 = vpush %v2588_v8 }
0x288b   :  { %s4150_s15 = spop %4149 }
0x288c   :  { %v2590_v4 = vstv %s4150_s15 }
0x288d   :  { %4262 = vrsqrt.f32 %v2590_v4  ;;  %vm2598_vm7 = vcmp.eq.f32.partialorder %v2590_v4, inf  ;;  %v2601_v55 = vand.u32 2147483648, %v2590_v4  ;;  %vm2600_vm12 = vcmp.eq.f32.partialorder %v2590_v4, 0.0 }
0x2893   :  { %v4263_v14 = vpop.eup %4262 }
0x2894   :  { %v2592_v23 = vmul.f32 %v4263_v14, %v2590_v4 }
0x2896   :  { %v2593_v27 = vmul.f32 %v4263_v14, %v2592_v23 }
0x2898   :  { %v2594_v31 = vmul.f32 0.5, %v2593_v27 }
0x289a   :  { %v2595_v33 = vsub.f32 1.5, %v2594_v31 }
0x289c   :  { %v2596_v41 = vmul.f32 %v4263_v14, %v2595_v33 }
0x289e   :  { %v2597_v44 = vmul.f32 %v2596_v41, %v2590_v4 }
0x28a0   :  { %v2599_v51 = vsel %vm2598_vm7, %v2590_v4, %v2597_v44  ;;  %vm5909_vm7 = vmmov %vm5906_vm8 }
0x28a1   :  { %v2602_v24 = vsel %vm2600_vm12, %v2601_v55, %v2599_v51  ;;  %vm5910_vm12 = vmmov %vm5907_vm1 }
0x28a2   :  { %4151 = vpush %v2602_v24 }
0x28d3   :  { %s5350_s22 = spop %4151 }
0x28d4   :  { %p2604_p11 = scmp.ge.f32.partialorder %s5350_s22, 0.0001  ;;  %s2610_s16 = sadd.f32 1.1920929e-07, %s5350_s22  ;;  %v2661_v55 = vstv %s5350_s22 }
0x28d6   :  { %v2611_v52 = vstv %s2610_s16  ;;  %s2605_s12 = scalar_select %p2604_p11, 1, 0 }
0x28d7   :  { %4264 = vrcp.f32 %v2611_v52  ;;  %v2623_v40 = vand.u32 2147483648, %v2611_v52  ;;  %v2621_v34 = vand.u32 2147483647, %v2611_v52  ;;  %vm2617_vm0 = vweird.f32 %v2611_v52 }
0x28d8   :  { %s2606_s21 = scvt.s32.f32 %s2605_s12 }
0x28d9   :  { %v2624_v62 = vor.u32 1.1754944e-38, %v2623_v40  ;;  %vm2622_vm10 = vcmp.eq.f32.partialorder %v2621_v34, 8.507059e+37 }
0x28da   :  { %s5355_s11 = smul.f32 %s2606_s21, %s5331_s13 }
0x28dc   :  { %v2608_v60 = vstv %s5355_s11  ;;  %s2960_s26 = smul.f32 %s5343_s25, %s5355_s11 }
0x28dd   :  { %v4265_v54 = vpop.eup %4264  ;;  %v2609_v36 = vmul.f32 %v2608_v60, %v2578_v35 }
0x28de   :  { %v2613_v12 = vmul.f32 %v4265_v54, %v2611_v52  ;;  %vm2618_vm5 = vweird.f32 %v4265_v54 }
0x28df   :  { %vm2619_vm15 = vmor %vm2617_vm0, %vm2618_vm5 }
0x28e0   :  { %v2614_v57 = vsub.f32 1.0, %v2613_v12  ;;  %vm5911_vm5 = vmmov %vm5907_vm1 }
0x28e2   :  { %v2615_v37 = vmul.f32 %v4265_v54, %v2614_v57 }
0x28e4   :  { %v2616_v26 = vadd.f32 %v4265_v54, %v2615_v37 }
0x28e6   :  { %v2620_v63 = vsel %vm2619_vm15, %v4265_v54, %v2616_v26  ;;  %v2662_v54 = vmul.f32 %v2661_v55, %v5336_v18 }
0x28e7   :  { %v2625_v42 = vsel %vm2622_vm10, %v2624_v62, %v2620_v63 }
0x28e8   :  { %v5360_v3 = vmul.f32 %v2625_v42, %v2609_v36 }
0x28ea   :  { %2642 = vmatpush.msra.mxu2 %v5360_v3 }
0x28eb   :  { %4025 = vmatmul.msk.f32.vlgmr.msra.gmra.mxu2 %vm5906_vm8, %v5264_v29 }
0x296e   :  { %v2644_v8 = vpop.f32.mrf.mxu2 }
0x296f   :  { %v2647_v4 = vmul.f32 %v2644_v8, %v5360_v3 }
0x2971   :  { %v2648_v14 = vsel %vm5907_vm1, %v2647_v4, 0.0 }
0x2972   :  { %2649 = vadd.xlane.f32.xlu0 %v2648_v14 }
0x29e5   :  { %v2650_v23 = vpop.xlane.xlu0 %2649 }
0x29e6   :  { %v2651_v27 = vrot.slane %v2650_v23, 4 }
0x29e8   :  { %v2652_v31 = vadd.f32 %v2651_v27, %v2650_v23 }
0x29ea   :  { %v2653_v35 = vrot.slane %v2652_v31, 2 }
0x29ec   :  { %v2654_v33 = vadd.f32 %v2653_v35, %v2652_v31 }
0x29ee   :  { %v2655_v41 = vrot.slane %v2654_v33, 1 }
0x29f0   :  { %v2656_v44 = vadd.f32 %v2655_v41, %v2654_v33 }
0x29f2   :  { %4153 = vpush %v2656_v44 }
0x2a23   :  { %s5367_s28 = spop %4153 }
0x2a24   :  { %v2658_v51 = vstv %s5367_s28 }
0x2a25   :  { %v2659_v24 = vmul.f32 %v2658_v51, %v5360_v3 }
0x2a27   :  { %v2660_v52 = vsub.f32 %v2644_v8, %v2659_v24 }
0x2a29   :  { %v2663_v12 = vsub.f32 %v2660_v52, %v2662_v54 }
0x2a2b   :  { %v2664_v57 = vmul.f32 %v2663_v12, %v2663_v12 }
0x2a2d   :  { %v2665_v40 = vsel %vm5908_vm14, %v2664_v57, 0.0 }
0x2a2e   :  { %2666 = vadd.xlane.f32.xlu0 %v2665_v40 }
0x2aa1   :  { %v2667_v37 = vpop.xlane.xlu0 %2666 }
0x2aa2   :  { %v2668_v34 = vrot.slane %v2667_v37, 4 }
0x2aa4   :  { %v2669_v26 = vadd.f32 %v2668_v34, %v2667_v37 }
0x2aa6   :  { %v2670_v62 = vrot.slane %v2669_v26, 2 }
0x2aa8   :  { %v2671_v36 = vadd.f32 %v2670_v62, %v2669_v26 }
0x2aaa   :  { %v2672_v63 = vrot.slane %v2671_v36, 1 }
0x2aac   :  { %v2673_v42 = vadd.f32 %v2672_v63, %v2671_v36 }
0x2aae   :  { %4155 = vpush %v2673_v42 }
0x2adf   :  { %s4156_s27 = spop %4155 }
0x2ae0   :  { %v2675_v4 = vstv %s4156_s27 }
0x2ae1   :  { %4266 = vrsqrt.f32 %v2675_v4  ;;  %vm2683_vm13 = vcmp.eq.f32.partialorder %v2675_v4, inf  ;;  %v2686_v41 = vand.u32 2147483648, %v2675_v4  ;;  %vm2685_vm11 = vcmp.eq.f32.partialorder %v2675_v4, 0.0 }
0x2ae7   :  { %v4267_v14 = vpop.eup %4266 }
0x2ae8   :  { %v2677_v8 = vmul.f32 %v4267_v14, %v2675_v4 }
0x2aea   :  { %v2678_v23 = vmul.f32 %v4267_v14, %v2677_v8 }
0x2aec   :  { %v2679_v27 = vmul.f32 0.5, %v2678_v23 }
0x2aee   :  { %v2680_v31 = vsub.f32 1.5, %v2679_v27 }
0x2af0   :  { %v2681_v35 = vmul.f32 %v4267_v14, %v2680_v31 }
0x2af2   :  { %v2682_v33 = vmul.f32 %v2681_v35, %v2675_v4 }
0x2af4   :  { %v2684_v44 = vsel %vm2683_vm13, %v2675_v4, %v2682_v33  ;;  %vm5912_vm13 = vmmov %vm5909_vm7 }
0x2af5   :  { %v2687_v55 = vsel %vm2685_vm11, %v2686_v41, %v2684_v44  ;;  %vm5913_vm11 = vmmov %vm5911_vm5 }
0x2af6   :  { %4157 = vpush %v2687_v55 }
0x2b27   :  { %s5374_s18 = spop %4157 }
0x2b28   :  { %p2689_p12 = scmp.ge.f32.partialorder %s5374_s18, 0.0001  ;;  %s2695_s7 = sadd.f32 1.1920929e-07, %s5374_s18  ;;  %v2746_v55 = vstv %s5374_s18 }
0x2b2a   :  { %v2696_v51 = vstv %s2695_s7  ;;  %s2690_s23 = scalar_select %p2689_p12, 1, 0 }
0x2b2b   :  { %4268 = vrcp.f32 %v2696_v51  ;;  %v2708_v57 = vand.u32 2147483648, %v2696_v51  ;;  %v2706_v37 = vand.u32 2147483647, %v2696_v51  ;;  %vm2702_vm2 = vweird.f32 %v2696_v51 }
0x2b2c   :  { %s2691_s19 = scvt.s32.f32 %s2690_s23 }
0x2b2d   :  { %v2709_v62 = vor.u32 1.1754944e-38, %v2708_v57  ;;  %vm2707_vm3 = vcmp.eq.f32.partialorder %v2706_v37, 8.507059e+37 }
0x2b2e   :  { %s5379_s3 = smul.f32 %s2691_s19, %s5355_s11 }
0x2b30   :  { %v2693_v34 = vstv %s5379_s3  ;;  %s2964_s20 = smul.f32 %s5367_s28, %s5379_s3 }
0x2b31   :  { %v4269_v24 = vpop.eup %4268  ;;  %v2694_v36 = vmul.f32 %v2693_v34, %v2663_v12 }
0x2b32   :  { %v2698_v52 = vmul.f32 %v4269_v24, %v2696_v51  ;;  %vm2703_vm6 = vweird.f32 %v4269_v24 }
0x2b33   :  { %vm2704_vm9 = vmor %vm2702_vm2, %vm2703_vm6 }
0x2b34   :  { %v2699_v54 = vsub.f32 1.0, %v2698_v52  ;;  %vm5914_vm6 = vmmov %vm5911_vm5 }
0x2b36   :  { %v2700_v40 = vmul.f32 %v4269_v24, %v2699_v54  ;;  %v2747_v54 = vmul.f32 %v2746_v55, %v5360_v3 }
0x2b38   :  { %v2701_v26 = vadd.f32 %v4269_v24, %v2700_v40 }
0x2b3a   :  { %v2705_v63 = vsel %vm2704_vm9, %v4269_v24, %v2701_v26 }
0x2b3b   :  { %v2710_v42 = vsel %vm2707_vm3, %v2709_v62, %v2705_v63 }
0x2b3c   :  { %v5384_v4 = vmul.f32 %v2710_v42, %v2694_v36 }
0x2b3e   :  { %2727 = vmatpush.msra.mxu3 %v5384_v4 }
0x2b3f   :  { %4026 = vmatmul.msk.f32.vlgmr.msra.gmra.mxu3 %vm5909_vm7, %v5264_v29 }
0x2bc2   :  { %v2729_v14 = vpop.f32.mrf.mxu3 }
0x2bc3   :  { %v2732_v8 = vmul.f32 %v2729_v14, %v5384_v4 }
0x2bc5   :  { %v2733_v23 = vsel %vm5910_vm12, %v2732_v8, 0.0 }
0x2bc6   :  { %2734 = vadd.xlane.f32.xlu0 %v2733_v23 }
0x2c39   :  { %v2735_v27 = vpop.xlane.xlu0 %2734 }
0x2c3a   :  { %v2736_v31 = vrot.slane %v2735_v27, 4 }
0x2c3c   :  { %v2737_v35 = vadd.f32 %v2736_v31, %v2735_v27 }
0x2c3e   :  { %v2738_v12 = vrot.slane %v2737_v35, 2 }
0x2c40   :  { %v2739_v33 = vadd.f32 %v2738_v12, %v2737_v35 }
0x2c42   :  { %v2740_v41 = vrot.slane %v2739_v33, 1 }
0x2c44   :  { %v2741_v44 = vadd.f32 %v2740_v41, %v2739_v33 }
0x2c46   :  { %4159 = vpush %v2741_v44 }
0x2c77   :  { %s5391_s10 = spop %4159 }
0x2c78   :  { %v2743_v51 = vstv %s5391_s10 }
0x2c79   :  { %v2744_v24 = vmul.f32 %v2743_v51, %v5384_v4 }
0x2c7b   :  { %v2745_v52 = vsub.f32 %v2729_v14, %v2744_v24 }
0x2c7d   :  { %v2748_v57 = vsub.f32 %v2745_v52, %v2747_v54 }
0x2c7f   :  { %v2749_v40 = vmul.f32 %v2748_v57, %v2748_v57 }
0x2c81   :  { %v2750_v37 = vsel %vm5911_vm5, %v2749_v40, 0.0 }
0x2c82   :  { %2751 = vadd.xlane.f32.xlu0 %v2750_v37 }
0x2cf5   :  { %v2752_v26 = vpop.xlane.xlu0 %2751 }
0x2cf6   :  { %v2753_v62 = vrot.slane %v2752_v26, 4 }
0x2cf8   :  { %v2754_v36 = vadd.f32 %v2753_v62, %v2752_v26 }
0x2cfa   :  { %v2755_v63 = vrot.slane %v2754_v36, 2 }
0x2cfc   :  { %v2756_v42 = vadd.f32 %v2755_v63, %v2754_v36 }
0x2cfe   :  { %v2757_v8 = vrot.slane %v2756_v42, 1 }
0x2d00   :  { %v2758_v23 = vadd.f32 %v2757_v8, %v2756_v42 }
0x2d02   :  { %4161 = vpush %v2758_v23 }
0x2d33   :  { %s4162_s15 = spop %4161 }
0x2d34   :  { %v2760_v27 = vstv %s4162_s15 }
0x2d35   :  { %4270 = vrsqrt.f32 %v2760_v27  ;;  %vm2768_vm0 = vcmp.eq.f32.partialorder %v2760_v27, inf  ;;  %v2771_v55 = vand.u32 2147483648, %v2760_v27  ;;  %vm2770_vm15 = vcmp.eq.f32.partialorder %v2760_v27, 0.0 }
0x2d3b   :  { %v4271_v31 = vpop.eup %4270 }
0x2d3c   :  { %v2762_v14 = vmul.f32 %v4271_v31, %v2760_v27 }
0x2d3e   :  { %v2763_v35 = vmul.f32 %v4271_v31, %v2762_v14 }
0x2d40   :  { %v2764_v12 = vmul.f32 0.5, %v2763_v35 }
0x2d42   :  { %v2765_v33 = vsub.f32 1.5, %v2764_v12 }
0x2d44   :  { %v2766_v41 = vmul.f32 %v4271_v31, %v2765_v33 }
0x2d46   :  { %v2767_v44 = vmul.f32 %v2766_v41, %v2760_v27 }
0x2d48   :  { %v2769_v51 = vsel %vm2768_vm0, %v2760_v27, %v2767_v44  ;;  %vm5915_vm0 = vmmov %vm5912_vm13 }
0x2d49   :  { %v2772_v24 = vsel %vm2770_vm15, %v2771_v55, %v2769_v51  ;;  %vm5916_vm15 = vmmov %vm5914_vm6 }
0x2d4a   :  { %4163 = vpush %v2772_v24 }
0x2d7b   :  { %s5398_s16 = spop %4163 }
0x2d7c   :  { %p2774_p13 = scmp.ge.f32.partialorder %s5398_s16, 0.0001  ;;  %s2780_s12 = sadd.f32 1.1920929e-07, %s5398_s16 }
0x2d7e   :  { %v2781_v52 = vstv %s2780_s12  ;;  %s2775_s21 = scalar_select %p2774_p13, 1, 0 }
0x2d7f   :  { %4272 = vrcp.f32 %v2781_v52  ;;  %v2793_v26 = vand.u32 2147483648, %v2781_v52  ;;  %v2791_v36 = vand.u32 2147483647, %v2781_v52  ;;  %vm2787_vm8 = vweird.f32 %v2781_v52 }
0x2d80   :  { %s2776_s27 = scvt.s32.f32 %s2775_s21 }
0x2d81   :  { %v2794_v8 = vor.u32 1.1754944e-38, %v2793_v26  ;;  %vm2792_vm14 = vcmp.eq.f32.partialorder %v2791_v36, 8.507059e+37 }
0x2d82   :  { %s5403_s7 = smul.f32 %s2776_s27, %s5379_s3 }
0x2d84   :  { %v2778_v63 = vstv %s5403_s7  ;;  %s2968_s5 = smul.f32 %s5391_s10, %s5403_s7 }
0x2d85   :  { %v4273_v54 = vpop.eup %4272  ;;  %v2779_v23 = vmul.f32 %v2778_v63, %v2748_v57  ;;  %s3000_s25 = smul.f32 %s5398_s16, %s5403_s7 }
0x2d86   :  { %v2783_v40 = vmul.f32 %v4273_v54, %v2781_v52  ;;  %vm2788_vm10 = vweird.f32 %v4273_v54 }
0x2d87   :  { %vm2789_vm1 = vmor %vm2787_vm8, %vm2788_vm10 }
0x2d88   :  { %v2784_v37 = vsub.f32 1.0, %v2783_v40  ;;  %vm5917_vm10 = vmmov %vm5914_vm6 }
0x2d8a   :  { %v2785_v62 = vmul.f32 %v4273_v54, %v2784_v37 }
0x2d8c   :  { %v2786_v42 = vadd.f32 %v4273_v54, %v2785_v62 }
0x2d8e   :  { %v2790_v27 = vsel %vm2789_vm1, %v4273_v54, %v2786_v42  ;;  %v2831_v54 = vstv %s5398_s16 }
0x2d8f   :  { %v2795_v31 = vsel %vm2792_vm14, %v2794_v8, %v2790_v27  ;;  %v2832_v62 = vmul.f32 %v2831_v54, %v5384_v4 }
0x2d90   :  { %v5408_v14 = vmul.f32 %v2795_v31, %v2779_v23 }
0x2d92   :  { %2812 = vmatpush.msra.mxu1 %v5408_v14 }
0x2d93   :  { %4027 = vmatmul.msk.f32.vlgmr.msra.gmra.mxu1 %vm5912_vm13, %v5264_v29 }
0x2e10   :  { %v2814_v35 = vpop.f32.mrf.mxu1 }
0x2e11   :  { %v2817_v12 = vmul.f32 %v2814_v35, %v5408_v14 }
0x2e13   :  { %v2818_v33 = vsel %vm5913_vm11, %v2817_v12, 0.0  ;;  %vm2018_vm11 = vcmask 31744  }
0x2e14   :  { %2819 = vadd.xlane.f32.xlu0 %v2818_v33 }
0x2e87   :  { %v2820_v41 = vpop.xlane.xlu0 %2819 }
0x2e88   :  { %v2821_v44 = vrot.slane %v2820_v41, 4 }
0x2e8a   :  { %v2822_v55 = vadd.f32 %v2821_v44, %v2820_v41 }
0x2e8c   :  { %v2823_v57 = vrot.slane %v2822_v55, 2 }
0x2e8e   :  { %v2824_v51 = vadd.f32 %v2823_v57, %v2822_v55 }
0x2e90   :  { %v2825_v24 = vrot.slane %v2824_v51, 1 }
0x2e92   :  { %v2826_v52 = vadd.f32 %v2825_v24, %v2824_v51 }
0x2e94   :  { %4165 = vpush %v2826_v52 }
0x2ec5   :  { %s5415_s23 = spop %4165 }
0x2ec6   :  { %v2828_v40 = vstv %s5415_s23 }
0x2ec7   :  { %v2829_v37 = vmul.f32 %v2828_v40, %v5408_v14 }
0x2ec9   :  { %v2830_v26 = vsub.f32 %v2814_v35, %v2829_v37 }
0x2ecb   :  { %v2833_v36 = vsub.f32 %v2830_v26, %v2832_v62 }
0x2ecd   :  { %v2834_v42 = vmul.f32 %v2833_v36, %v2833_v36 }
0x2ecf   :  { %v2835_v8 = vsel %vm5914_vm6, %v2834_v42, 0.0 }
0x2ed0   :  { %2836 = vadd.xlane.f32.xlu0 %v2835_v8 }
0x2f43   :  { %v2837_v23 = vpop.xlane.xlu0 %2836 }
0x2f44   :  { %v2838_v27 = vrot.slane %v2837_v23, 4 }
0x2f46   :  { %v2839_v31 = vadd.f32 %v2838_v27, %v2837_v23 }
0x2f48   :  { %v2840_v12 = vrot.slane %v2839_v31, 2 }
0x2f4a   :  { %v2841_v33 = vadd.f32 %v2840_v12, %v2839_v31 }
0x2f4c   :  { %v2842_v41 = vrot.slane %v2841_v33, 1 }
0x2f4e   :  { %v2843_v44 = vadd.f32 %v2842_v41, %v2841_v33 }
0x2f50   :  { %4167 = vpush %v2843_v44 }
0x2f81   :  { %s4168_s19 = spop %4167 }
0x2f82   :  { %v2845_v55 = vstv %s4168_s19 }
0x2f83   :  { %4274 = vrsqrt.f32 %v2845_v55  ;;  %vm2853_vm2 = vcmp.eq.f32.partialorder %v2845_v55, inf  ;;  %v2856_v37 = vand.u32 2147483648, %v2845_v55  ;;  %vm2855_vm9 = vcmp.eq.f32.partialorder %v2845_v55, 0.0 }
0x2f89   :  { %v4275_v57 = vpop.eup %4274 }
0x2f8a   :  { %v2847_v35 = vmul.f32 %v4275_v57, %v2845_v55 }
0x2f8c   :  { %v2848_v51 = vmul.f32 %v4275_v57, %v2847_v35 }
0x2f8e   :  { %v2849_v24 = vmul.f32 0.5, %v2848_v51 }
0x2f90   :  { %v2850_v52 = vsub.f32 1.5, %v2849_v24 }
0x2f92   :  { %v2851_v54 = vmul.f32 %v4275_v57, %v2850_v52 }
0x2f94   :  { %v2852_v40 = vmul.f32 %v2851_v54, %v2845_v55 }
0x2f96   :  { %v2854_v26 = vsel %vm2853_vm2, %v2845_v55, %v2852_v40  ;;  %vm2034_vm2 = vcmask 24576  }
0x2f97   :  { %v2857_v62 = vsel %vm2855_vm9, %v2856_v37, %v2854_v26  ;;  %v3032_v37 = vmul.f32 %v2608_v60, %v5336_v18  ;;  %v3048_v26 = vmul.f32 %v2778_v63, %v5384_v4  ;;  %v4189_v63 = vld [vmem:[#allocation2] ss:$0 sm:$0xff] }
0x2f98   :  { %4169 = vpush %v2857_v62 }
0x2fc9   :  { %s5422_s15 = spop %4169 }
0x2fca   :  { %p2859_p0 = scmp.ge.f32.partialorder %s5422_s15, 0.0001  ;;  %s2865_s12 = sadd.f32 1.1920929e-07, %s5422_s15 }
0x2fcc   :  { %v2866_v42 = vstv %s2865_s12  ;;  %s2860_s21 = scalar_select %p2859_p0, 1, 0 }
0x2fcd   :  { %4276 = vrcp.f32 %v2866_v42  ;;  %v2878_v31 = vand.u32 2147483648, %v2866_v42  ;;  %v2876_v33 = vand.u32 2147483647, %v2866_v42  ;;  %vm2872_vm7 = vweird.f32 %v2866_v42 }
0x2fce   :  { %s2861_s27 = scvt.s32.f32 %s2860_s21 }
0x2fcf   :  { %v2879_v55 = vor.u32 1.1754944e-38, %v2878_v31  ;;  %vm2877_vm5 = vcmp.eq.f32.partialorder %v2876_v33, 8.507059e+37 }
0x2fd0   :  { %s5427_s19 = smul.f32 %s2861_s27, %s5403_s7 }
0x2fd1   :  { %s2952_s27 = smul.f32 %s5295_s17, %s5307_s1 }
0x2fd2   :  { %v2863_v41 = vstv %s5427_s19  ;;  %s2980_s17 = smul.f32 %s5277_s0, %s5281_s8 }
0x2fd3   :  { %v4277_v8 = vpop.eup %4276  ;;  %v2864_v57 = vmul.f32 %v2863_v41, %v2833_v36  ;;  %v3008_v36 = vmul.f32 %v2353_v58, %v5260_v56  ;;  %v2916_v56 = vstv %s5422_s15  ;;  %s2988_s0 = smul.f32 %s5326_s29, %s5331_s13 }
0x2fd4   :  { %v2868_v23 = vmul.f32 %v4277_v8, %v2866_v42  ;;  %vm2873_vm3 = vweird.f32 %v4277_v8  ;;  %v2917_v4 = vmul.f32 %v2916_v56, %v5408_v14  ;;  %s3004_s29 = smul.f32 %s5422_s15, %s5427_s19 }
0x2fd5   :  { %vm2874_vm12 = vmor %vm2872_vm7, %vm2873_vm3 }
0x2fd6   :  { %v2869_v27 = vsub.f32 1.0, %v2868_v23  ;;  %vm5919_vm7 = vmmov %vm5915_vm0 }
0x2fd8   :  { %v2870_v12 = vmul.f32 %v4277_v8, %v2869_v27 }
0x2fda   :  { %v2871_v44 = vadd.f32 %v4277_v8, %v2870_v12 }
0x2fdc   :  { %v2875_v35 = vsel %vm2874_vm12, %v4277_v8, %v2871_v44  ;;  %v1991_v44 = vadd.f32 %v4189_v63, %v5291_v15  ;;  %v3040_v15 = vmul.f32 %v2693_v34, %v5360_v3 }
0x2fdd   :  { %v2880_v51 = vsel %vm2877_vm5, %v2879_v55, %v2875_v35  ;;  %vm5920_vm5 = vmmov %vm5915_vm0 }
0x2fde   :  { %v5430_v24 = vmul.f32 %v2880_v51, %v2864_v57  ;;  %v1993_v57 = vsub.f32 0.0, %v1991_v44 }
0x2fe0   :  { %2897 = vmatpush.msrb.mxu0 %v5430_v24  ;;  %v1994_v35 = vmul.f32 1.442695, %v1993_v57 }
0x2fe1   :  { %4028 = vmatmul.msk.f32.vlgmr.msrb.gmra.mxu0 %vm5915_vm0, %v5264_v29 }
0x2fe2   :  { %4278 = vpow2.f32 %v1994_v35 }
0x2fe8   :  { %v4279_v51 = vpop.eup %4278 }
0x305e   :  { %v2899_v52 = vpop.f32.mrf.mxu0 }
0x305f   :  { %v2902_v54 = vmul.f32 %v2899_v52, %v5430_v24 }
0x3061   :  { %v2903_v40 = vsel %vm5916_vm15, %v2902_v54, 0.0  ;;  %v3016_v54 = vmul.f32 %v2438_v5, %v5286_v45  ;;  %vm5921_vm15 = vmmov %vm5915_vm0 }
0x3062   :  { %2904 = vadd.xlane.f32.xlu1 %v2903_v40  ;;  %v3024_v40 = vmul.f32 %v2523_v0, %v5312_v9 }
0x307b   :  { %3011 = vperm.xlu1 %4184, %v3008_v36  }
0x3083   :  { %3035 = vperm.xlu1 %4184, %v3032_v37  }
0x308b   :  { %3051 = vperm.xlu1 %4184, %v3048_v26  }
0x30d5   :  { %v2905_v29 = vpop.xlane.xlu1 %2904 }
0x30d6   :  { %v2906_v62 = vrot.slane %v2905_v29, 4 }
0x30d8   :  { %v2907_v42 = vadd.f32 %v2906_v62, %v2905_v29  ;;  %v3056_v62 = vmul.f32 %v2863_v41, %v5408_v14 }
0x30da   :  { %v2908_v8 = vrot.slane %v2907_v42, 2 }
0x30dc   :  { %v2909_v23 = vadd.f32 %v2908_v8, %v2907_v42 }
0x30de   :  { %v2910_v27 = vrot.slane %v2909_v23, 1 }
0x30e0   :  { %v2911_v31 = vadd.f32 %v2910_v27, %v2909_v23 }
0x30e2   :  { %4171 = vpush %v2911_v31 }
0x30ed   :  { %v3012_v14 = vpop.permute.xlu1 %3011 }
0x3113   :  { %s5446_s12 = spop %4171 }
0x3114   :  { %v2913_v58 = vstv %s5446_s12 }
0x3115   :  { %v2914_v18 = vmul.f32 %v2913_v58, %v5430_v24 }
0x3117   :  { %v2915_v60 = vsub.f32 %v2899_v52, %v2914_v18  ;;  %v1996_v52 = vadd.f32 1.0, %v4279_v51 }
0x3119   :  { %v2918_v12 = vsub.f32 %v2915_v60, %v2917_v4  ;;  %4280 = vrcp.f32 %v1996_v52  ;;  %v2008_v45 = vand.u32 2147483648, %v1996_v52  ;;  %vm2002_vm1 = vweird.f32 %v1996_v52 }
0x311a   :  { %v2006_v5 = vand.u32 2147483647, %v1996_v52  ;;  %v3014_v60 = vmul.f32 %v4967_v48, %v3012_v14 }
0x311b   :  { %v2919_v33 = vmul.f32 %v2918_v12, %v2918_v12  ;;  %v2009_v9 = vor.u32 1.1754944e-38, %v2008_v45 }
0x311c   :  { %vm2007_vm13 = vcmp.eq.f32.partialorder %v2006_v5, 8.507059e+37 }
0x311d   :  { %v2920_v55 = vsel %vm5917_vm10, %v2919_v33, 0.0  ;;  %v3036_v33 = vpop.permute.xlu1 %3035  ;;  %vm5922_vm10 = vmmov %vm5915_vm0 }
0x311e   :  { %2921 = vadd.xlane.f32.xlu0 %v2920_v55  ;;  %v3038_v55 = vmul.f32 %v4983_v16, %v3036_v33  ;;  %v2953_v33 = vstv %s2952_s27  ;;  %s5947_s27 = sld [smem:[#allocation10_spill]] }
0x311f   :  { %v4281_v36 = vpop.eup %4280 }
0x3120   :  { %v1998_v37 = vmul.f32 %v4281_v36, %v1996_v52  ;;  %vm2003_vm8 = vweird.f32 %v4281_v36 }
0x3121   :  { %vm2004_vm14 = vmor %vm2002_vm1, %vm2003_vm8 }
0x3122   :  { %v1999_v26 = vsub.f32 1.0, %v1998_v37  ;;  %vm5923_vm8 = vmmov %vm5915_vm0 }
0x3123   :  { %vm5924_vm1 = vmmov %vm5915_vm0 }
0x3124   :  { %v2000_v29 = vmul.f32 %v4281_v36, %v1999_v26 }
0x3125   :  { %v3052_v52 = vpop.permute.xlu1 %3051 }
0x3126   :  { %v2001_v42 = vadd.f32 %v4281_v36, %v2000_v29 }
0x3128   :  { %v2005_v8 = vsel %vm2004_vm14, %v4281_v36, %v2001_v42  ;;  %vm5925_vm14 = vmmov %vm5915_vm0 }
0x3129   :  { %v2010_v0 = vsel %vm2007_vm13, %v2009_v9, %v2005_v8  ;;  %vm5926_vm13 = vmmov %vm5915_vm0 }
0x3132   :  { %3019 = vperm.xlu0 %4183, %v3016_v54  }
0x313a   :  { %3027 = vperm.xlu0 %4183, %v3024_v40   ;;  %v4322_v40 = vmov 8.0  }
0x313b   :  { %4282 = vrcp.f32 %v4322_v40 }
0x3142   :  { %3043 = vperm.xlu0 %4183, %v3040_v15   ;;  %v4283_v15 = vpop.eup %4282 }
0x3143   :  { %v2027_v26 = vmul.f32 8.0, %v4283_v15  ;;  %vm2031_vm6 = vweird.f32 %v4283_v15 }
0x3145   :  { %v2028_v42 = vsub.f32 1.0, %v2027_v26 }
0x3147   :  { %v2029_v5 = vmul.f32 %v4283_v15, %v2028_v42 }
0x3149   :  { %v2030_v9 = vadd.f32 %v4283_v15, %v2029_v5 }
0x314a   :  { %3059 = vperm.xlu0 %4183, %v3056_v62  }
0x3152   :  { %2014 = vperm.xlu0 %4183, %v2010_v0  }
0x3191   :  { %v2922_v23 = vpop.xlane.xlu0 %2921 }
0x3192   :  { %v2923_v27 = vrot.slane %v2922_v23, 4 }
0x3194   :  { %v2924_v3 = vadd.f32 %v2923_v27, %v2922_v23 }
0x3196   :  { %v2925_v34 = vrot.slane %v2924_v3, 2 }
0x3198   :  { %v2926_v31 = vadd.f32 %v2925_v34, %v2924_v3  ;;  %v5478_v3 = vsel %vm2031_vm6, %v4283_v15, %v2030_v9  ;;  %vm5927_vm6 = vmmov %vm5915_vm0 }
0x319a   :  { %v2927_v56 = vrot.slane %v2926_v31, 1 }
0x319c   :  { %v2928_v58 = vadd.f32 %v2927_v56, %v2926_v31 }
0x319e   :  { %4173 = vpush %v2928_v58 }
0x31a4   :  { %v3020_v41 = vpop.permute.xlu0 %3019 }
0x31a5   :  { %v3022_v18 = vmul.f32 %v4962_v46, %v3020_v41  ;;  %v3054_v46 = vmul.f32 %v4998_v21, %v3052_v52  ;;  %v2965_v52 = vstv %s2964_s20  ;;  %s2984_s20 = smul.f32 %s5302_s30, %s5307_s1 }
0x31a6   :  { %s2992_s30 = smul.f32 %s5350_s22, %s5355_s11  ;;  %s3074_s22 = sadd.f32 %s5307_s1, %s5281_s8 }
0x31a7   :  { %v3023_v63 = vadd.f32 %v3022_v18, %v3014_v60  ;;  %v2985_v42 = vstv %s2984_s20 }
0x31a8   :  { %s3075_s28 = sadd.f32 %s3074_s22, %s5331_s13 }
0x31a9   :  { %s5937_s22 = sld [smem:[#allocation9_spill]] }
0x31ac   :  { %v3028_v4 = vpop.permute.xlu0 %3027 }
0x31ad   :  { %v3030_v12 = vmul.f32 %v4972_v49, %v3028_v4  ;;  %v4188_v49 = vld [vmem:[%s5918_s24] ss:$0 sm:$0xff]  ;;  %s2956_s24 = smul.f32 %s5319_s14, %s5331_s13 }
0x31ae   :  { %s2996_s14 = smul.f32 %s5374_s18, %s5379_s3  ;;  %s3076_s18 = sadd.f32 %s3075_s28, %s5355_s11 }
0x31af   :  { %v3031_v44 = vadd.f32 %v3030_v12, %v3023_v63 }
0x31b0   :  { %s3077_s10 = sadd.f32 %s3076_s18, %s5379_s3 }
0x31b1   :  { %v3039_v35 = vadd.f32 %v3038_v55, %v3031_v44  ;;  %v2957_v55 = vstv %s2956_s24  ;;  %s5946_s18 = sld [smem:[#allocation13_spill]] }
0x31b2   :  { %s3078_s16 = sadd.f32 %s3077_s10, %s5403_s7 }
0x31b4   :  { %v3044_v57 = vpop.permute.xlu0 %3043 }
0x31b5   :  { %v3046_v51 = vmul.f32 %v4988_v53, %v3044_v57  ;;  %v1963_v53 = vadd.f32 %v4188_v49, %v5268_v17  ;;  %v2954_v57 = vmul.f32 %v4681_v10, %v2953_v33  ;;  %v2969_v10 = vstv %s2968_s5  ;;  %v3313_v33 = vld [vmem:[%s5764_s4 + $0x10] sm:$0xff] }
0x31b7   :  { %v3047_v54 = vadd.f32 %v3046_v51, %v3039_v35  ;;  %v2961_v35 = vstv %s2960_s26 }
0x31b9   :  { %v3055_v48 = vadd.f32 %v3054_v46, %v3047_v54  ;;  %v2958_v54 = vmul.f32 %v4708_v19, %v2957_v55  ;;  %v2962_v46 = vmul.f32 %v4724_v30, %v2961_v35 }
0x31bc   :  { %v3060_v36 = vpop.permute.xlu0 %3059 }
0x31bd   :  { %v3062_v37 = vmul.f32 %v5006_v28, %v3060_v36 }
0x31bf   :  { %v5474_v16 = vadd.f32 %v3062_v37, %v3055_v48  ;;  %v2970_v37 = vmul.f32 %v4762_v43, %v2969_v10  ;;  %v2981_v43 = vstv %s2980_s17 }
0x31c4   :  { %v2015_v29 = vpop.permute.xlu0 %2014 }
0x31c5   :  { %v2017_v62 = vmul.f32 %v2015_v29, %v1963_v53 }
0x31c7   :  { %v2019_v21 = vsel %vm2018_vm11, %v2017_v62, 0.0 }
0x31c8   :  { %v2020_v45 = vrot.slane %v2019_v21, 4 }
0x31ca   :  { %v2021_v8 = vadd.f32 %v2020_v45, %v2019_v21  ;;  %v2989_v45 = vstv %s2988_s0 }
0x31cc   :  { %v2022_v28 = vrot.slane %v2021_v8, 2 }
0x31ce   :  { %v2023_v0 = vadd.f32 %v2022_v28, %v2021_v8  ;;  %v2993_v8 = vstv %s2992_s30  ;;  %v2990_v28 = vmul.f32 %v4900_v25, %v2989_v45  ;;  %v3677_v45 = vld [vmem:[%s5937_s22 + $0x68] sm:$0xff] }
0x31cf   :  { %s4174_s21 = spop %4173 }
0x31d0   :  { %v2024_v23 = vrot.slane %v2023_v0, 1  ;;  %v2930_v27 = vstv %s4174_s21  ;;  %s2948_s21 = smul.f32 %s5272_s9, %s5281_s8 }
0x31d1   :  { %4284 = vrsqrt.f32 %v2930_v27  ;;  %vm2938_vm9 = vcmp.eq.f32.partialorder %v2930_v27, inf  ;;  %v2941_v4 = vand.u32 2147483648, %v2930_v27  ;;  %vm2940_vm3 = vcmp.eq.f32.partialorder %v2930_v27, 0.0  ;;  %s2972_s9 = smul.f32 %s5415_s23, %s5427_s19  ;;  %s3079_s23 = sadd.f32 %s3078_s16, %s5427_s19 }
0x31d2   :  { %v2025_v17 = vadd.f32 %v2024_v23, %v2023_v0  ;;  %v2949_v44 = vstv %s2948_s21  ;;  %v2997_v0 = vstv %s2996_s14  ;;  %v3001_v23 = vstv %s3000_s25 }
0x31d3   :  { %v2950_v51 = vmul.f32 %v4692_v13, %v2949_v44  ;;  %v2966_v13 = vmul.f32 %v4754_v38, %v2965_v52  ;;  %v2973_v48 = vstv %s2972_s9  ;;  %v3002_v25 = vmul.f32 %v4950_v20, %v3001_v23  ;;  %v3707_v23 = vld [vmem:[%s5937_s22 + $0x98] sm:$0xff] }
0x31d4   :  { %v2033_v34 = vmul.f32 %v5478_v3, %v2025_v17  ;;  %v2974_v15 = vmul.f32 %v4778_v47, %v2973_v48  ;;  %v2982_v47 = vmul.f32 %v4850_v59, %v2981_v43  ;;  %v3005_v17 = vstv %s3004_s29  ;;  %v3483_v48 = vld [vmem:[%s5764_s4 + $0x30] sm:$0xff]  ;;  %v3537_v43 = vld [vmem:[%s5937_s22 + $0x18] sm:$0xff]  ;;  %s5945_s29 = sld [smem:[#allocation11_spill]] }
0x31d5   :  { %v2955_v40 = vadd.f32 %v2954_v57, %v2950_v51  ;;  %v5592_v57 = vld [vmem:[%s5762_s2 + $0x18] sm:$0xff] }
0x31d6   :  { %2035 = vst.msk [vmem:[#allocation3] sm:$0x1] %vm2034_vm2, %v2033_v34 }
0x31d7   :  { %v4285_v31 = vpop.eup %4284  ;;  %v2959_v36 = vadd.f32 %v2958_v54, %v2955_v40 }
0x31d8   :  { %v2932_v56 = vmul.f32 %v4285_v31, %v2930_v27 }
0x31d9   :  { %v2963_v19 = vadd.f32 %v2962_v46, %v2959_v36 }
0x31da   :  { %v2933_v58 = vmul.f32 %v4285_v31, %v2932_v56 }
0x31db   :  { %v2967_v30 = vadd.f32 %v2966_v13, %v2963_v19  ;;  %v5608_v13 = vld [vmem:[%s5762_s2 + $0x28] sm:$0xff] }
0x31dc   :  { %v2934_v14 = vmul.f32 0.5, %v2933_v58 }
0x31dd   :  { %v2971_v49 = vadd.f32 %v2970_v37, %v2967_v30 }
0x31de   :  { %v2935_v41 = vsub.f32 1.5, %v2934_v14 }
0x31df   :  { %v2975_v29 = vadd.f32 %v2974_v15, %v2971_v49  ;;  %v3561_v15 = vld [vmem:[%s5937_s22 + $0x38] sm:$0xff]  ;;  %v3559_v49 = vld [vmem:[%s5937_s22 + $0x28] sm:$0xff] }
0x31e0   :  { %v2936_v18 = vmul.f32 %v4285_v31, %v2935_v41  ;;  %v3006_v31 = vmul.f32 %v4954_v32, %v3005_v17  ;;  %v3676_v17 = vld [vmem:[%s5937_s22 + $0x60] sm:$0xff] }
0x31e2   :  { %v2937_v60 = vmul.f32 %v2936_v18, %v2930_v27 }
0x31e4   :  { %v2939_v63 = vsel %vm2938_vm9, %v2930_v27, %v2937_v60  ;;  %v3361_v60 = vld [vmem:[%s5764_s4 + $0x18] sm:$0xff]  ;;  %vm5928_vm9 = vmmov %vm5915_vm0 }
0x31e5   :  { %v2942_v12 = vsel %vm2940_vm3, %v2941_v4, %v2939_v63  ;;  %v3386_v4 = vld [vmem:[%s5764_s4 + $0x20] sm:$0xff]  ;;  %vm5929_vm3 = vmmov %vm5915_vm0 }
0x31e6   :  { %4175 = vpush %v2942_v12 }
0x3217   :  { %s4176_s6 = spop %4175 }
0x3218   :  { %p2944_p1 = scmp.ge.f32.partialorder %s4176_s6, 0.0001 }
0x321a   :  { %s2945_s24 = scalar_select %p2944_p1, 1, 0 }
0x321c   :  { %s2946_s26 = scvt.s32.f32 %s2945_s24  ;;  %s5948_s24 = sld [smem:[#allocation12_spill]] }
0x321e   :  { %s5505_s6 = smul.f32 %s2946_s26, %s5427_s19  ;;  %s4323_s26 = smov [#allocation3]  }
0x321f   :  { %s3928_s17 = sshll.u32 %s4323_s26, 4  ;;  %s3929_s17 = int_to_ptr.vmem [resolvable:$true] %s3928_s17 }
0x3220   :  { %s2976_s5 = smul.f32 %s5446_s12, %s5505_s6  ;;  %v3064_v38 = vstv %s5505_s6  ;;  %s3080_s15 = sadd.f32 %s3079_s23, %s5505_s6 }
0x3221   :  { %v3065_v26 = vmul.f32 %v3064_v38, %v5430_v24  ;;  %v2986_v24 = vmul.f32 %v4869_v61, %v2985_v42  ;;  %v2998_v61 = vmul.f32 %v4942_v11, %v2997_v0  ;;  %v3560_v38 = vld [vmem:[%s5937_s22 + $0x30] sm:$0xff]  ;;  %v3679_v42 = vld [vmem:[%s5937_s22 + $0x78] sm:$0xff]  ;;  %s5938_s6 = sld [smem:[#allocation8_spill]] }
0x3222   :  { %v2977_v53 = vstv %s2976_s5  ;;  %s5949_s5 = sld [smem:[#allocation14_spill]] }
0x3223   :  { %v2978_v62 = vmul.f32 %v4828_v50, %v2977_v53  ;;  %3068 = vperm.xlu1 %4184, %v3065_v26   ;;  %v2994_v50 = vmul.f32 %v4927_v1, %v2993_v8  ;;  %v3081_v1 = vstv %s3080_s15  ;;  %v3558_v26 = vld [vmem:[%s5937_s22 + $0x20] sm:$0xff]  ;;  %v3536_v53 = vld [vmem:[%s5937_s22 + $0x10] sm:$0xff] }
0x3224   :  { %vm3082_vm12 = vcmp.lt.f32.partialorder %v48_v22, %v3081_v1  ;;  %v5560_v22 = vld [vmem:[%s5762_s2 + $0x8] sm:$0xff]  ;;  %v3628_v1 = vld [vmem:[%s5937_s22 + $0x40] sm:$0xff] }
0x3225   :  { %v2979_v21 = vadd.f32 %v2978_v62, %v2975_v29  ;;  %v4029_v14 = vsel %vm3082_vm12, 1.0, %v4319_v7  ;;  %vm5931_vm12 = vmmov %vm5915_vm0  ;;  %v3535_v29 = vld [vmem:[%s5937_s22 + $0x8] sm:$0xff]  ;;  %v3534_v62 = vld [vmem:[%s5937_s22] sm:$0xff] }
0x3227   :  { %v2983_v5 = vadd.f32 %v2982_v47, %v2979_v21  ;;  %v3678_v47 = vld [vmem:[%s5937_s22 + $0x70] sm:$0xff] }
0x3228   :  { %s3930_s0 = sshll.u32 %s5949_s5, 4  ;;  %s3931_s0 = int_to_ptr.hbm [resolvable:$true] %s3930_s0 }
0x3229   :  { %v2987_v9 = vadd.f32 %v2986_v24, %v2983_v5 }
0x322b   :  { %v2991_v59 = vadd.f32 %v2990_v28, %v2987_v9  ;;  %v4190_v28 = vld [vmem:[%s5938_s6] ss:$0 sm:$0xff] }
0x322d   :  { %v2995_v27 = vadd.f32 %v2994_v50, %v2991_v59 }
0x322f   :  { %v2999_v34 = vadd.f32 %v2998_v61, %v2995_v27  ;;  %v3706_v61 = vld [vmem:[%s5937_s22 + $0x90] sm:$0xff]  ;;  %v3705_v27 = vld [vmem:[%s5937_s22 + $0x88] sm:$0xff] }
0x3231   :  { %v3003_v56 = vadd.f32 %v3002_v25, %v2999_v34  ;;  %v3704_v25 = vld [vmem:[%s5937_s22 + $0x80] sm:$0xff] }
0x3233   :  { %v3007_v58 = vadd.f32 %v3006_v31, %v3003_v56  ;;  %v3631_v31 = vld [vmem:[%s5937_s22 + $0x58] sm:$0xff]  ;;  %v3630_v56 = vld [vmem:[%s5937_s22 + $0x50] sm:$0xff] }
0x3235   :  { %3104 = vmatpush.msrb.mxu2 %v3007_v58  ;;  %3150 = vmatpush.msrb.mxu1 %v3007_v58 }
0x3236   :  { %4033 = vmatmul.msk.f32.vlgmr.msrb.gmra.mxu1 %vm5919_vm7, %v3007_v58  ;;  %vm5930_vm7 = vmmov %vm5915_vm0  ;;  %v3629_v58 = vld [vmem:[%s5937_s22 + $0x48] sm:$0xff] }
0x3295   :  { %v3069_v11 = vpop.permute.xlu1 %3068 }
0x3296   :  { %v3071_v20 = vmul.f32 %v5012_v2, %v3069_v11 }
0x3298   :  { %v3072_v32 = vadd.f32 %v3071_v20, %v5474_v16  ;;  %v3222_v16 = vld [vmem:[%s5764_s4] sm:$0xff] }
0x329a   :  { %v3085_v41 = vmul.f32 %v4029_v14, %v3072_v32  ;;  %v3752_v32 = vld [vmem:[%s5937_s22 + $0xb8] sm:$0xff] }
0x329c   :  { %4030 = vmatmul.msk.f32.vlgmr.msrb.gmra.mxu2 %vm5920_vm5, %v3085_v41  ;;  %4031 = vmatpush.xpose.msk.msrb.mxu3 %vm5915_vm0, %v3085_v41  ;;  %vm5932_vm5 = vmmov %vm5915_vm0 }
0x329d   :  { %4035 = vmatpush.xpose.msk.msra.mxu2 %vm5921_vm15, %v3085_v41  ;;  %vm5933_vm15 = vmmov %vm5915_vm0 }
0x32a0   :  { %3217 = vmatpush.msra.mxu3 %v5201_v39 }
0x32a1   :  { %3285 = vmatpush.msrb.mxu2 %v3222_v16 }
0x32b3   :  { %v3152_v18 = vpop.f32.mrf.mxu1 }
0x32b4   :  { %3170 = vmatpush.msra.mxu0 %v3152_v18  ;;  %v3750_v18 = vld [vmem:[%s5937_s22 + $0xa8] sm:$0xff] }
0x32b5   :  { %4034 = vmatmul.msk.f32.vlgmr.msra.gmra.mxu0 %vm5922_vm10, %v3085_v41  ;;  %vm5934_vm10 = vmmov %vm5915_vm0  ;;  %v3751_v41 = vld [vmem:[%s5937_s22 + $0xb0] sm:$0xff] }
0x32b6   :  { %3262 = vmatpush.msrb.mxu0 %v3243_v6  ;;  %v3749_v6 = vld [vmem:[%s5937_s22 + $0xa0] sm:$0xff] }
0x32b8   :  { %3356 = vmatpush.msra.mxu0 %v5201_v39 }
0x331f   :  { %v3106_v7 = vpop.f32.mrf.mxu2 }
0x3320   :  { %4032 = vmatmul.msk.f32.vlgmr.msrb.gmra.mxu3 %vm5923_vm8, %v3106_v7  ;;  %vm5935_vm8 = vmmov %vm5915_vm0 }
0x3321   :  { %3308 = vmatpush.msrb.mxu3 %v5201_v39 }
0x3328   :  { %4037 = vmatmul.msk.f32.vlgmr.msra.gmra.mxu3 %vm5924_vm1, %v5560_v22  ;;  %vm5936_vm1 = vmmov %vm5915_vm0 }
0x3329   :  { %3402 = vmatpush.msra.mxu3 %v3386_v4 }
0x3332   :  { %v3172_v2 = vpop.f32.mrf.mxu0 }
0x3333   :  { %4036 = vmatmul.msk.f32.vlgmr.msra.gmra.mxu2 %vm5925_vm14, %v3172_v2  ;;  %vm5939_vm14 = vmmov %vm5915_vm0 }
0x3334   :  { %3380 = vmatpush.msra.mxu2 %v3361_v60 }
0x33a3   :  { %v5574_v63 = vpop.f32.mrf.mxu3 }
0x33a4   :  { %4041 = vmatmul.msk.f32.vlgmr.msrb.gmra.mxu3 %vm5926_vm13, %v5574_v63  ;;  %vm5940_vm13 = vmmov %vm5915_vm0 }
0x33a5   :  { %3502 = vmatpush.msrb.mxu3 %v3483_v48 }
0x33ab   :  { %v3219_v12 = vpop.f32.mrf.mxu3 }
0x33ac   :  { %3238 = vmatpush.msra.mxu1 %v3219_v12  ;;  %4040 = vmatmul.msk.f32.vlgmr.msrb.gmra.mxu2 %vm5927_vm6, %v3219_v12  ;;  %vm5941_vm6 = vmmov %vm5915_vm0 }
0x33ad   :  { %4045 = vmatmul.msk.f32.vlgmr.msra.gmra.mxu3 %vm5928_vm9, %v3219_v12  ;;  %3478 = vmatpush.msrb.mxu2 %v5201_v39  ;;  %vm5942_vm9 = vmmov %vm5915_vm0  ;;  %v3799_v12 = vld [vmem:[%s5937_s22 + $0xd0] sm:$0xff] }
0x33ae   :  { %4038 = vmatmul.msk.f32.vlgmr.msra.gmra.mxu1 %vm5929_vm3, %v5560_v22  ;;  %3600 = vmatpush.msra.mxu3 %v3537_v43  ;;  %vm5943_vm3 = vmmov %vm5915_vm0  ;;  %v4193_v43 = vld [vmem:[#allocation2] ss:$0 sm:$0xff] }
0x33af   :  { %3332 = vmatpush.msrb.mxu1 %v3313_v33  ;;  %v3798_v33 = vld [vmem:[%s5937_s22 + $0xc8] sm:$0xff] }
0x33b0   :  { %3601 = vmatpush.msra.mxu3 %v3536_v53 }
0x33b1   :  { %3428 = vmatpush.msra.mxu1 %v5201_v39  ;;  %v3433_v39 = vld [vmem:[%s5764_s4 + $0x28] sm:$0xff] }
0x33b2   :  { %3602 = vmatpush.msra.mxu3 %v3535_v29 }
0x33b4   :  { %3603 = vmatpush.msra.mxu3 %v3534_v62 }
0x33b6   :  { %v5596_v35 = vpop.f32.mrf.mxu2 }
0x3427   :  { %v3310_v44 = vpop.f32.mrf.mxu3 }
0x3428   :  { %4042 = vmatmul.msk.f32.vlgmr.msrb.gmra.mxu1 %vm5930_vm7, %v3310_v44  ;;  %vm5944_vm7 = vmmov %vm5915_vm0  ;;  %v3797_v44 = vld [vmem:[%s5937_s22 + $0xc0] sm:$0xff] }
0x342b   :  { %v3240_v55 = vpop.f32.mrf.mxu1 }
0x342c   :  { %4039 = vmatmul.msk.f32.vlgmr.msrb.gmra.mxu0 %vm5931_vm12, %v3240_v55 }
0x342d   :  { %3452 = vmatpush.msrb.mxu0 %v3433_v39  ;;  %v3833_v39 = vld [vmem:[%s5945_s29 + $0x18] sm:$0xff] }
0x342f   :  { %v3287_v54 = vpop.f32.mrf.mxu2 }
0x3430   :  { %4047 = vmatmul.msk.f32.vlgmr.msra.gmra.mxu1 %vm5932_vm5, %v5592_v57  ;;  %v3404_v21 = vpop.f32.mrf.mxu3 }
0x3434   :  { %4043 = vmatmul.msk.f32.vlgmr.msra.gmra.mxu0 %vm5915_vm0, %v5596_v35 }
0x34a5   :  { %v3334_v51 = vpop.f32.mrf.mxu1 }
0x34a9   :  { %v3264_v52 = vpop.f32.mrf.mxu0 }
0x34aa   :  { %v3288_v40 = vadd.f32 %v3287_v54, %v3264_v52  ;;  %v3832_v54 = vld [vmem:[%s5945_s29 + $0x10] sm:$0xff] }
0x34ab   :  { %v3863_v52 = vld [vmem:[%s5946_s18 + $0x10] sm:$0xff] }
0x34ac   :  { %v3337_v46 = vadd.f32 %v3334_v51, %v3288_v40  ;;  %v3864_v51 = vld [vmem:[%s5946_s18 + $0x18] sm:$0xff]  ;;  %v3831_v40 = vld [vmem:[%s5945_s29 + $0x8] sm:$0xff] }
0x34ad   :  { %v3430_v10 = vpop.f32.mrf.mxu1 }
0x34ae   :  { %4048 = vmatmul.msk.f32.vlgmr.msrb.gmra.mxu0 %vm5933_vm15, %v3430_v10  ;;  %v3830_v10 = vld [vmem:[%s5945_s29] sm:$0xff] }
0x34b1   :  { %v3358_v36 = vpop.f32.mrf.mxu0 }
0x34b2   :  { %4044 = vmatmul.msk.f32.vlgmr.msra.gmra.mxu2 %vm5934_vm10, %v3358_v36  ;;  %v3861_v36 = vld [vmem:[%s5946_s18] sm:$0xff] }
0x34b3   :  { %3577 = vmatpush.msra.mxu2 %v3561_v15 }
0x34b5   :  { %3578 = vmatpush.msra.mxu2 %v3560_v38 }
0x34b7   :  { %3579 = vmatpush.msra.mxu2 %v3559_v49 }
0x34b9   :  { %3580 = vmatpush.msra.mxu2 %v3558_v26 }
0x34ba   :  { %4050 = vmatmul.msk.f32.vlgmr.msrb.gmra.mxu2 %vm5935_vm8, %v5608_v13 }
0x352b   :  { %v3454_v5 = vpop.f32.mrf.mxu0 }
0x3535   :  { %v3382_v19 = vpop.f32.mrf.mxu2 }
0x3536   :  { %v3385_v37 = vadd.f32 %v3382_v19, %v3337_v46  ;;  %v3862_v46 = vld [vmem:[%s5946_s18 + $0x8] sm:$0xff] }
0x3538   :  { %v3407_v24 = vadd.f32 %v3404_v21, %v3385_v37 }
0x353a   :  { %v3457_v8 = vadd.f32 %v3454_v5, %v3407_v24 }
0x353d   :  { %v3480_v30 = vpop.f32.mrf.mxu2 }
0x353e   :  { %4051 = vmatmul.msk.f32.vlgmr.msrb.gmra.mxu3 %vm5936_vm1, %v3480_v30  ;;  %v4191_v30 = vld [vmem:[%s5947_s27] ss:$0 sm:$0xff] }
0x353f   :  { %3695 = vmatpush.msrb.mxu3 %v3679_v42 }
0x3541   :  { %3696 = vmatpush.msrb.mxu3 %v3678_v47 }
0x3543   :  { %3697 = vmatpush.msrb.mxu3 %v3677_v45 }
0x3545   :  { %3698 = vmatpush.msrb.mxu3 %v3676_v17 }
0x35c1   :  { %v3504_v9 = vpop.f32.mrf.mxu3 }
0x35c2   :  { %v3507_v0 = vadd.f32 %v3504_v9, %v3457_v8 }
0x35c4   :  { %v3511_v50 = vadd.f32 %v4190_v28, %v3507_v0 }
0x35c6   :  { %v3512_v59 = vmax.f32 %v3511_v50, 0.0 }
0x35c8   :  { %3529 = vmatpush.msrb.mxu1 %v3512_v59  ;;  %3671 = vmatpush.msrb.mxu2 %v3512_v59 }
0x35c9   :  { %4052 = vmatmul.msk.f32.vlgmr.msrb.gmra.mxu1 %vm5939_vm14, %v5560_v22 }
0x35ca   :  { %3623 = vmatpush.msra.mxu1 %v3512_v59 }
0x35cc   :  { %3720 = vmatpush.msrb.mxu1 %v3707_v23 }
0x35ce   :  { %3721 = vmatpush.msrb.mxu1 %v3706_v61  ;;  %v4192_v61 = vld [vmem:[%s5948_s24] ss:$0 sm:$0xff] }
0x35d0   :  { %3722 = vmatpush.msrb.mxu1 %v3705_v27 }
0x35d1   :  { %4056 = vmatmul.msk.f32.vlgmr.msra.gmra.mxu1 %vm5940_vm13, %v5574_v63  ;;  %v3800_v63 = vld [vmem:[%s5937_s22 + $0xd8] sm:$0xff] }
0x35d2   :  { %3723 = vmatpush.msrb.mxu1 %v3704_v25 }
0x35d4   :  { %3816 = vmatpush.msra.mxu1 %v3800_v63 }
0x35d6   :  { %3817 = vmatpush.msra.mxu1 %v3799_v12 }
0x35d8   :  { %3818 = vmatpush.msra.mxu1 %v3798_v33 }
0x35da   :  { %3819 = vmatpush.msra.mxu1 %v3797_v44 }
0x3646   :  { %v3531_v34 = vpop.f32.mrf.mxu1 }
0x3647   :  { %3553 = vmatpush.msra.mxu0 %v3531_v34  ;;  %4055 = vmatmul.msk.f32.vlgmr.msra.gmra.mxu3 %vm1665_vm4, %v3531_v34 }
0x3648   :  { %4060 = vmatmul.msk.f32.vlgmr.msrb.gmra.mxu1 %vm1665_vm4, %v3531_v34  ;;  %3792 = vmatpush.msra.mxu3 %v3512_v59 }
0x3649   :  { %4053 = vmatmul.msk.f32.vlgmr.msra.gmra.mxu0 %vm5941_vm6, %v5560_v22 }
0x364a   :  { %3647 = vmatpush.msrb.mxu0 %v3631_v31 }
0x364c   :  { %3648 = vmatpush.msrb.mxu0 %v3630_v56 }
0x364e   :  { %3649 = vmatpush.msrb.mxu0 %v3629_v58  ;;  %v3625_v11 = vpop.f32.mrf.mxu1 }
0x3650   :  { %3650 = vmatpush.msrb.mxu0 %v3628_v1 }
0x3651   :  { %4057 = vmatmul.msk.f32.vlgmr.msrb.gmra.mxu0 %vm1665_vm4, %v3625_v11 }
0x3652   :  { %3744 = vmatpush.msra.mxu0 %v3512_v59 }
0x3654   :  { %3853 = vmatpush.msrb.mxu0 %v3833_v39 }
0x3656   :  { %3854 = vmatpush.msrb.mxu0 %v3832_v54 }
0x3658   :  { %3855 = vmatpush.msrb.mxu0 %v3831_v40 }
0x3659   :  { %4061 = vmatmul.msk.f32.vlgmr.msra.gmra.mxu0 %vm5942_vm9, %v5592_v57 }
0x365a   :  { %3856 = vmatpush.msrb.mxu0 %v3830_v10 }
0x36c6   :  { %v3555_v20 = vpop.f32.mrf.mxu0 }
0x36c7   :  { %4054 = vmatmul.msk.f32.vlgmr.msra.gmra.mxu2 %vm1665_vm4, %v3555_v20 }
0x36c8   :  { %3768 = vmatpush.msra.mxu2 %v3752_v32 }
0x36ca   :  { %3769 = vmatpush.msra.mxu2 %v3751_v41  ;;  %v3605_v22 = vpop.f32.mrf.mxu3 }
0x36cc   :  { %3770 = vmatpush.msra.mxu2 %v3750_v18 }
0x36ce   :  { %v3652_v14 = vpop.f32.mrf.mxu0  ;;  %3771 = vmatpush.msra.mxu2 %v3749_v6 }
0x36cf   :  { %4058 = vmatmul.msk.f32.vlgmr.msrb.gmra.mxu2 %vm5943_vm3, %v5596_v35 }
0x36d0   :  { %3881 = vmatpush.msrb.mxu2 %v3864_v51 }
0x36d2   :  { %3882 = vmatpush.msrb.mxu2 %v3863_v52 }
0x36d4   :  { %3883 = vmatpush.msrb.mxu2 %v3862_v46 }
0x36d6   :  { %v3746_v7 = vpop.f32.mrf.mxu0  ;;  %3884 = vmatpush.msrb.mxu2 %v3861_v36 }
0x36d7   :  { %4062 = vmatmul.msk.f32.vlgmr.msra.gmra.mxu2 %vm1665_vm4, %v3746_v7 }
0x374a   :  { %v3582_v2 = vpop.f32.mrf.mxu2 }
0x374b   :  { %v3606_v16 = vadd.f32 %v3605_v22, %v3582_v2 }
0x374d   :  { %v3655_v60 = vadd.f32 %v3652_v14, %v3606_v16 }
0x3752   :  { %v3673_v4 = vpop.f32.mrf.mxu2 }
0x3753   :  { %4059 = vmatmul.msk.f32.vlgmr.msrb.gmra.mxu3 %vm1665_vm4, %v3673_v4 }
0x375a   :  { %v3773_v19 = vpop.f32.mrf.mxu2 }
0x375b   :  { %4063 = vmatmul.msk.f32.vlgmr.msra.gmra.mxu3 %vm5944_vm7, %v5608_v13  ;;  %v3725_v13 = vpop.f32.mrf.mxu1 }
0x37d6   :  { %v3700_v55 = vpop.f32.mrf.mxu3 }
0x37d7   :  { %v3703_v57 = vadd.f32 %v3700_v55, %v3655_v60 }
0x37d9   :  { %v3728_v48 = vadd.f32 %v3725_v13, %v3703_v57 }
0x37db   :  { %v3776_v37 = vadd.f32 %v3773_v19, %v3728_v48 }
0x37de   :  { %v3794_v35 = vpop.f32.mrf.mxu3 }
0x37df   :  { %4064 = vmatmul.msk.f32.vlgmr.msra.gmra.mxu1 %vm1665_vm4, %v3794_v35 }
0x385c   :  { %v3821_v15 = vpop.f32.mrf.mxu1 }
0x385d   :  { %v3824_v38 = vadd.f32 %v3821_v15, %v3776_v37 }
0x385f   :  { %v3828_v49 = vadd.f32 %v4191_v30, %v3824_v38 }
0x3861   :  { %v3829_v26 = vmax.f32 %v3828_v49, 0.0 }
0x3863   :  { %4065 = vmatmul.msk.f32.vlgmr.msrb.gmra.mxu0 %vm1665_vm4, %v3829_v26  ;;  %4066 = vmatmul.msk.f32.vlgmr.msrb.gmra.mxu2 %vm1665_vm4, %v3829_v26 }
0x38e0   :  { %v3858_v27 = vpop.f32.mrf.mxu0 }
0x38e1   :  { %v3859_v17 = vadd.f32 %v4192_v61, %v3858_v27 }
0x38e6   :  { %v3886_v53 = vpop.f32.mrf.mxu2 }
0x38e7   :  { %v3887_v29 = vadd.f32 %v4193_v43, %v3886_v53 }
0x38e9   :  { %v3889_v62 = vsub.f32 0.0, %v3887_v29 }
0x38eb   :  { %v3890_v42 = vmul.f32 1.442695, %v3889_v62 }
0x38ed   :  { %4286 = vpow2.f32 %v3890_v42 }
0x38f3   :  { %v4287_v47 = vpop.eup %4286 }
0x38f4   :  { %v3892_v21 = vadd.f32 1.0, %v4287_v47 }
0x38f6   :  { %4288 = vrcp.f32 %v3892_v21  ;;  %v3904_v8 = vand.u32 2147483648, %v3892_v21  ;;  %v3902_v9 = vand.u32 2147483647, %v3892_v21  ;;  %vm3898_vm5 = vweird.f32 %v3892_v21 }
0x38f8   :  { %v3905_v50 = vor.u32 1.1754944e-38, %v3904_v8  ;;  %vm3903_vm4 = vcmp.eq.f32.partialorder %v3902_v9, 8.507059e+37 }
0x38fc   :  { %v4289_v45 = vpop.eup %4288 }
0x38fd   :  { %v3894_v24 = vmul.f32 %v4289_v45, %v3892_v21  ;;  %vm3899_vm12 = vweird.f32 %v4289_v45 }
0x38fe   :  { %vm3900_vm0 = vmor %vm3898_vm5, %vm3899_vm12 }
0x38ff   :  { %v3895_v5 = vsub.f32 1.0, %v3894_v24 }
0x3901   :  { %v3896_v28 = vmul.f32 %v4289_v45, %v3895_v5 }
0x3903   :  { %v3897_v0 = vadd.f32 %v4289_v45, %v3896_v28 }
0x3905   :  { %v3901_v59 = vsel %vm3900_vm0, %v4289_v45, %v3897_v0 }
0x3906   :  { %v3906_v23 = vsel %vm3903_vm4, %v3905_v50, %v3901_v59 }
0x3907   :  { %3910 = vperm.xlu2 %4185, %v3906_v23  }
0x3961   :  { %v3911_v25 = vpop.permute.xlu2 %3910 }
0x3962   :  { %v3913_v34 = vmul.f32 %v3911_v25, %v3859_v17 }
0x3964   :  { %v3914_v31 = vsel %vm2018_vm11, %v3913_v34, 0.0 }
0x3965   :  { %v3915_v56 = vrot.slane %v3914_v31, 4 }
0x3967   :  { %v3916_v58 = vadd.f32 %v3915_v56, %v3914_v31 }
0x3969   :  { %v3917_v1 = vrot.slane %v3916_v58, 2 }
0x396b   :  { %v3918_v11 = vadd.f32 %v3917_v1, %v3916_v58 }
0x396d   :  { %v3919_v20 = vrot.slane %v3918_v11, 1 }
0x396f   :  { %v3920_v32 = vadd.f32 %v3919_v20, %v3918_v11 }
0x3971   :  { %v3921_v14 = vmul.f32 %v3920_v32, %v5478_v3 }
0x3973   :  { %3922 = vst.msk [vmem:[#allocation3 + $0x1] sm:$0x1] %vm2034_vm2, %v3921_v14 }
0x3974   :  { %3933 = dma.vmem_to_hbm [thread:$0]  %s3929_s17, 32, %s3931_s0, [#allocation4]  }
0x3975   :  { %4316 = dma.done.wait [#allocation4], 32  }
0x3976   :  { %4317 = vsyncadd [#allocation4], 4294967264 }
0x3977   :  { %3938 = vsyncpa [#allocation4], 1 }

</bundles_post_ra>
